<compile_context>
chip_gen: v6e
topology: v6e:2x2x1
jax: 0.10.0
libtpu: 0.0.40
codegen_flags: <defaults>
</compile_context>

<pallas_src>
import functools
import math

import jax
import jax.numpy as jnp
from jax.experimental import pallas as pl
from jax.experimental.pallas import tpu as pltpu

EPS = 1e-5

ENC_LAYER_KEYS = ("wqkv", "bqkv", "wo", "bo", "ln1_g", "ln1_b",
                  "w1", "b1", "w2", "b2", "ln2_g", "ln2_b")
DEC_LAYER_KEYS = ("sa_wqkv", "sa_bqkv", "sa_wo", "sa_bo", "ln1_g", "ln1_b",
                  "ca_wq", "ca_bq", "ca_wkv", "ca_bkv", "ca_wo", "ca_bo",
                  "ln2_g", "ln2_b", "w1", "b1", "w2", "b2", "ln3_g", "ln3_b")


# ----------------------------- in-kernel helpers ----------------------------

def _ln(x, g, b):
    """LayerNorm over the last axis, single-pass mean / mean-of-squares."""
    mu = jnp.mean(x, axis=-1, keepdims=True)
    mu2 = jnp.mean(x * x, axis=-1, keepdims=True)
    var = jnp.maximum(mu2 - mu * mu, 0.0)
    return (x - mu) * jax.lax.rsqrt(var + EPS) * g + b


def _dot(a_f32, w_bf16, b_f32):
    """bf16-input MXU matmul with f32 accumulation + bias."""
    return jnp.dot(a_f32.astype(jnp.bfloat16), w_bf16,
                   preferred_element_type=jnp.float32) + b_f32


def _mha(q, k, v, wo, bo, num_heads):
    """Multi-head SDPA on 2D (seq, E) tensors, no mask.

    bf16 casts are hoisted out of the head loop; per-head context tiles are
    value-concatenated (no VMEM scratch, no masked partial stores) and the
    output projection is a single K=E matmul.  Softmax stays f32; the
    denominator uses the EUP approx reciprocal.
    """
    Sq, E = q.shape
    Dh = E // num_heads
    scale = 1.0 / math.sqrt(Dh)
    qb = (q * scale).astype(jnp.bfloat16)     # cast once (scale folded in)
    kb = k.astype(jnp.bfloat16)
    vb = v.astype(jnp.bfloat16)
    ctx = []
    for h in range(num_heads):
        sl = slice(h * Dh, (h + 1) * Dh)
        # (Sq, Dh) x (Sk, Dh)^T -> (Sq, Sk), f32 accumulation
        s = jax.lax.dot_general(qb[:, sl], kb[:, sl],
                                (((1,), (1,)), ((), ())),
                                preferred_element_type=jnp.float32)
        s = s - jnp.max(s, axis=-1, keepdims=True)
        p = jnp.exp(s)
        p = p * pl.reciprocal(jnp.sum(p, axis=-1, keepdims=True), approx=True)
        ctx.append(jnp.dot(p.astype(jnp.bfloat16), vb[:, sl],
                           preferred_element_type=jnp.float32))
    ctx = jnp.concatenate(ctx, axis=-1)       # (Sq, E) f32, value-level
    return _dot(ctx, wo, bo)


# ------------------------------ fused kernels --------------------------------

def _enc_stack_kernel(num_heads,
                      x_ref,
                      wqkv_ref, bqkv_ref, wo_ref, bo_ref,
                      ln1g_ref, ln1b_ref,
                      w1_ref, b1_ref, w2_ref, b2_ref,
                      ln2g_ref, ln2b_ref,
                      encg_ref, encb_ref,
                      o_ref, state):
    """One grid step = one encoder layer for one batch element (grid=(B, L))."""
    l = pl.program_id(1)

    @pl.when(l == 0)
    def _():
        state[...] = x_ref[...]               # load embeddings once per batch

    x = state[...]                            # (S, E) f32, resident in VMEM
    E = x.shape[-1]

    qkv = _dot(x, wqkv_ref[...], bqkv_ref[...])          # packed QKV (S, 3E)
    attn = _mha(qkv[:, :E], qkv[:, E:2 * E], qkv[:, 2 * E:],
                wo_ref[...], bo_ref[...], num_heads)
    x = _ln(x + attn, ln1g_ref[...], ln1b_ref[...])      # post-norm

    h = jnp.maximum(_dot(x, w1_ref[...], b1_ref[...]), 0.0)   # ReLU FFN
    f = _dot(h, w2_ref[...], b2_ref[...])
    y = _ln(x + f, ln2g_ref[...], ln2b_ref[...])
    state[...] = y

    @pl.when(l == pl.num_programs(1) - 1)
    def _():                                  # encoder final norm folded in
        o_ref[...] = _ln(y, encg_ref[...], encb_ref[...])


def _dec_stack_kernel(num_heads,
                      x_ref, m_ref,
                      sa_wqkv_ref, sa_bqkv_ref, sa_wo_ref, sa_bo_ref,
                      ln1g_ref, ln1b_ref,
                      ca_wq_ref, ca_bq_ref, ca_wkv_ref, ca_bkv_ref,
                      ca_wo_ref, ca_bo_ref,
                      ln2g_ref, ln2b_ref,
                      w1_ref, b1_ref, w2_ref, b2_ref,
                      ln3g_ref, ln3b_ref,
                      decg_ref, decb_ref, fcw_ref, fcb_ref,
                      o_ref, state):
    """One grid step = one decoder layer for one batch element (grid=(B, L))."""
    l = pl.program_id(1)

    @pl.when(l == 0)
    def _():
        state[...] = x_ref[...]

    x = state[...]                            # (T, E)
    mem = m_ref[...]                          # (S, E), resident across layers
    E = x.shape[-1]

    # --- self-attention (packed QKV, unmasked as in the reference forward) ---
    qkv = _dot(x, sa_wqkv_ref[...], sa_bqkv_ref[...])
    sa = _mha(qkv[:, :E], qkv[:, E:2 * E], qkv[:, 2 * E:],
              sa_wo_ref[...], sa_bo_ref[...], num_heads)
    x = _ln(x + sa, ln1g_ref[...], ln1b_ref[...])

    # --- cross-attention (Q from tgt, packed KV from memory) ---
    q = _dot(x, ca_wq_ref[...], ca_bq_ref[...])
    kv = _dot(mem, ca_wkv_ref[...], ca_bkv_ref[...])
    ca = _mha(q, kv[:, :E], kv[:, E:],
              ca_wo_ref[...], ca_bo_ref[...], num_heads)
    x = _ln(x + ca, ln2g_ref[...], ln2b_ref[...])

    # --- FFN ---
    h = jnp.maximum(_dot(x, w1_ref[...], b1_ref[...]), 0.0)
    f = _dot(h, w2_ref[...], b2_ref[...])
    y = _ln(x + f, ln3g_ref[...], ln3b_ref[...])
    state[...] = y

    @pl.when(l == pl.num_programs(1) - 1)
    def _():                                  # final norm + vocab proj folded in
        z = _ln(y, decg_ref[...], decb_ref[...])
        o_ref[...] = _dot(z, fcw_ref[...], fcb_ref[...])   # lane-dense (128) out


# ------------------------------ Python wrappers ------------------------------

def _layer_spec(arr):
    # stacked per-layer param (L, r, c) -> kernel sees (r, c) of layer l
    return pl.BlockSpec((None,) + arr.shape[1:], lambda b, l: (l, 0, 0))


def _fixed_spec(arr):
    # non-stacked (r, c) param, resident for the whole grid
    return pl.BlockSpec(arr.shape, lambda b, l: (0, 0))


def _compiler_params():
    return pltpu.CompilerParams(
        dimension_semantics=("parallel", "arbitrary"),
        vmem_limit_bytes=32 * 1024 * 1024)


def encoder_stack(x, params, num_heads):
    B, S, E = x.shape
    pe = params["enc"]
    L = pe["wqkv"].shape[0]
    layer_args = [pe[k] for k in ENC_LAYER_KEYS]
    fixed_args = [params["enc_norm_g"], params["enc_norm_b"]]
    grid_spec = pltpu.PrefetchScalarGridSpec(
        num_scalar_prefetch=0,
        grid=(B, L),
        in_specs=[pl.BlockSpec((None, S, E), lambda b, l: (b, 0, 0))]
                 + [_layer_spec(a) for a in layer_args]
                 + [_fixed_spec(a) for a in fixed_args],
        out_specs=pl.BlockSpec((None, S, E), lambda b, l: (b, 0, 0)),
        scratch_shapes=[pltpu.VMEM((S, E), jnp.float32)],
    )
    return pl.pallas_call(
        functools.partial(_enc_stack_kernel, num_heads),
        grid_spec=grid_spec,
        out_shape=jax.ShapeDtypeStruct((B, S, E), jnp.float32),
        compiler_params=_compiler_params(),
    )(x, *layer_args, *fixed_args)


def decoder_stack(x, memory, params, num_heads):
    B, T, E = x.shape
    S = memory.shape[1]
    pd = params["dec"]
    L = pd["sa_wqkv"].shape[0]
    VP = params["fc_w"].shape[1]              # vocab padded to 128 lanes
    layer_args = [pd[k] for k in DEC_LAYER_KEYS]
    fixed_args = [params["dec_norm_g"], params["dec_norm_b"],
                  params["fc_w"], params["fc_b"]]
    grid_spec = pltpu.PrefetchScalarGridSpec(
        num_scalar_prefetch=0,
        grid=(B, L),
        in_specs=[pl.BlockSpec((None, T, E), lambda b, l: (b, 0, 0)),
                  pl.BlockSpec((None, S, E), lambda b, l: (b, 0, 0))]
                 + [_layer_spec(a) for a in layer_args]
                 + [_fixed_spec(a) for a in fixed_args],
        out_specs=pl.BlockSpec((None, T, VP), lambda b, l: (b, 0, 0)),
        scratch_shapes=[pltpu.VMEM((T, E), jnp.float32)],
    )
    return pl.pallas_call(
        functools.partial(_dec_stack_kernel, num_heads),
        grid_spec=grid_spec,
        out_shape=jax.ShapeDtypeStruct((B, T, VP), jnp.float32),
        compiler_params=_compiler_params(),
    )(x, memory, *layer_args, *fixed_args)


def forward(params, src_ids, tgt_ids, num_heads):
    emb = params["embedding"]
    vocab = emb.shape[0]
    src = jnp.take(emb, src_ids, axis=0)      # (B, S, E) embedding gather (glue)
    tgt = jnp.take(emb, tgt_ids, axis=0)      # (B, T, E)

    mem = encoder_stack(src, params, num_heads)           # 1 pallas_call
    logits_pad = decoder_stack(tgt, mem, params, num_heads)   # 1 pallas_call
    return logits_pad[:, :, :vocab]           # drop 128-lane padding


# --------------------------- deterministic params ---------------------------

def _w(key, shape, scale=0.05):
    # matmul weights stored bf16 (MXU inputs); accumulation stays f32 in-kernel
    return (jax.random.normal(key, shape, jnp.float32) * scale).astype(jnp.bfloat16)


def _round_up(n, m):
    return ((n + m - 1) // m) * m


def _init_enc_layer(key, E, H):
    ks = jax.random.split(key, 4)
    return {
        "wqkv": _w(ks[0], (E, 3 * E)), "bqkv": jnp.zeros((1, 3 * E), jnp.float32),
        "wo": _w(ks[1], (E, E)), "bo": jnp.zeros((1, E), jnp.float32),
        "ln1_g": jnp.ones((1, E), jnp.float32), "ln1_b": jnp.zeros((1, E), jnp.float32),
        "w1": _w(ks[2], (E, H)), "b1": jnp.zeros((1, H), jnp.float32),
        "w2": _w(ks[3], (H, E)), "b2": jnp.zeros((1, E), jnp.float32),
        "ln2_g": jnp.ones((1, E), jnp.float32), "ln2_b": jnp.zeros((1, E), jnp.float32),
    }


def _init_dec_layer(key, E, H):
    ks = jax.random.split(key, 7)
    return {
        "sa_wqkv": _w(ks[0], (E, 3 * E)), "sa_bqkv": jnp.zeros((1, 3 * E), jnp.float32),
        "sa_wo": _w(ks[1], (E, E)), "sa_bo": jnp.zeros((1, E), jnp.float32),
        "ln1_g": jnp.ones((1, E), jnp.float32), "ln1_b": jnp.zeros((1, E), jnp.float32),
        "ca_wq": _w(ks[2], (E, E)), "ca_bq": jnp.zeros((1, E), jnp.float32),
        "ca_wkv": _w(ks[3], (E, 2 * E)), "ca_bkv": jnp.zeros((1, 2 * E), jnp.float32),
        "ca_wo": _w(ks[4], (E, E)), "ca_bo": jnp.zeros((1, E), jnp.float32),
        "ln2_g": jnp.ones((1, E), jnp.float32), "ln2_b": jnp.zeros((1, E), jnp.float32),
        "w1": _w(ks[5], (E, H)), "b1": jnp.zeros((1, H), jnp.float32),
        "w2": _w(ks[6], (H, E)), "b2": jnp.zeros((1, E), jnp.float32),
        "ln3_g": jnp.ones((1, E), jnp.float32), "ln3_b": jnp.zeros((1, E), jnp.float32),
    }


def _stack_layers(layer_dicts):
    # stack each per-layer param along a leading layer axis for the layer grid
    return {k: jnp.stack([d[k] for d in layer_dicts], axis=0)
            for k in layer_dicts[0]}


def init_params(key, vocab_size, embed_size, num_layers, hidden_size):
    ks = jax.random.split(key, 2 * num_layers + 2)
    enc_layers = [_init_enc_layer(ks[1 + i], embed_size, hidden_size)
                  for i in range(num_layers)]
    dec_layers = [_init_dec_layer(ks[1 + num_layers + i], embed_size, hidden_size)
                  for i in range(num_layers)]
    vp = _round_up(vocab_size, 128)           # lane-dense logits output
    fc_w = jnp.pad(_w(ks[-1], (embed_size, vocab_size)),
                   ((0, 0), (0, vp - vocab_size)))
    return {
        "embedding": jax.random.normal(ks[0], (vocab_size, embed_size), jnp.float32),
        "enc": _stack_layers(enc_layers),
        "dec": _stack_layers(dec_layers),
        "enc_norm_g": jnp.ones((1, embed_size), jnp.float32),
        "enc_norm_b": jnp.zeros((1, embed_size), jnp.float32),
        "dec_norm_g": jnp.ones((1, embed_size), jnp.float32),
        "dec_norm_b": jnp.zeros((1, embed_size), jnp.float32),
        "fc_w": fc_w,
        "fc_b": jnp.zeros((1, vp), jnp.float32),
    }


# --------------------------------- main --------------------------------------

if __name__ == "__main__":
    vocab_size, embed_size = 64, 32
    num_heads, num_layers = 4, 2
    hidden_size = 64          # dim_feedforward
    memory_size = 16          # unused in forward()
    B, S_src, S_tgt = 2, 8, 8

    key = jax.random.PRNGKey(0)
    kp, ks, kt = jax.random.split(key, 3)
    params = init_params(kp, vocab_size, embed_size, num_layers, hidden_size)

    src_ids = jax.random.randint(ks, (B, S_src), 0, vocab_size, jnp.int32)
    tgt_ids = jax.random.randint(kt, (B, S_tgt), 0, vocab_size, jnp.int32)

    run = jax.jit(functools.partial(forward, num_heads=num_heads))
    logits = run(params, src_ids, tgt_ids)
    jax.block_until_ready(logits)

    assert logits.shape == (B, S_tgt, vocab_size), logits.shape
    assert bool(jnp.all(jnp.isfinite(logits)))
    print("KERNEL_OK")
</pallas_src>

<mosaic_0001>
module attributes {stable_mosaic.version = 11 : i64} {
  func.func @_enc_stack_kernel(%arg0: i32, %arg1: i32, %arg2: memref<1x8x32xf32, #tpu.memory_space<vmem>>, %arg3: memref<1x32x96xbf16, #tpu.memory_space<vmem>>, %arg4: memref<1x1x96xf32, #tpu.memory_space<vmem>>, %arg5: memref<1x32x32xbf16, #tpu.memory_space<vmem>>, %arg6: memref<1x1x32xf32, #tpu.memory_space<vmem>>, %arg7: memref<1x1x32xf32, #tpu.memory_space<vmem>>, %arg8: memref<1x1x32xf32, #tpu.memory_space<vmem>>, %arg9: memref<1x32x64xbf16, #tpu.memory_space<vmem>>, %arg10: memref<1x1x64xf32, #tpu.memory_space<vmem>>, %arg11: memref<1x64x32xbf16, #tpu.memory_space<vmem>>, %arg12: memref<1x1x32xf32, #tpu.memory_space<vmem>>, %arg13: memref<1x1x32xf32, #tpu.memory_space<vmem>>, %arg14: memref<1x1x32xf32, #tpu.memory_space<vmem>>, %arg15: memref<1x32xf32, #tpu.memory_space<vmem>>, %arg16: memref<1x32xf32, #tpu.memory_space<vmem>>, %arg17: memref<1x8x32xf32, #tpu.memory_space<vmem>>, %arg18: memref<8x32xf32, #tpu.memory_space<vmem>>) attributes {dimension_semantics = [#tpu.dimension_semantics<parallel>, #tpu.dimension_semantics<arbitrary>], iteration_bounds = array<i64: 2, 2>, scalar_prefetch = 0 : i64, scratch_operands = 1 : i64, tpu.core_type = #tpu.core_type<tc>, window_params = [{transform_indices = @transform_0, window_bounds = array<i64: 1, 8, 32>}, {transform_indices = @transform_1, window_bounds = array<i64: 1, 32, 96>}, {transform_indices = @transform_2, window_bounds = array<i64: 1, 1, 96>}, {transform_indices = @transform_3, window_bounds = array<i64: 1, 32, 32>}, {transform_indices = @transform_4, window_bounds = array<i64: 1, 1, 32>}, {transform_indices = @transform_5, window_bounds = array<i64: 1, 1, 32>}, {transform_indices = @transform_6, window_bounds = array<i64: 1, 1, 32>}, {transform_indices = @transform_7, window_bounds = array<i64: 1, 32, 64>}, {transform_indices = @transform_8, window_bounds = array<i64: 1, 1, 64>}, {transform_indices = @transform_9, window_bounds = array<i64: 1, 64, 32>}, {transform_indices = @transform_10, window_bounds = array<i64: 1, 1, 32>}, {transform_indices = @transform_11, window_bounds = array<i64: 1, 1, 32>}, {transform_indices = @transform_12, window_bounds = array<i64: 1, 1, 32>}, {pipeline_mode = #tpu.pipeline_mode<synchronous>, transform_indices = @transform_13, window_bounds = array<i64: 1, 32>}, {pipeline_mode = #tpu.pipeline_mode<synchronous>, transform_indices = @transform_14, window_bounds = array<i64: 1, 32>}, {transform_indices = @transform_15, window_bounds = array<i64: 1, 8, 32>}]} {
    %c0_i32 = arith.constant 0 : i32
    %0 = arith.cmpi eq, %arg1, %c0_i32 : i32
    %1 = arith.extui %0 : i1 to i32
    %c0_i32_0 = arith.constant 0 : i32
    %2 = arith.cmpi ne, %1, %c0_i32_0 : i32
    scf.if %2 {
      %c0_74 = arith.constant 0 : index
      %c0_75 = arith.constant 0 : index
      %c0_76 = arith.constant 0 : index
      %173 = vector.load %arg2[%c0_74, %c0_75, %c0_76] : memref<1x8x32xf32, #tpu.memory_space<vmem>>, vector<1x8x32xf32>
      %174 = vector.shape_cast %173 : vector<1x8x32xf32> to vector<8x32xf32>
      %c0_77 = arith.constant 0 : index
      %c0_78 = arith.constant 0 : index
      %175 = vector.load %arg18[%c0_77, %c0_78] : memref<8x32xf32, #tpu.memory_space<vmem>>, vector<8x32xf32>
      tpu.vector_store %arg18[%c0_77, %c0_78], %174 {strides = array<i32>} : memref<8x32xf32, #tpu.memory_space<vmem>>, vector<8x32xf32>,
    } else {
    }
    %c0 = arith.constant 0 : index
    %c0_1 = arith.constant 0 : index
    %3 = vector.load %arg18[%c0, %c0_1] : memref<8x32xf32, #tpu.memory_space<vmem>>, vector<8x32xf32>
    %c0_2 = arith.constant 0 : index
    %c0_3 = arith.constant 0 : index
    %c0_4 = arith.constant 0 : index
    %4 = vector.load %arg3[%c0_2, %c0_3, %c0_4] : memref<1x32x96xbf16, #tpu.memory_space<vmem>>, vector<1x32x96xbf16>
    %5 = vector.shape_cast %4 : vector<1x32x96xbf16> to vector<32x96xbf16>
    %c0_5 = arith.constant 0 : index
    %c0_6 = arith.constant 0 : index
    %c0_7 = arith.constant 0 : index
    %6 = vector.load %arg4[%c0_5, %c0_6, %c0_7] : memref<1x1x96xf32, #tpu.memory_space<vmem>>, vector<1x1x96xf32>
    %7 = vector.shape_cast %6 : vector<1x1x96xf32> to vector<1x96xf32>
    %8 = arith.truncf %3 : vector<8x32xf32> to vector<8x32xbf16>
    %cst = arith.constant dense<0.000000e+00> : vector<8x96xf32>
    %9 = tpu.matmul %8, %5, %cst {dimension_numbers = #tpu.dot_dimension_numbers<[1], [0], [0], [1], [0, 0, 1, 1], [], []>} : vector<8x32xbf16>, vector<32x96xbf16>, vector<8x96xf32> -> vector<8x96xf32>
    %10 = vector.broadcast %7 : vector<1x96xf32> to vector<8x96xf32>
    %11 = arith.addf %9, %10 : vector<8x96xf32>
    %12 = vector.extract_strided_slice %11 {offsets = [0, 0], sizes = [8, 32], strides = [1, 1]} : vector<8x96xf32> to vector<8x32xf32>
    %13 = vector.extract_strided_slice %11 {offsets = [0, 32], sizes = [8, 32], strides = [1, 1]} : vector<8x96xf32> to vector<8x32xf32>
    %14 = vector.extract_strided_slice %11 {offsets = [0, 64], sizes = [8, 32], strides = [1, 1]} : vector<8x96xf32> to vector<8x32xf32>
    %c0_8 = arith.constant 0 : index
    %c0_9 = arith.constant 0 : index
    %c0_10 = arith.constant 0 : index
    %15 = vector.load %arg5[%c0_8, %c0_9, %c0_10] : memref<1x32x32xbf16, #tpu.memory_space<vmem>>, vector<1x32x32xbf16>
    %16 = vector.shape_cast %15 : vector<1x32x32xbf16> to vector<32x32xbf16>
    %c0_11 = arith.constant 0 : index
    %c0_12 = arith.constant 0 : index
    %c0_13 = arith.constant 0 : index
    %17 = vector.load %arg6[%c0_11, %c0_12, %c0_13] : memref<1x1x32xf32, #tpu.memory_space<vmem>>, vector<1x1x32xf32>
    %18 = vector.shape_cast %17 : vector<1x1x32xf32> to vector<1x32xf32>
    %cst_14 = arith.constant 0.353553385 : f32
    %19 = vector.broadcast %cst_14 : f32 to vector<8x32xf32>
    %20 = arith.mulf %12, %19 : vector<8x32xf32>
    %21 = arith.truncf %20 : vector<8x32xf32> to vector<8x32xbf16>
    %22 = arith.truncf %13 : vector<8x32xf32> to vector<8x32xbf16>
    %23 = arith.truncf %14 : vector<8x32xf32> to vector<8x32xbf16>
    %24 = vector.extract_strided_slice %21 {offsets = [0, 0], sizes = [8, 8], strides = [1, 1]} : vector<8x32xbf16> to vector<8x8xbf16>
    %25 = vector.extract_strided_slice %22 {offsets = [0, 0], sizes = [8, 8], strides = [1, 1]} : vector<8x32xbf16> to vector<8x8xbf16>
    %cst_15 = arith.constant dense<0.000000e+00> : vector<8x8xf32>
    %26 = tpu.matmul %24, %25, %cst_15 {dimension_numbers = #tpu.dot_dimension_numbers<[1], [1], [0], [0], [0, 0, 1, 0], [], []>} : vector<8x8xbf16>, vector<8x8xbf16>, vector<8x8xf32> -> vector<8x8xf32>
    %cst_16 = arith.constant dense<0xFF800000> : vector<8xf32>
    %27 = vector.multi_reduction <maximumf>, %26, %cst_16 [1] : vector<8x8xf32> to vector<8xf32>
    %28 = vector.shape_cast %27 : vector<8xf32> to vector<8x1xf32>
    %29 = vector.broadcast %28 : vector<8x1xf32> to vector<8x8xf32>
    %30 = arith.subf %26, %29 : vector<8x8xf32>
    %31 = math.exp %30 : vector<8x8xf32>
    %cst_17 = arith.constant dense<0.000000e+00> : vector<8xf32>
    %32 = vector.multi_reduction <add>, %31, %cst_17 [1] : vector<8x8xf32> to vector<8xf32>
    %33 = vector.shape_cast %32 : vector<8xf32> to vector<8x1xf32>
    %34 = tpu.reciprocal %33 {approx = true} : vector<8x1xf32> -> vector<8x1xf32>
    %35 = vector.broadcast %34 : vector<8x1xf32> to vector<8x8xf32>
    %36 = arith.mulf %31, %35 : vector<8x8xf32>
    %37 = arith.truncf %36 : vector<8x8xf32> to vector<8x8xbf16>
    %38 = vector.extract_strided_slice %23 {offsets = [0, 0], sizes = [8, 8], strides = [1, 1]} : vector<8x32xbf16> to vector<8x8xbf16>
    %cst_18 = arith.constant dense<0.000000e+00> : vector<8x8xf32>
    %39 = tpu.matmul %37, %38, %cst_18 {dimension_numbers = #tpu.dot_dimension_numbers<[1], [0], [0], [1], [0, 0, 1, 1], [], []>} : vector<8x8xbf16>, vector<8x8xbf16>, vector<8x8xf32> -> vector<8x8xf32>
    %40 = vector.extract_strided_slice %21 {offsets = [0, 8], sizes = [8, 8], strides = [1, 1]} : vector<8x32xbf16> to vector<8x8xbf16>
    %41 = vector.extract_strided_slice %22 {offsets = [0, 8], sizes = [8, 8], strides = [1, 1]} : vector<8x32xbf16> to vector<8x8xbf16>
    %cst_19 = arith.constant dense<0.000000e+00> : vector<8x8xf32>
    %42 = tpu.matmul %40, %41, %cst_19 {dimension_numbers = #tpu.dot_dimension_numbers<[1], [1], [0], [0], [0, 0, 1, 0], [], []>} : vector<8x8xbf16>, vector<8x8xbf16>, vector<8x8xf32> -> vector<8x8xf32>
    %cst_20 = arith.constant dense<0xFF800000> : vector<8xf32>
    %43 = vector.multi_reduction <maximumf>, %42, %cst_20 [1] : vector<8x8xf32> to vector<8xf32>
    %44 = vector.shape_cast %43 : vector<8xf32> to vector<8x1xf32>
    %45 = vector.broadcast %44 : vector<8x1xf32> to vector<8x8xf32>
    %46 = arith.subf %42, %45 : vector<8x8xf32>
    %47 = math.exp %46 : vector<8x8xf32>
    %cst_21 = arith.constant dense<0.000000e+00> : vector<8xf32>
    %48 = vector.multi_reduction <add>, %47, %cst_21 [1] : vector<8x8xf32> to vector<8xf32>
    %49 = vector.shape_cast %48 : vector<8xf32> to vector<8x1xf32>
    %50 = tpu.reciprocal %49 {approx = true} : vector<8x1xf32> -> vector<8x1xf32>
    %51 = vector.broadcast %50 : vector<8x1xf32> to vector<8x8xf32>
    %52 = arith.mulf %47, %51 : vector<8x8xf32>
    %53 = arith.truncf %52 : vector<8x8xf32> to vector<8x8xbf16>
    %54 = vector.extract_strided_slice %23 {offsets = [0, 8], sizes = [8, 8], strides = [1, 1]} : vector<8x32xbf16> to vector<8x8xbf16>
    %cst_22 = arith.constant dense<0.000000e+00> : vector<8x8xf32>
    %55 = tpu.matmul %53, %54, %cst_22 {dimension_numbers = #tpu.dot_dimension_numbers<[1], [0], [0], [1], [0, 0, 1, 1], [], []>} : vector<8x8xbf16>, vector<8x8xbf16>, vector<8x8xf32> -> vector<8x8xf32>
    %56 = vector.extract_strided_slice %21 {offsets = [0, 16], sizes = [8, 8], strides = [1, 1]} : vector<8x32xbf16> to vector<8x8xbf16>
    %57 = vector.extract_strided_slice %22 {offsets = [0, 16], sizes = [8, 8], strides = [1, 1]} : vector<8x32xbf16> to vector<8x8xbf16>
    %cst_23 = arith.constant dense<0.000000e+00> : vector<8x8xf32>
    %58 = tpu.matmul %56, %57, %cst_23 {dimension_numbers = #tpu.dot_dimension_numbers<[1], [1], [0], [0], [0, 0, 1, 0], [], []>} : vector<8x8xbf16>, vector<8x8xbf16>, vector<8x8xf32> -> vector<8x8xf32>
    %cst_24 = arith.constant dense<0xFF800000> : vector<8xf32>
    %59 = vector.multi_reduction <maximumf>, %58, %cst_24 [1] : vector<8x8xf32> to vector<8xf32>
    %60 = vector.shape_cast %59 : vector<8xf32> to vector<8x1xf32>
    %61 = vector.broadcast %60 : vector<8x1xf32> to vector<8x8xf32>
    %62 = arith.subf %58, %61 : vector<8x8xf32>
    %63 = math.exp %62 : vector<8x8xf32>
    %cst_25 = arith.constant dense<0.000000e+00> : vector<8xf32>
    %64 = vector.multi_reduction <add>, %63, %cst_25 [1] : vector<8x8xf32> to vector<8xf32>
    %65 = vector.shape_cast %64 : vector<8xf32> to vector<8x1xf32>
    %66 = tpu.reciprocal %65 {approx = true} : vector<8x1xf32> -> vector<8x1xf32>
    %67 = vector.broadcast %66 : vector<8x1xf32> to vector<8x8xf32>
    %68 = arith.mulf %63, %67 : vector<8x8xf32>
    %69 = arith.truncf %68 : vector<8x8xf32> to vector<8x8xbf16>
    %70 = vector.extract_strided_slice %23 {offsets = [0, 16], sizes = [8, 8], strides = [1, 1]} : vector<8x32xbf16> to vector<8x8xbf16>
    %cst_26 = arith.constant dense<0.000000e+00> : vector<8x8xf32>
    %71 = tpu.matmul %69, %70, %cst_26 {dimension_numbers = #tpu.dot_dimension_numbers<[1], [0], [0], [1], [0, 0, 1, 1], [], []>} : vector<8x8xbf16>, vector<8x8xbf16>, vector<8x8xf32> -> vector<8x8xf32>
    %72 = vector.extract_strided_slice %21 {offsets = [0, 24], sizes = [8, 8], strides = [1, 1]} : vector<8x32xbf16> to vector<8x8xbf16>
    %73 = vector.extract_strided_slice %22 {offsets = [0, 24], sizes = [8, 8], strides = [1, 1]} : vector<8x32xbf16> to vector<8x8xbf16>
    %cst_27 = arith.constant dense<0.000000e+00> : vector<8x8xf32>
    %74 = tpu.matmul %72, %73, %cst_27 {dimension_numbers = #tpu.dot_dimension_numbers<[1], [1], [0], [0], [0, 0, 1, 0], [], []>} : vector<8x8xbf16>, vector<8x8xbf16>, vector<8x8xf32> -> vector<8x8xf32>
    %cst_28 = arith.constant dense<0xFF800000> : vector<8xf32>
    %75 = vector.multi_reduction <maximumf>, %74, %cst_28 [1] : vector<8x8xf32> to vector<8xf32>
    %76 = vector.shape_cast %75 : vector<8xf32> to vector<8x1xf32>
    %77 = vector.broadcast %76 : vector<8x1xf32> to vector<8x8xf32>
    %78 = arith.subf %74, %77 : vector<8x8xf32>
    %79 = math.exp %78 : vector<8x8xf32>
    %cst_29 = arith.constant dense<0.000000e+00> : vector<8xf32>
    %80 = vector.multi_reduction <add>, %79, %cst_29 [1] : vector<8x8xf32> to vector<8xf32>
    %81 = vector.shape_cast %80 : vector<8xf32> to vector<8x1xf32>
    %82 = tpu.reciprocal %81 {approx = true} : vector<8x1xf32> -> vector<8x1xf32>
    %83 = vector.broadcast %82 : vector<8x1xf32> to vector<8x8xf32>
    %84 = arith.mulf %79, %83 : vector<8x8xf32>
    %85 = arith.truncf %84 : vector<8x8xf32> to vector<8x8xbf16>
    %86 = vector.extract_strided_slice %23 {offsets = [0, 24], sizes = [8, 8], strides = [1, 1]} : vector<8x32xbf16> to vector<8x8xbf16>
    %cst_30 = arith.constant dense<0.000000e+00> : vector<8x8xf32>
    %87 = tpu.matmul %85, %86, %cst_30 {dimension_numbers = #tpu.dot_dimension_numbers<[1], [0], [0], [1], [0, 0, 1, 1], [], []>} : vector<8x8xbf16>, vector<8x8xbf16>, vector<8x8xf32> -> vector<8x8xf32>
    %88 = tpu.concatenate %39, %55, %71, %87 in 1 : vector<8x8xf32>, vector<8x8xf32>, vector<8x8xf32>, vector<8x8xf32> -> vector<8x32xf32>
    %89 = arith.truncf %88 : vector<8x32xf32> to vector<8x32xbf16>
    %cst_31 = arith.constant dense<0.000000e+00> : vector<8x32xf32>
    %90 = tpu.matmul %89, %16, %cst_31 {dimension_numbers = #tpu.dot_dimension_numbers<[1], [0], [0], [1], [0, 0, 1, 1], [], []>} : vector<8x32xbf16>, vector<32x32xbf16>, vector<8x32xf32> -> vector<8x32xf32>
    %91 = vector.broadcast %18 : vector<1x32xf32> to vector<8x32xf32>
    %92 = arith.addf %90, %91 : vector<8x32xf32>
    %93 = arith.addf %3, %92 : vector<8x32xf32>
    %c0_32 = arith.constant 0 : index
    %c0_33 = arith.constant 0 : index
    %c0_34 = arith.constant 0 : index
    %94 = vector.load %arg7[%c0_32, %c0_33, %c0_34] : memref<1x1x32xf32, #tpu.memory_space<vmem>>, vector<1x1x32xf32>
    %95 = vector.shape_cast %94 : vector<1x1x32xf32> to vector<1x32xf32>
    %c0_35 = arith.constant 0 : index
    %c0_36 = arith.constant 0 : index
    %c0_37 = arith.constant 0 : index
    %96 = vector.load %arg8[%c0_35, %c0_36, %c0_37] : memref<1x1x32xf32, #tpu.memory_space<vmem>>, vector<1x1x32xf32>
    %97 = vector.shape_cast %96 : vector<1x1x32xf32> to vector<1x32xf32>
    %cst_38 = arith.constant dense<0.000000e+00> : vector<8xf32>
    %98 = vector.multi_reduction <add>, %93, %cst_38 [1] : vector<8x32xf32> to vector<8xf32>
    %99 = vector.shape_cast %98 : vector<8xf32> to vector<8x1xf32>
    %cst_39 = arith.constant 3.200000e+01 : f32
    %100 = vector.broadcast %cst_39 : f32 to vector<8x1xf32>
    %101 = arith.divf %99, %100 : vector<8x1xf32>
    %102 = arith.mulf %93, %93 : vector<8x32xf32>
    %cst_40 = arith.constant dense<0.000000e+00> : vector<8xf32>
    %103 = vector.multi_reduction <add>, %102, %cst_40 [1] : vector<8x32xf32> to vector<8xf32>
    %104 = vector.shape_cast %103 : vector<8xf32> to vector<8x1xf32>
    %cst_41 = arith.constant 3.200000e+01 : f32
    %105 = vector.broadcast %cst_41 : f32 to vector<8x1xf32>
    %106 = arith.divf %104, %105 : vector<8x1xf32>
    %107 = arith.mulf %101, %101 : vector<8x1xf32>
    %108 = arith.subf %106, %107 : vector<8x1xf32>
    %cst_42 = arith.constant 0.000000e+00 : f32
    %109 = vector.broadcast %cst_42 : f32 to vector<8x1xf32>
    %110 = arith.maximumf %108, %109 : vector<8x1xf32>
    %111 = vector.broadcast %101 : vector<8x1xf32> to vector<8x32xf32>
    %112 = arith.subf %93, %111 : vector<8x32xf32>
    %cst_43 = arith.constant 9.99999974E-6 : f32
    %113 = vector.broadcast %cst_43 : f32 to vector<8x1xf32>
    %114 = arith.addf %110, %113 : vector<8x1xf32>
    %115 = math.rsqrt %114 : vector<8x1xf32>
    %116 = vector.broadcast %115 : vector<8x1xf32> to vector<8x32xf32>
    %117 = arith.mulf %112, %116 : vector<8x32xf32>
    %118 = vector.broadcast %95 : vector<1x32xf32> to vector<8x32xf32>
    %119 = arith.mulf %117, %118 : vector<8x32xf32>
    %120 = vector.broadcast %97 : vector<1x32xf32> to vector<8x32xf32>
    %121 = arith.addf %119, %120 : vector<8x32xf32>
    %c0_44 = arith.constant 0 : index
    %c0_45 = arith.constant 0 : index
    %c0_46 = arith.constant 0 : index
    %122 = vector.load %arg9[%c0_44, %c0_45, %c0_46] : memref<1x32x64xbf16, #tpu.memory_space<vmem>>, vector<1x32x64xbf16>
    %123 = vector.shape_cast %122 : vector<1x32x64xbf16> to vector<32x64xbf16>
    %c0_47 = arith.constant 0 : index
    %c0_48 = arith.constant 0 : index
    %c0_49 = arith.constant 0 : index
    %124 = vector.load %arg10[%c0_47, %c0_48, %c0_49] : memref<1x1x64xf32, #tpu.memory_space<vmem>>, vector<1x1x64xf32>
    %125 = vector.shape_cast %124 : vector<1x1x64xf32> to vector<1x64xf32>
    %126 = arith.truncf %121 : vector<8x32xf32> to vector<8x32xbf16>
    %cst_50 = arith.constant dense<0.000000e+00> : vector<8x64xf32>
    %127 = tpu.matmul %126, %123, %cst_50 {dimension_numbers = #tpu.dot_dimension_numbers<[1], [0], [0], [1], [0, 0, 1, 1], [], []>} : vector<8x32xbf16>, vector<32x64xbf16>, vector<8x64xf32> -> vector<8x64xf32>
    %128 = vector.broadcast %125 : vector<1x64xf32> to vector<8x64xf32>
    %129 = arith.addf %127, %128 : vector<8x64xf32>
    %cst_51 = arith.constant 0.000000e+00 : f32
    %130 = vector.broadcast %cst_51 : f32 to vector<8x64xf32>
    %131 = arith.maximumf %129, %130 : vector<8x64xf32>
    %c0_52 = arith.constant 0 : index
    %c0_53 = arith.constant 0 : index
    %c0_54 = arith.constant 0 : index
    %132 = vector.load %arg11[%c0_52, %c0_53, %c0_54] : memref<1x64x32xbf16, #tpu.memory_space<vmem>>, vector<1x64x32xbf16>
    %133 = vector.shape_cast %132 : vector<1x64x32xbf16> to vector<64x32xbf16>
    %c0_55 = arith.constant 0 : index
    %c0_56 = arith.constant 0 : index
    %c0_57 = arith.constant 0 : index
    %134 = vector.load %arg12[%c0_55, %c0_56, %c0_57] : memref<1x1x32xf32, #tpu.memory_space<vmem>>, vector<1x1x32xf32>
    %135 = vector.shape_cast %134 : vector<1x1x32xf32> to vector<1x32xf32>
    %136 = arith.truncf %131 : vector<8x64xf32> to vector<8x64xbf16>
    %cst_58 = arith.constant dense<0.000000e+00> : vector<8x32xf32>
    %137 = tpu.matmul %136, %133, %cst_58 {dimension_numbers = #tpu.dot_dimension_numbers<[1], [0], [0], [1], [0, 0, 1, 1], [], []>} : vector<8x64xbf16>, vector<64x32xbf16>, vector<8x32xf32> -> vector<8x32xf32>
    %138 = vector.broadcast %135 : vector<1x32xf32> to vector<8x32xf32>
    %139 = arith.addf %137, %138 : vector<8x32xf32>
    %140 = arith.addf %121, %139 : vector<8x32xf32>
    %c0_59 = arith.constant 0 : index
    %c0_60 = arith.constant 0 : index
    %c0_61 = arith.constant 0 : index
    %141 = vector.load %arg13[%c0_59, %c0_60, %c0_61] : memref<1x1x32xf32, #tpu.memory_space<vmem>>, vector<1x1x32xf32>
    %142 = vector.shape_cast %141 : vector<1x1x32xf32> to vector<1x32xf32>
    %c0_62 = arith.constant 0 : index
    %c0_63 = arith.constant 0 : index
    %c0_64 = arith.constant 0 : index
    %143 = vector.load %arg14[%c0_62, %c0_63, %c0_64] : memref<1x1x32xf32, #tpu.memory_space<vmem>>, vector<1x1x32xf32>
    %144 = vector.shape_cast %143 : vector<1x1x32xf32> to vector<1x32xf32>
    %cst_65 = arith.constant dense<0.000000e+00> : vector<8xf32>
    %145 = vector.multi_reduction <add>, %140, %cst_65 [1] : vector<8x32xf32> to vector<8xf32>
    %146 = vector.shape_cast %145 : vector<8xf32> to vector<8x1xf32>
    %cst_66 = arith.constant 3.200000e+01 : f32
    %147 = vector.broadcast %cst_66 : f32 to vector<8x1xf32>
    %148 = arith.divf %146, %147 : vector<8x1xf32>
    %149 = arith.mulf %140, %140 : vector<8x32xf32>
    %cst_67 = arith.constant dense<0.000000e+00> : vector<8xf32>
    %150 = vector.multi_reduction <add>, %149, %cst_67 [1] : vector<8x32xf32> to vector<8xf32>
    %151 = vector.shape_cast %150 : vector<8xf32> to vector<8x1xf32>
    %cst_68 = arith.constant 3.200000e+01 : f32
    %152 = vector.broadcast %cst_68 : f32 to vector<8x1xf32>
    %153 = arith.divf %151, %152 : vector<8x1xf32>
    %154 = arith.mulf %148, %148 : vector<8x1xf32>
    %155 = arith.subf %153, %154 : vector<8x1xf32>
    %cst_69 = arith.constant 0.000000e+00 : f32
    %156 = vector.broadcast %cst_69 : f32 to vector<8x1xf32>
    %157 = arith.maximumf %155, %156 : vector<8x1xf32>
    %158 = vector.broadcast %148 : vector<8x1xf32> to vector<8x32xf32>
    %159 = arith.subf %140, %158 : vector<8x32xf32>
    %cst_70 = arith.constant 9.99999974E-6 : f32
    %160 = vector.broadcast %cst_70 : f32 to vector<8x1xf32>
    %161 = arith.addf %157, %160 : vector<8x1xf32>
    %162 = math.rsqrt %161 : vector<8x1xf32>
    %163 = vector.broadcast %162 : vector<8x1xf32> to vector<8x32xf32>
    %164 = arith.mulf %159, %163 : vector<8x32xf32>
    %165 = vector.broadcast %142 : vector<1x32xf32> to vector<8x32xf32>
    %166 = arith.mulf %164, %165 : vector<8x32xf32>
    %167 = vector.broadcast %144 : vector<1x32xf32> to vector<8x32xf32>
    %168 = arith.addf %166, %167 : vector<8x32xf32>
    %c0_71 = arith.constant 0 : index
    %c0_72 = arith.constant 0 : index
    %169 = vector.load %arg18[%c0_71, %c0_72] : memref<8x32xf32, #tpu.memory_space<vmem>>, vector<8x32xf32>
    tpu.vector_store %arg18[%c0_71, %c0_72], %168 {strides = array<i32>} : memref<8x32xf32, #tpu.memory_space<vmem>>, vector<8x32xf32>,
    %c1_i32 = arith.constant 1 : i32
    %170 = arith.cmpi eq, %arg1, %c1_i32 : i32
    %171 = arith.extui %170 : i1 to i32
    %c0_i32_73 = arith.constant 0 : i32
    %172 = arith.cmpi ne, %171, %c0_i32_73 : i32
    scf.if %172 {
      %c0_74 = arith.constant 0 : index
      %c0_75 = arith.constant 0 : index
      %173 = vector.load %arg15[%c0_74, %c0_75] : memref<1x32xf32, #tpu.memory_space<vmem>>, vector<1x32xf32>
      %c0_76 = arith.constant 0 : index
      %c0_77 = arith.constant 0 : index
      %174 = vector.load %arg16[%c0_76, %c0_77] : memref<1x32xf32, #tpu.memory_space<vmem>>, vector<1x32xf32>
      %cst_78 = arith.constant dense<0.000000e+00> : vector<8xf32>
      %175 = vector.multi_reduction <add>, %168, %cst_78 [1] : vector<8x32xf32> to vector<8xf32>
      %176 = vector.shape_cast %175 : vector<8xf32> to vector<8x1xf32>
      %cst_79 = arith.constant 3.200000e+01 : f32
      %177 = vector.broadcast %cst_79 : f32 to vector<8x1xf32>
      %178 = arith.divf %176, %177 : vector<8x1xf32>
      %179 = arith.mulf %168, %168 : vector<8x32xf32>
      %cst_80 = arith.constant dense<0.000000e+00> : vector<8xf32>
      %180 = vector.multi_reduction <add>, %179, %cst_80 [1] : vector<8x32xf32> to vector<8xf32>
      %181 = vector.shape_cast %180 : vector<8xf32> to vector<8x1xf32>
      %cst_81 = arith.constant 3.200000e+01 : f32
      %182 = vector.broadcast %cst_81 : f32 to vector<8x1xf32>
      %183 = arith.divf %181, %182 : vector<8x1xf32>
      %184 = arith.mulf %178, %178 : vector<8x1xf32>
      %185 = arith.subf %183, %184 : vector<8x1xf32>
      %cst_82 = arith.constant 0.000000e+00 : f32
      %186 = vector.broadcast %cst_82 : f32 to vector<8x1xf32>
      %187 = arith.maximumf %185, %186 : vector<8x1xf32>
      %188 = vector.broadcast %178 : vector<8x1xf32> to vector<8x32xf32>
      %189 = arith.subf %168, %188 : vector<8x32xf32>
      %cst_83 = arith.constant 9.99999974E-6 : f32
      %190 = vector.broadcast %cst_83 : f32 to vector<8x1xf32>
      %191 = arith.addf %187, %190 : vector<8x1xf32>
      %192 = math.rsqrt %191 : vector<8x1xf32>
      %193 = vector.broadcast %192 : vector<8x1xf32> to vector<8x32xf32>
      %194 = arith.mulf %189, %193 : vector<8x32xf32>
      %195 = vector.broadcast %173 : vector<1x32xf32> to vector<8x32xf32>
      %196 = arith.mulf %194, %195 : vector<8x32xf32>
      %197 = vector.broadcast %174 : vector<1x32xf32> to vector<8x32xf32>
      %198 = arith.addf %196, %197 : vector<8x32xf32>
      %c0_84 = arith.constant 0 : index
      %c0_85 = arith.constant 0 : index
      %c0_86 = arith.constant 0 : index
      %199 = vector.load %arg17[%c0_84, %c0_85, %c0_86] : memref<1x8x32xf32, #tpu.memory_space<vmem>>, vector<1x8x32xf32>
      %200 = vector.shape_cast %199 : vector<1x8x32xf32> to vector<8x32xf32>
      %201 = vector.shape_cast %198 : vector<8x32xf32> to vector<1x8x32xf32>
      tpu.vector_store %arg17[%c0_84, %c0_85, %c0_86], %201 {strides = array<i32>} : memref<1x8x32xf32, #tpu.memory_space<vmem>>, vector<1x8x32xf32>,
    } else {
    }
    return
  }
  func.func @transform_0(%arg0: i32, %arg1: i32) -> (i32, i32, i32) {
    %c0_i32 = arith.constant 0 : i32
    %c0_i32_0 = arith.constant 0 : i32
    %c0_i32_1 = arith.constant 0 : i32
    return %arg0, %c0_i32, %c0_i32_0 : i32, i32, i32
  }
  func.func @transform_1(%arg0: i32, %arg1: i32) -> (i32, i32, i32) {
    %c0_i32 = arith.constant 0 : i32
    %c0_i32_0 = arith.constant 0 : i32
    %c0_i32_1 = arith.constant 0 : i32
    return %arg1, %c0_i32, %c0_i32_0 : i32, i32, i32
  }
  func.func @transform_2(%arg0: i32, %arg1: i32) -> (i32, i32, i32) {
    %c0_i32 = arith.constant 0 : i32
    %c0_i32_0 = arith.constant 0 : i32
    %c0_i32_1 = arith.constant 0 : i32
    return %arg1, %c0_i32, %c0_i32_0 : i32, i32, i32
  }
  func.func @transform_3(%arg0: i32, %arg1: i32) -> (i32, i32, i32) {
    %c0_i32 = arith.constant 0 : i32
    %c0_i32_0 = arith.constant 0 : i32
    %c0_i32_1 = arith.constant 0 : i32
    return %arg1, %c0_i32, %c0_i32_0 : i32, i32, i32
  }
  func.func @transform_4(%arg0: i32, %arg1: i32) -> (i32, i32, i32) {
    %c0_i32 = arith.constant 0 : i32
    %c0_i32_0 = arith.constant 0 : i32
    %c0_i32_1 = arith.constant 0 : i32
    return %arg1, %c0_i32, %c0_i32_0 : i32, i32, i32
  }
  func.func @transform_5(%arg0: i32, %arg1: i32) -> (i32, i32, i32) {
    %c0_i32 = arith.constant 0 : i32
    %c0_i32_0 = arith.constant 0 : i32
    %c0_i32_1 = arith.constant 0 : i32
    return %arg1, %c0_i32, %c0_i32_0 : i32, i32, i32
  }
  func.func @transform_6(%arg0: i32, %arg1: i32) -> (i32, i32, i32) {
    %c0_i32 = arith.constant 0 : i32
    %c0_i32_0 = arith.constant 0 : i32
    %c0_i32_1 = arith.constant 0 : i32
    return %arg1, %c0_i32, %c0_i32_0 : i32, i32, i32
  }
  func.func @transform_7(%arg0: i32, %arg1: i32) -> (i32, i32, i32) {
    %c0_i32 = arith.constant 0 : i32
    %c0_i32_0 = arith.constant 0 : i32
    %c0_i32_1 = arith.constant 0 : i32
    return %arg1, %c0_i32, %c0_i32_0 : i32, i32, i32
  }
  func.func @transform_8(%arg0: i32, %arg1: i32) -> (i32, i32, i32) {
    %c0_i32 = arith.constant 0 : i32
    %c0_i32_0 = arith.constant 0 : i32
    %c0_i32_1 = arith.constant 0 : i32
    return %arg1, %c0_i32, %c0_i32_0 : i32, i32, i32
  }
  func.func @transform_9(%arg0: i32, %arg1: i32) -> (i32, i32, i32) {
    %c0_i32 = arith.constant 0 : i32
    %c0_i32_0 = arith.constant 0 : i32
    %c0_i32_1 = arith.constant 0 : i32
    return %arg1, %c0_i32, %c0_i32_0 : i32, i32, i32
  }
  func.func @transform_10(%arg0: i32, %arg1: i32) -> (i32, i32, i32) {
    %c0_i32 = arith.constant 0 : i32
    %c0_i32_0 = arith.constant 0 : i32
    %c0_i32_1 = arith.constant 0 : i32
    return %arg1, %c0_i32, %c0_i32_0 : i32, i32, i32
  }
  func.func @transform_11(%arg0: i32, %arg1: i32) -> (i32, i32, i32) {
    %c0_i32 = arith.constant 0 : i32
    %c0_i32_0 = arith.constant 0 : i32
    %c0_i32_1 = arith.constant 0 : i32
    return %arg1, %c0_i32, %c0_i32_0 : i32, i32, i32
  }
  func.func @transform_12(%arg0: i32, %arg1: i32) -> (i32, i32, i32) {
    %c0_i32 = arith.constant 0 : i32
    %c0_i32_0 = arith.constant 0 : i32
    %c0_i32_1 = arith.constant 0 : i32
    return %arg1, %c0_i32, %c0_i32_0 : i32, i32, i32
  }
  func.func @transform_13(%arg0: i32, %arg1: i32) -> (i32, i32) {
    %c0_i32 = arith.constant 0 : i32
    %c0_i32_0 = arith.constant 0 : i32
    %c0_i32_1 = arith.constant 0 : i32
    return %c0_i32, %c0_i32_0 : i32, i32
  }
  func.func @transform_14(%arg0: i32, %arg1: i32) -> (i32, i32) {
    %c0_i32 = arith.constant 0 : i32
    %c0_i32_0 = arith.constant 0 : i32
    %c0_i32_1 = arith.constant 0 : i32
    return %c0_i32, %c0_i32_0 : i32, i32
  }
  func.func @transform_15(%arg0: i32, %arg1: i32) -> (i32, i32, i32) {
    %c0_i32 = arith.constant 0 : i32
    %c0_i32_0 = arith.constant 0 : i32
    %c0_i32_1 = arith.constant 0 : i32
    return %arg0, %c0_i32, %c0_i32_0 : i32, i32, i32
  }
}

module attributes {stable_mosaic.version = 11 : i64} {
  func.func @_dec_stack_kernel(%arg0: i32, %arg1: i32, %arg2: memref<1x8x32xf32, #tpu.memory_space<vmem>>, %arg3: memref<1x8x32xf32, #tpu.memory_space<vmem>>, %arg4: memref<1x32x96xbf16, #tpu.memory_space<vmem>>, %arg5: memref<1x1x96xf32, #tpu.memory_space<vmem>>, %arg6: memref<1x32x32xbf16, #tpu.memory_space<vmem>>, %arg7: memref<1x1x32xf32, #tpu.memory_space<vmem>>, %arg8: memref<1x1x32xf32, #tpu.memory_space<vmem>>, %arg9: memref<1x1x32xf32, #tpu.memory_space<vmem>>, %arg10: memref<1x32x32xbf16, #tpu.memory_space<vmem>>, %arg11: memref<1x1x32xf32, #tpu.memory_space<vmem>>, %arg12: memref<1x32x64xbf16, #tpu.memory_space<vmem>>, %arg13: memref<1x1x64xf32, #tpu.memory_space<vmem>>, %arg14: memref<1x32x32xbf16, #tpu.memory_space<vmem>>, %arg15: memref<1x1x32xf32, #tpu.memory_space<vmem>>, %arg16: memref<1x1x32xf32, #tpu.memory_space<vmem>>, %arg17: memref<1x1x32xf32, #tpu.memory_space<vmem>>, %arg18: memref<1x32x64xbf16, #tpu.memory_space<vmem>>, %arg19: memref<1x1x64xf32, #tpu.memory_space<vmem>>, %arg20: memref<1x64x32xbf16, #tpu.memory_space<vmem>>, %arg21: memref<1x1x32xf32, #tpu.memory_space<vmem>>, %arg22: memref<1x1x32xf32, #tpu.memory_space<vmem>>, %arg23: memref<1x1x32xf32, #tpu.memory_space<vmem>>, %arg24: memref<1x32xf32, #tpu.memory_space<vmem>>, %arg25: memref<1x32xf32, #tpu.memory_space<vmem>>, %arg26: memref<32x128xbf16, #tpu.memory_space<vmem>>, %arg27: memref<1x128xf32, #tpu.memory_space<vmem>>, %arg28: memref<1x8x128xf32, #tpu.memory_space<vmem>>, %arg29: memref<8x32xf32, #tpu.memory_space<vmem>>) attributes {dimension_semantics = [#tpu.dimension_semantics<parallel>, #tpu.dimension_semantics<arbitrary>], iteration_bounds = array<i64: 2, 2>, scalar_prefetch = 0 : i64, scratch_operands = 1 : i64, tpu.core_type = #tpu.core_type<tc>, window_params = [{transform_indices = @transform_0, window_bounds = array<i64: 1, 8, 32>}, {transform_indices = @transform_1, window_bounds = array<i64: 1, 8, 32>}, {transform_indices = @transform_2, window_bounds = array<i64: 1, 32, 96>}, {transform_indices = @transform_3, window_bounds = array<i64: 1, 1, 96>}, {transform_indices = @transform_4, window_bounds = array<i64: 1, 32, 32>}, {transform_indices = @transform_5, window_bounds = array<i64: 1, 1, 32>}, {transform_indices = @transform_6, window_bounds = array<i64: 1, 1, 32>}, {transform_indices = @transform_7, window_bounds = array<i64: 1, 1, 32>}, {transform_indices = @transform_8, window_bounds = array<i64: 1, 32, 32>}, {transform_indices = @transform_9, window_bounds = array<i64: 1, 1, 32>}, {transform_indices = @transform_10, window_bounds = array<i64: 1, 32, 64>}, {transform_indices = @transform_11, window_bounds = array<i64: 1, 1, 64>}, {transform_indices = @transform_12, window_bounds = array<i64: 1, 32, 32>}, {transform_indices = @transform_13, window_bounds = array<i64: 1, 1, 32>}, {transform_indices = @transform_14, window_bounds = array<i64: 1, 1, 32>}, {transform_indices = @transform_15, window_bounds = array<i64: 1, 1, 32>}, {transform_indices = @transform_16, window_bounds = array<i64: 1, 32, 64>}, {transform_indices = @transform_17, window_bounds = array<i64: 1, 1, 64>}, {transform_indices = @transform_18, window_bounds = array<i64: 1, 64, 32>}, {transform_indices = @transform_19, window_bounds = array<i64: 1, 1, 32>}, {transform_indices = @transform_20, window_bounds = array<i64: 1, 1, 32>}, {transform_indices = @transform_21, window_bounds = array<i64: 1, 1, 32>}, {pipeline_mode = #tpu.pipeline_mode<synchronous>, transform_indices = @transform_22, window_bounds = array<i64: 1, 32>}, {pipeline_mode = #tpu.pipeline_mode<synchronous>, transform_indices = @transform_23, window_bounds = array<i64: 1, 32>}, {pipeline_mode = #tpu.pipeline_mode<synchronous>, transform_indices = @transform_24, window_bounds = array<i64: 32, 128>}, {pipeline_mode = #tpu.pipeline_mode<synchronous>, transform_indices = @transform_25, window_bounds = array<i64: 1, 128>}, {transform_indices = @transform_26, window_bounds = array<i64: 1, 8, 128>}]} {
    %c0_i32 = arith.constant 0 : i32
    %0 = arith.cmpi eq, %arg1, %c0_i32 : i32
    %1 = arith.extui %0 : i1 to i32
    %c0_i32_0 = arith.constant 0 : i32
    %2 = arith.cmpi ne, %1, %c0_i32_0 : i32
    scf.if %2 {
      %c0_127 = arith.constant 0 : index
      %c0_128 = arith.constant 0 : index
      %c0_129 = arith.constant 0 : index
      %300 = vector.load %arg2[%c0_127, %c0_128, %c0_129] : memref<1x8x32xf32, #tpu.memory_space<vmem>>, vector<1x8x32xf32>
      %301 = vector.shape_cast %300 : vector<1x8x32xf32> to vector<8x32xf32>
      %c0_130 = arith.constant 0 : index
      %c0_131 = arith.constant 0 : index
      %302 = vector.load %arg29[%c0_130, %c0_131] : memref<8x32xf32, #tpu.memory_space<vmem>>, vector<8x32xf32>
      tpu.vector_store %arg29[%c0_130, %c0_131], %301 {strides = array<i32>} : memref<8x32xf32, #tpu.memory_space<vmem>>, vector<8x32xf32>,
    } else {
    }
    %c0 = arith.constant 0 : index
    %c0_1 = arith.constant 0 : index
    %3 = vector.load %arg29[%c0, %c0_1] : memref<8x32xf32, #tpu.memory_space<vmem>>, vector<8x32xf32>
    %c0_2 = arith.constant 0 : index
    %c0_3 = arith.constant 0 : index
    %c0_4 = arith.constant 0 : index
    %4 = vector.load %arg3[%c0_2, %c0_3, %c0_4] : memref<1x8x32xf32, #tpu.memory_space<vmem>>, vector<1x8x32xf32>
    %5 = vector.shape_cast %4 : vector<1x8x32xf32> to vector<8x32xf32>
    %c0_5 = arith.constant 0 : index
    %c0_6 = arith.constant 0 : index
    %c0_7 = arith.constant 0 : index
    %6 = vector.load %arg4[%c0_5, %c0_6, %c0_7] : memref<1x32x96xbf16, #tpu.memory_space<vmem>>, vector<1x32x96xbf16>
    %7 = vector.shape_cast %6 : vector<1x32x96xbf16> to vector<32x96xbf16>
    %c0_8 = arith.constant 0 : index
    %c0_9 = arith.constant 0 : index
    %c0_10 = arith.constant 0 : index
    %8 = vector.load %arg5[%c0_8, %c0_9, %c0_10] : memref<1x1x96xf32, #tpu.memory_space<vmem>>, vector<1x1x96xf32>
    %9 = vector.shape_cast %8 : vector<1x1x96xf32> to vector<1x96xf32>
    %10 = arith.truncf %3 : vector<8x32xf32> to vector<8x32xbf16>
    %cst = arith.constant dense<0.000000e+00> : vector<8x96xf32>
    %11 = tpu.matmul %10, %7, %cst {dimension_numbers = #tpu.dot_dimension_numbers<[1], [0], [0], [1], [0, 0, 1, 1], [], []>} : vector<8x32xbf16>, vector<32x96xbf16>, vector<8x96xf32> -> vector<8x96xf32>
    %12 = vector.broadcast %9 : vector<1x96xf32> to vector<8x96xf32>
    %13 = arith.addf %11, %12 : vector<8x96xf32>
    %14 = vector.extract_strided_slice %13 {offsets = [0, 0], sizes = [8, 32], strides = [1, 1]} : vector<8x96xf32> to vector<8x32xf32>
    %15 = vector.extract_strided_slice %13 {offsets = [0, 32], sizes = [8, 32], strides = [1, 1]} : vector<8x96xf32> to vector<8x32xf32>
    %16 = vector.extract_strided_slice %13 {offsets = [0, 64], sizes = [8, 32], strides = [1, 1]} : vector<8x96xf32> to vector<8x32xf32>
    %c0_11 = arith.constant 0 : index
    %c0_12 = arith.constant 0 : index
    %c0_13 = arith.constant 0 : index
    %17 = vector.load %arg6[%c0_11, %c0_12, %c0_13] : memref<1x32x32xbf16, #tpu.memory_space<vmem>>, vector<1x32x32xbf16>
    %18 = vector.shape_cast %17 : vector<1x32x32xbf16> to vector<32x32xbf16>
    %c0_14 = arith.constant 0 : index
    %c0_15 = arith.constant 0 : index
    %c0_16 = arith.constant 0 : index
    %19 = vector.load %arg7[%c0_14, %c0_15, %c0_16] : memref<1x1x32xf32, #tpu.memory_space<vmem>>, vector<1x1x32xf32>
    %20 = vector.shape_cast %19 : vector<1x1x32xf32> to vector<1x32xf32>
    %cst_17 = arith.constant 0.353553385 : f32
    %21 = vector.broadcast %cst_17 : f32 to vector<8x32xf32>
    %22 = arith.mulf %14, %21 : vector<8x32xf32>
    %23 = arith.truncf %22 : vector<8x32xf32> to vector<8x32xbf16>
    %24 = arith.truncf %15 : vector<8x32xf32> to vector<8x32xbf16>
    %25 = arith.truncf %16 : vector<8x32xf32> to vector<8x32xbf16>
    %26 = vector.extract_strided_slice %23 {offsets = [0, 0], sizes = [8, 8], strides = [1, 1]} : vector<8x32xbf16> to vector<8x8xbf16>
    %27 = vector.extract_strided_slice %24 {offsets = [0, 0], sizes = [8, 8], strides = [1, 1]} : vector<8x32xbf16> to vector<8x8xbf16>
    %cst_18 = arith.constant dense<0.000000e+00> : vector<8x8xf32>
    %28 = tpu.matmul %26, %27, %cst_18 {dimension_numbers = #tpu.dot_dimension_numbers<[1], [1], [0], [0], [0, 0, 1, 0], [], []>} : vector<8x8xbf16>, vector<8x8xbf16>, vector<8x8xf32> -> vector<8x8xf32>
    %cst_19 = arith.constant dense<0xFF800000> : vector<8xf32>
    %29 = vector.multi_reduction <maximumf>, %28, %cst_19 [1] : vector<8x8xf32> to vector<8xf32>
    %30 = vector.shape_cast %29 : vector<8xf32> to vector<8x1xf32>
    %31 = vector.broadcast %30 : vector<8x1xf32> to vector<8x8xf32>
    %32 = arith.subf %28, %31 : vector<8x8xf32>
    %33 = math.exp %32 : vector<8x8xf32>
    %cst_20 = arith.constant dense<0.000000e+00> : vector<8xf32>
    %34 = vector.multi_reduction <add>, %33, %cst_20 [1] : vector<8x8xf32> to vector<8xf32>
    %35 = vector.shape_cast %34 : vector<8xf32> to vector<8x1xf32>
    %36 = tpu.reciprocal %35 {approx = true} : vector<8x1xf32> -> vector<8x1xf32>
    %37 = vector.broadcast %36 : vector<8x1xf32> to vector<8x8xf32>
    %38 = arith.mulf %33, %37 : vector<8x8xf32>
    %39 = arith.truncf %38 : vector<8x8xf32> to vector<8x8xbf16>
    %40 = vector.extract_strided_slice %25 {offsets = [0, 0], sizes = [8, 8], strides = [1, 1]} : vector<8x32xbf16> to vector<8x8xbf16>
    %cst_21 = arith.constant dense<0.000000e+00> : vector<8x8xf32>
    %41 = tpu.matmul %39, %40, %cst_21 {dimension_numbers = #tpu.dot_dimension_numbers<[1], [0], [0], [1], [0, 0, 1, 1], [], []>} : vector<8x8xbf16>, vector<8x8xbf16>, vector<8x8xf32> -> vector<8x8xf32>
    %42 = vector.extract_strided_slice %23 {offsets = [0, 8], sizes = [8, 8], strides = [1, 1]} : vector<8x32xbf16> to vector<8x8xbf16>
    %43 = vector.extract_strided_slice %24 {offsets = [0, 8], sizes = [8, 8], strides = [1, 1]} : vector<8x32xbf16> to vector<8x8xbf16>
    %cst_22 = arith.constant dense<0.000000e+00> : vector<8x8xf32>
    %44 = tpu.matmul %42, %43, %cst_22 {dimension_numbers = #tpu.dot_dimension_numbers<[1], [1], [0], [0], [0, 0, 1, 0], [], []>} : vector<8x8xbf16>, vector<8x8xbf16>, vector<8x8xf32> -> vector<8x8xf32>
    %cst_23 = arith.constant dense<0xFF800000> : vector<8xf32>
    %45 = vector.multi_reduction <maximumf>, %44, %cst_23 [1] : vector<8x8xf32> to vector<8xf32>
    %46 = vector.shape_cast %45 : vector<8xf32> to vector<8x1xf32>
    %47 = vector.broadcast %46 : vector<8x1xf32> to vector<8x8xf32>
    %48 = arith.subf %44, %47 : vector<8x8xf32>
    %49 = math.exp %48 : vector<8x8xf32>
    %cst_24 = arith.constant dense<0.000000e+00> : vector<8xf32>
    %50 = vector.multi_reduction <add>, %49, %cst_24 [1] : vector<8x8xf32> to vector<8xf32>
    %51 = vector.shape_cast %50 : vector<8xf32> to vector<8x1xf32>
    %52 = tpu.reciprocal %51 {approx = true} : vector<8x1xf32> -> vector<8x1xf32>
    %53 = vector.broadcast %52 : vector<8x1xf32> to vector<8x8xf32>
    %54 = arith.mulf %49, %53 : vector<8x8xf32>
    %55 = arith.truncf %54 : vector<8x8xf32> to vector<8x8xbf16>
    %56 = vector.extract_strided_slice %25 {offsets = [0, 8], sizes = [8, 8], strides = [1, 1]} : vector<8x32xbf16> to vector<8x8xbf16>
    %cst_25 = arith.constant dense<0.000000e+00> : vector<8x8xf32>
    %57 = tpu.matmul %55, %56, %cst_25 {dimension_numbers = #tpu.dot_dimension_numbers<[1], [0], [0], [1], [0, 0, 1, 1], [], []>} : vector<8x8xbf16>, vector<8x8xbf16>, vector<8x8xf32> -> vector<8x8xf32>
    %58 = vector.extract_strided_slice %23 {offsets = [0, 16], sizes = [8, 8], strides = [1, 1]} : vector<8x32xbf16> to vector<8x8xbf16>
    %59 = vector.extract_strided_slice %24 {offsets = [0, 16], sizes = [8, 8], strides = [1, 1]} : vector<8x32xbf16> to vector<8x8xbf16>
    %cst_26 = arith.constant dense<0.000000e+00> : vector<8x8xf32>
    %60 = tpu.matmul %58, %59, %cst_26 {dimension_numbers = #tpu.dot_dimension_numbers<[1], [1], [0], [0], [0, 0, 1, 0], [], []>} : vector<8x8xbf16>, vector<8x8xbf16>, vector<8x8xf32> -> vector<8x8xf32>
    %cst_27 = arith.constant dense<0xFF800000> : vector<8xf32>
    %61 = vector.multi_reduction <maximumf>, %60, %cst_27 [1] : vector<8x8xf32> to vector<8xf32>
    %62 = vector.shape_cast %61 : vector<8xf32> to vector<8x1xf32>
    %63 = vector.broadcast %62 : vector<8x1xf32> to vector<8x8xf32>
    %64 = arith.subf %60, %63 : vector<8x8xf32>
    %65 = math.exp %64 : vector<8x8xf32>
    %cst_28 = arith.constant dense<0.000000e+00> : vector<8xf32>
    %66 = vector.multi_reduction <add>, %65, %cst_28 [1] : vector<8x8xf32> to vector<8xf32>
    %67 = vector.shape_cast %66 : vector<8xf32> to vector<8x1xf32>
    %68 = tpu.reciprocal %67 {approx = true} : vector<8x1xf32> -> vector<8x1xf32>
    %69 = vector.broadcast %68 : vector<8x1xf32> to vector<8x8xf32>
    %70 = arith.mulf %65, %69 : vector<8x8xf32>
    %71 = arith.truncf %70 : vector<8x8xf32> to vector<8x8xbf16>
    %72 = vector.extract_strided_slice %25 {offsets = [0, 16], sizes = [8, 8], strides = [1, 1]} : vector<8x32xbf16> to vector<8x8xbf16>
    %cst_29 = arith.constant dense<0.000000e+00> : vector<8x8xf32>
    %73 = tpu.matmul %71, %72, %cst_29 {dimension_numbers = #tpu.dot_dimension_numbers<[1], [0], [0], [1], [0, 0, 1, 1], [], []>} : vector<8x8xbf16>, vector<8x8xbf16>, vector<8x8xf32> -> vector<8x8xf32>
    %74 = vector.extract_strided_slice %23 {offsets = [0, 24], sizes = [8, 8], strides = [1, 1]} : vector<8x32xbf16> to vector<8x8xbf16>
    %75 = vector.extract_strided_slice %24 {offsets = [0, 24], sizes = [8, 8], strides = [1, 1]} : vector<8x32xbf16> to vector<8x8xbf16>
    %cst_30 = arith.constant dense<0.000000e+00> : vector<8x8xf32>
    %76 = tpu.matmul %74, %75, %cst_30 {dimension_numbers = #tpu.dot_dimension_numbers<[1], [1], [0], [0], [0, 0, 1, 0], [], []>} : vector<8x8xbf16>, vector<8x8xbf16>, vector<8x8xf32> -> vector<8x8xf32>
    %cst_31 = arith.constant dense<0xFF800000> : vector<8xf32>
    %77 = vector.multi_reduction <maximumf>, %76, %cst_31 [1] : vector<8x8xf32> to vector<8xf32>
    %78 = vector.shape_cast %77 : vector<8xf32> to vector<8x1xf32>
    %79 = vector.broadcast %78 : vector<8x1xf32> to vector<8x8xf32>
    %80 = arith.subf %76, %79 : vector<8x8xf32>
    %81 = math.exp %80 : vector<8x8xf32>
    %cst_32 = arith.constant dense<0.000000e+00> : vector<8xf32>
    %82 = vector.multi_reduction <add>, %81, %cst_32 [1] : vector<8x8xf32> to vector<8xf32>
    %83 = vector.shape_cast %82 : vector<8xf32> to vector<8x1xf32>
    %84 = tpu.reciprocal %83 {approx = true} : vector<8x1xf32> -> vector<8x1xf32>
    %85 = vector.broadcast %84 : vector<8x1xf32> to vector<8x8xf32>
    %86 = arith.mulf %81, %85 : vector<8x8xf32>
    %87 = arith.truncf %86 : vector<8x8xf32> to vector<8x8xbf16>
    %88 = vector.extract_strided_slice %25 {offsets = [0, 24], sizes = [8, 8], strides = [1, 1]} : vector<8x32xbf16> to vector<8x8xbf16>
    %cst_33 = arith.constant dense<0.000000e+00> : vector<8x8xf32>
    %89 = tpu.matmul %87, %88, %cst_33 {dimension_numbers = #tpu.dot_dimension_numbers<[1], [0], [0], [1], [0, 0, 1, 1], [], []>} : vector<8x8xbf16>, vector<8x8xbf16>, vector<8x8xf32> -> vector<8x8xf32>
    %90 = tpu.concatenate %41, %57, %73, %89 in 1 : vector<8x8xf32>, vector<8x8xf32>, vector<8x8xf32>, vector<8x8xf32> -> vector<8x32xf32>
    %91 = arith.truncf %90 : vector<8x32xf32> to vector<8x32xbf16>
    %cst_34 = arith.constant dense<0.000000e+00> : vector<8x32xf32>
    %92 = tpu.matmul %91, %18, %cst_34 {dimension_numbers = #tpu.dot_dimension_numbers<[1], [0], [0], [1], [0, 0, 1, 1], [], []>} : vector<8x32xbf16>, vector<32x32xbf16>, vector<8x32xf32> -> vector<8x32xf32>
    %93 = vector.broadcast %20 : vector<1x32xf32> to vector<8x32xf32>
    %94 = arith.addf %92, %93 : vector<8x32xf32>
    %95 = arith.addf %3, %94 : vector<8x32xf32>
    %c0_35 = arith.constant 0 : index
    %c0_36 = arith.constant 0 : index
    %c0_37 = arith.constant 0 : index
    %96 = vector.load %arg8[%c0_35, %c0_36, %c0_37] : memref<1x1x32xf32, #tpu.memory_space<vmem>>, vector<1x1x32xf32>
    %97 = vector.shape_cast %96 : vector<1x1x32xf32> to vector<1x32xf32>
    %c0_38 = arith.constant 0 : index
    %c0_39 = arith.constant 0 : index
    %c0_40 = arith.constant 0 : index
    %98 = vector.load %arg9[%c0_38, %c0_39, %c0_40] : memref<1x1x32xf32, #tpu.memory_space<vmem>>, vector<1x1x32xf32>
    %99 = vector.shape_cast %98 : vector<1x1x32xf32> to vector<1x32xf32>
    %cst_41 = arith.constant dense<0.000000e+00> : vector<8xf32>
    %100 = vector.multi_reduction <add>, %95, %cst_41 [1] : vector<8x32xf32> to vector<8xf32>
    %101 = vector.shape_cast %100 : vector<8xf32> to vector<8x1xf32>
    %cst_42 = arith.constant 3.200000e+01 : f32
    %102 = vector.broadcast %cst_42 : f32 to vector<8x1xf32>
    %103 = arith.divf %101, %102 : vector<8x1xf32>
    %104 = arith.mulf %95, %95 : vector<8x32xf32>
    %cst_43 = arith.constant dense<0.000000e+00> : vector<8xf32>
    %105 = vector.multi_reduction <add>, %104, %cst_43 [1] : vector<8x32xf32> to vector<8xf32>
    %106 = vector.shape_cast %105 : vector<8xf32> to vector<8x1xf32>
    %cst_44 = arith.constant 3.200000e+01 : f32
    %107 = vector.broadcast %cst_44 : f32 to vector<8x1xf32>
    %108 = arith.divf %106, %107 : vector<8x1xf32>
    %109 = arith.mulf %103, %103 : vector<8x1xf32>
    %110 = arith.subf %108, %109 : vector<8x1xf32>
    %cst_45 = arith.constant 0.000000e+00 : f32
    %111 = vector.broadcast %cst_45 : f32 to vector<8x1xf32>
    %112 = arith.maximumf %110, %111 : vector<8x1xf32>
    %113 = vector.broadcast %103 : vector<8x1xf32> to vector<8x32xf32>
    %114 = arith.subf %95, %113 : vector<8x32xf32>
    %cst_46 = arith.constant 9.99999974E-6 : f32
    %115 = vector.broadcast %cst_46 : f32 to vector<8x1xf32>
    %116 = arith.addf %112, %115 : vector<8x1xf32>
    %117 = math.rsqrt %116 : vector<8x1xf32>
    %118 = vector.broadcast %117 : vector<8x1xf32> to vector<8x32xf32>
    %119 = arith.mulf %114, %118 : vector<8x32xf32>
    %120 = vector.broadcast %97 : vector<1x32xf32> to vector<8x32xf32>
    %121 = arith.mulf %119, %120 : vector<8x32xf32>
    %122 = vector.broadcast %99 : vector<1x32xf32> to vector<8x32xf32>
    %123 = arith.addf %121, %122 : vector<8x32xf32>
    %c0_47 = arith.constant 0 : index
    %c0_48 = arith.constant 0 : index
    %c0_49 = arith.constant 0 : index
    %124 = vector.load %arg10[%c0_47, %c0_48, %c0_49] : memref<1x32x32xbf16, #tpu.memory_space<vmem>>, vector<1x32x32xbf16>
    %125 = vector.shape_cast %124 : vector<1x32x32xbf16> to vector<32x32xbf16>
    %c0_50 = arith.constant 0 : index
    %c0_51 = arith.constant 0 : index
    %c0_52 = arith.constant 0 : index
    %126 = vector.load %arg11[%c0_50, %c0_51, %c0_52] : memref<1x1x32xf32, #tpu.memory_space<vmem>>, vector<1x1x32xf32>
    %127 = vector.shape_cast %126 : vector<1x1x32xf32> to vector<1x32xf32>
    %128 = arith.truncf %123 : vector<8x32xf32> to vector<8x32xbf16>
    %cst_53 = arith.constant dense<0.000000e+00> : vector<8x32xf32>
    %129 = tpu.matmul %128, %125, %cst_53 {dimension_numbers = #tpu.dot_dimension_numbers<[1], [0], [0], [1], [0, 0, 1, 1], [], []>} : vector<8x32xbf16>, vector<32x32xbf16>, vector<8x32xf32> -> vector<8x32xf32>
    %130 = vector.broadcast %127 : vector<1x32xf32> to vector<8x32xf32>
    %131 = arith.addf %129, %130 : vector<8x32xf32>
    %c0_54 = arith.constant 0 : index
    %c0_55 = arith.constant 0 : index
    %c0_56 = arith.constant 0 : index
    %132 = vector.load %arg12[%c0_54, %c0_55, %c0_56] : memref<1x32x64xbf16, #tpu.memory_space<vmem>>, vector<1x32x64xbf16>
    %133 = vector.shape_cast %132 : vector<1x32x64xbf16> to vector<32x64xbf16>
    %c0_57 = arith.constant 0 : index
    %c0_58 = arith.constant 0 : index
    %c0_59 = arith.constant 0 : index
    %134 = vector.load %arg13[%c0_57, %c0_58, %c0_59] : memref<1x1x64xf32, #tpu.memory_space<vmem>>, vector<1x1x64xf32>
    %135 = vector.shape_cast %134 : vector<1x1x64xf32> to vector<1x64xf32>
    %136 = arith.truncf %5 : vector<8x32xf32> to vector<8x32xbf16>
    %cst_60 = arith.constant dense<0.000000e+00> : vector<8x64xf32>
    %137 = tpu.matmul %136, %133, %cst_60 {dimension_numbers = #tpu.dot_dimension_numbers<[1], [0], [0], [1], [0, 0, 1, 1], [], []>} : vector<8x32xbf16>, vector<32x64xbf16>, vector<8x64xf32> -> vector<8x64xf32>
    %138 = vector.broadcast %135 : vector<1x64xf32> to vector<8x64xf32>
    %139 = arith.addf %137, %138 : vector<8x64xf32>
    %140 = vector.extract_strided_slice %139 {offsets = [0, 0], sizes = [8, 32], strides = [1, 1]} : vector<8x64xf32> to vector<8x32xf32>
    %141 = vector.extract_strided_slice %139 {offsets = [0, 32], sizes = [8, 32], strides = [1, 1]} : vector<8x64xf32> to vector<8x32xf32>
    %c0_61 = arith.constant 0 : index
    %c0_62 = arith.constant 0 : index
    %c0_63 = arith.constant 0 : index
    %142 = vector.load %arg14[%c0_61, %c0_62, %c0_63] : memref<1x32x32xbf16, #tpu.memory_space<vmem>>, vector<1x32x32xbf16>
    %143 = vector.shape_cast %142 : vector<1x32x32xbf16> to vector<32x32xbf16>
    %c0_64 = arith.constant 0 : index
    %c0_65 = arith.constant 0 : index
    %c0_66 = arith.constant 0 : index
    %144 = vector.load %arg15[%c0_64, %c0_65, %c0_66] : memref<1x1x32xf32, #tpu.memory_space<vmem>>, vector<1x1x32xf32>
    %145 = vector.shape_cast %144 : vector<1x1x32xf32> to vector<1x32xf32>
    %cst_67 = arith.constant 0.353553385 : f32
    %146 = vector.broadcast %cst_67 : f32 to vector<8x32xf32>
    %147 = arith.mulf %131, %146 : vector<8x32xf32>
    %148 = arith.truncf %147 : vector<8x32xf32> to vector<8x32xbf16>
    %149 = arith.truncf %140 : vector<8x32xf32> to vector<8x32xbf16>
    %150 = arith.truncf %141 : vector<8x32xf32> to vector<8x32xbf16>
    %151 = vector.extract_strided_slice %148 {offsets = [0, 0], sizes = [8, 8], strides = [1, 1]} : vector<8x32xbf16> to vector<8x8xbf16>
    %152 = vector.extract_strided_slice %149 {offsets = [0, 0], sizes = [8, 8], strides = [1, 1]} : vector<8x32xbf16> to vector<8x8xbf16>
    %cst_68 = arith.constant dense<0.000000e+00> : vector<8x8xf32>
    %153 = tpu.matmul %151, %152, %cst_68 {dimension_numbers = #tpu.dot_dimension_numbers<[1], [1], [0], [0], [0, 0, 1, 0], [], []>} : vector<8x8xbf16>, vector<8x8xbf16>, vector<8x8xf32> -> vector<8x8xf32>
    %cst_69 = arith.constant dense<0xFF800000> : vector<8xf32>
    %154 = vector.multi_reduction <maximumf>, %153, %cst_69 [1] : vector<8x8xf32> to vector<8xf32>
    %155 = vector.shape_cast %154 : vector<8xf32> to vector<8x1xf32>
    %156 = vector.broadcast %155 : vector<8x1xf32> to vector<8x8xf32>
    %157 = arith.subf %153, %156 : vector<8x8xf32>
    %158 = math.exp %157 : vector<8x8xf32>
    %cst_70 = arith.constant dense<0.000000e+00> : vector<8xf32>
    %159 = vector.multi_reduction <add>, %158, %cst_70 [1] : vector<8x8xf32> to vector<8xf32>
    %160 = vector.shape_cast %159 : vector<8xf32> to vector<8x1xf32>
    %161 = tpu.reciprocal %160 {approx = true} : vector<8x1xf32> -> vector<8x1xf32>
    %162 = vector.broadcast %161 : vector<8x1xf32> to vector<8x8xf32>
    %163 = arith.mulf %158, %162 : vector<8x8xf32>
    %164 = arith.truncf %163 : vector<8x8xf32> to vector<8x8xbf16>
    %165 = vector.extract_strided_slice %150 {offsets = [0, 0], sizes = [8, 8], strides = [1, 1]} : vector<8x32xbf16> to vector<8x8xbf16>
    %cst_71 = arith.constant dense<0.000000e+00> : vector<8x8xf32>
    %166 = tpu.matmul %164, %165, %cst_71 {dimension_numbers = #tpu.dot_dimension_numbers<[1], [0], [0], [1], [0, 0, 1, 1], [], []>} : vector<8x8xbf16>, vector<8x8xbf16>, vector<8x8xf32> -> vector<8x8xf32>
    %167 = vector.extract_strided_slice %148 {offsets = [0, 8], sizes = [8, 8], strides = [1, 1]} : vector<8x32xbf16> to vector<8x8xbf16>
    %168 = vector.extract_strided_slice %149 {offsets = [0, 8], sizes = [8, 8], strides = [1, 1]} : vector<8x32xbf16> to vector<8x8xbf16>
    %cst_72 = arith.constant dense<0.000000e+00> : vector<8x8xf32>
    %169 = tpu.matmul %167, %168, %cst_72 {dimension_numbers = #tpu.dot_dimension_numbers<[1], [1], [0], [0], [0, 0, 1, 0], [], []>} : vector<8x8xbf16>, vector<8x8xbf16>, vector<8x8xf32> -> vector<8x8xf32>
    %cst_73 = arith.constant dense<0xFF800000> : vector<8xf32>
    %170 = vector.multi_reduction <maximumf>, %169, %cst_73 [1] : vector<8x8xf32> to vector<8xf32>
    %171 = vector.shape_cast %170 : vector<8xf32> to vector<8x1xf32>
    %172 = vector.broadcast %171 : vector<8x1xf32> to vector<8x8xf32>
    %173 = arith.subf %169, %172 : vector<8x8xf32>
    %174 = math.exp %173 : vector<8x8xf32>
    %cst_74 = arith.constant dense<0.000000e+00> : vector<8xf32>
    %175 = vector.multi_reduction <add>, %174, %cst_74 [1] : vector<8x8xf32> to vector<8xf32>
    %176 = vector.shape_cast %175 : vector<8xf32> to vector<8x1xf32>
    %177 = tpu.reciprocal %176 {approx = true} : vector<8x1xf32> -> vector<8x1xf32>
    %178 = vector.broadcast %177 : vector<8x1xf32> to vector<8x8xf32>
    %179 = arith.mulf %174, %178 : vector<8x8xf32>
    %180 = arith.truncf %179 : vector<8x8xf32> to vector<8x8xbf16>
    %181 = vector.extract_strided_slice %150 {offsets = [0, 8], sizes = [8, 8], strides = [1, 1]} : vector<8x32xbf16> to vector<8x8xbf16>
    %cst_75 = arith.constant dense<0.000000e+00> : vector<8x8xf32>
    %182 = tpu.matmul %180, %181, %cst_75 {dimension_numbers = #tpu.dot_dimension_numbers<[1], [0], [0], [1], [0, 0, 1, 1], [], []>} : vector<8x8xbf16>, vector<8x8xbf16>, vector<8x8xf32> -> vector<8x8xf32>
    %183 = vector.extract_strided_slice %148 {offsets = [0, 16], sizes = [8, 8], strides = [1, 1]} : vector<8x32xbf16> to vector<8x8xbf16>
    %184 = vector.extract_strided_slice %149 {offsets = [0, 16], sizes = [8, 8], strides = [1, 1]} : vector<8x32xbf16> to vector<8x8xbf16>
    %cst_76 = arith.constant dense<0.000000e+00> : vector<8x8xf32>
    %185 = tpu.matmul %183, %184, %cst_76 {dimension_numbers = #tpu.dot_dimension_numbers<[1], [1], [0], [0], [0, 0, 1, 0], [], []>} : vector<8x8xbf16>, vector<8x8xbf16>, vector<8x8xf32> -> vector<8x8xf32>
    %cst_77 = arith.constant dense<0xFF800000> : vector<8xf32>
    %186 = vector.multi_reduction <maximumf>, %185, %cst_77 [1] : vector<8x8xf32> to vector<8xf32>
    %187 = vector.shape_cast %186 : vector<8xf32> to vector<8x1xf32>
    %188 = vector.broadcast %187 : vector<8x1xf32> to vector<8x8xf32>
    %189 = arith.subf %185, %188 : vector<8x8xf32>
    %190 = math.exp %189 : vector<8x8xf32>
    %cst_78 = arith.constant dense<0.000000e+00> : vector<8xf32>
    %191 = vector.multi_reduction <add>, %190, %cst_78 [1] : vector<8x8xf32> to vector<8xf32>
    %192 = vector.shape_cast %191 : vector<8xf32> to vector<8x1xf32>
    %193 = tpu.reciprocal %192 {approx = true} : vector<8x1xf32> -> vector<8x1xf32>
    %194 = vector.broadcast %193 : vector<8x1xf32> to vector<8x8xf32>
    %195 = arith.mulf %190, %194 : vector<8x8xf32>
    %196 = arith.truncf %195 : vector<8x8xf32> to vector<8x8xbf16>
    %197 = vector.extract_strided_slice %150 {offsets = [0, 16], sizes = [8, 8], strides = [1, 1]} : vector<8x32xbf16> to vector<8x8xbf16>
    %cst_79 = arith.constant dense<0.000000e+00> : vector<8x8xf32>
    %198 = tpu.matmul %196, %197, %cst_79 {dimension_numbers = #tpu.dot_dimension_numbers<[1], [0], [0], [1], [0, 0, 1, 1], [], []>} : vector<8x8xbf16>, vector<8x8xbf16>, vector<8x8xf32> -> vector<8x8xf32>
    %199 = vector.extract_strided_slice %148 {offsets = [0, 24], sizes = [8, 8], strides = [1, 1]} : vector<8x32xbf16> to vector<8x8xbf16>
    %200 = vector.extract_strided_slice %149 {offsets = [0, 24], sizes = [8, 8], strides = [1, 1]} : vector<8x32xbf16> to vector<8x8xbf16>
    %cst_80 = arith.constant dense<0.000000e+00> : vector<8x8xf32>
    %201 = tpu.matmul %199, %200, %cst_80 {dimension_numbers = #tpu.dot_dimension_numbers<[1], [1], [0], [0], [0, 0, 1, 0], [], []>} : vector<8x8xbf16>, vector<8x8xbf16>, vector<8x8xf32> -> vector<8x8xf32>
    %cst_81 = arith.constant dense<0xFF800000> : vector<8xf32>
    %202 = vector.multi_reduction <maximumf>, %201, %cst_81 [1] : vector<8x8xf32> to vector<8xf32>
    %203 = vector.shape_cast %202 : vector<8xf32> to vector<8x1xf32>
    %204 = vector.broadcast %203 : vector<8x1xf32> to vector<8x8xf32>
    %205 = arith.subf %201, %204 : vector<8x8xf32>
    %206 = math.exp %205 : vector<8x8xf32>
    %cst_82 = arith.constant dense<0.000000e+00> : vector<8xf32>
    %207 = vector.multi_reduction <add>, %206, %cst_82 [1] : vector<8x8xf32> to vector<8xf32>
    %208 = vector.shape_cast %207 : vector<8xf32> to vector<8x1xf32>
    %209 = tpu.reciprocal %208 {approx = true} : vector<8x1xf32> -> vector<8x1xf32>
    %210 = vector.broadcast %209 : vector<8x1xf32> to vector<8x8xf32>
    %211 = arith.mulf %206, %210 : vector<8x8xf32>
    %212 = arith.truncf %211 : vector<8x8xf32> to vector<8x8xbf16>
    %213 = vector.extract_strided_slice %150 {offsets = [0, 24], sizes = [8, 8], strides = [1, 1]} : vector<8x32xbf16> to vector<8x8xbf16>
    %cst_83 = arith.constant dense<0.000000e+00> : vector<8x8xf32>
    %214 = tpu.matmul %212, %213, %cst_83 {dimension_numbers = #tpu.dot_dimension_numbers<[1], [0], [0], [1], [0, 0, 1, 1], [], []>} : vector<8x8xbf16>, vector<8x8xbf16>, vector<8x8xf32> -> vector<8x8xf32>
    %215 = tpu.concatenate %166, %182, %198, %214 in 1 : vector<8x8xf32>, vector<8x8xf32>, vector<8x8xf32>, vector<8x8xf32> -> vector<8x32xf32>
    %216 = arith.truncf %215 : vector<8x32xf32> to vector<8x32xbf16>
    %cst_84 = arith.constant dense<0.000000e+00> : vector<8x32xf32>
    %217 = tpu.matmul %216, %143, %cst_84 {dimension_numbers = #tpu.dot_dimension_numbers<[1], [0], [0], [1], [0, 0, 1, 1], [], []>} : vector<8x32xbf16>, vector<32x32xbf16>, vector<8x32xf32> -> vector<8x32xf32>
    %218 = vector.broadcast %145 : vector<1x32xf32> to vector<8x32xf32>
    %219 = arith.addf %217, %218 : vector<8x32xf32>
    %220 = arith.addf %123, %219 : vector<8x32xf32>
    %c0_85 = arith.constant 0 : index
    %c0_86 = arith.constant 0 : index
    %c0_87 = arith.constant 0 : index
    %221 = vector.load %arg16[%c0_85, %c0_86, %c0_87] : memref<1x1x32xf32, #tpu.memory_space<vmem>>, vector<1x1x32xf32>
    %222 = vector.shape_cast %221 : vector<1x1x32xf32> to vector<1x32xf32>
    %c0_88 = arith.constant 0 : index
    %c0_89 = arith.constant 0 : index
    %c0_90 = arith.constant 0 : index
    %223 = vector.load %arg17[%c0_88, %c0_89, %c0_90] : memref<1x1x32xf32, #tpu.memory_space<vmem>>, vector<1x1x32xf32>
    %224 = vector.shape_cast %223 : vector<1x1x32xf32> to vector<1x32xf32>
    %cst_91 = arith.constant dense<0.000000e+00> : vector<8xf32>
    %225 = vector.multi_reduction <add>, %220, %cst_91 [1] : vector<8x32xf32> to vector<8xf32>
    %226 = vector.shape_cast %225 : vector<8xf32> to vector<8x1xf32>
    %cst_92 = arith.constant 3.200000e+01 : f32
    %227 = vector.broadcast %cst_92 : f32 to vector<8x1xf32>
    %228 = arith.divf %226, %227 : vector<8x1xf32>
    %229 = arith.mulf %220, %220 : vector<8x32xf32>
    %cst_93 = arith.constant dense<0.000000e+00> : vector<8xf32>
    %230 = vector.multi_reduction <add>, %229, %cst_93 [1] : vector<8x32xf32> to vector<8xf32>
    %231 = vector.shape_cast %230 : vector<8xf32> to vector<8x1xf32>
    %cst_94 = arith.constant 3.200000e+01 : f32
    %232 = vector.broadcast %cst_94 : f32 to vector<8x1xf32>
    %233 = arith.divf %231, %232 : vector<8x1xf32>
    %234 = arith.mulf %228, %228 : vector<8x1xf32>
    %235 = arith.subf %233, %234 : vector<8x1xf32>
    %cst_95 = arith.constant 0.000000e+00 : f32
    %236 = vector.broadcast %cst_95 : f32 to vector<8x1xf32>
    %237 = arith.maximumf %235, %236 : vector<8x1xf32>
    %238 = vector.broadcast %228 : vector<8x1xf32> to vector<8x32xf32>
    %239 = arith.subf %220, %238 : vector<8x32xf32>
    %cst_96 = arith.constant 9.99999974E-6 : f32
    %240 = vector.broadcast %cst_96 : f32 to vector<8x1xf32>
    %241 = arith.addf %237, %240 : vector<8x1xf32>
    %242 = math.rsqrt %241 : vector<8x1xf32>
    %243 = vector.broadcast %242 : vector<8x1xf32> to vector<8x32xf32>
    %244 = arith.mulf %239, %243 : vector<8x32xf32>
    %245 = vector.broadcast %222 : vector<1x32xf32> to vector<8x32xf32>
    %246 = arith.mulf %244, %245 : vector<8x32xf32>
    %247 = vector.broadcast %224 : vector<1x32xf32> to vector<8x32xf32>
    %248 = arith.addf %246, %247 : vector<8x32xf32>
    %c0_97 = arith.constant 0 : index
    %c0_98 = arith.constant 0 : index
    %c0_99 = arith.constant 0 : index
    %249 = vector.load %arg18[%c0_97, %c0_98, %c0_99] : memref<1x32x64xbf16, #tpu.memory_space<vmem>>, vector<1x32x64xbf16>
    %250 = vector.shape_cast %249 : vector<1x32x64xbf16> to vector<32x64xbf16>
    %c0_100 = arith.constant 0 : index
    %c0_101 = arith.constant 0 : index
    %c0_102 = arith.constant 0 : index
    %251 = vector.load %arg19[%c0_100, %c0_101, %c0_102] : memref<1x1x64xf32, #tpu.memory_space<vmem>>, vector<1x1x64xf32>
    %252 = vector.shape_cast %251 : vector<1x1x64xf32> to vector<1x64xf32>
    %253 = arith.truncf %248 : vector<8x32xf32> to vector<8x32xbf16>
    %cst_103 = arith.constant dense<0.000000e+00> : vector<8x64xf32>
    %254 = tpu.matmul %253, %250, %cst_103 {dimension_numbers = #tpu.dot_dimension_numbers<[1], [0], [0], [1], [0, 0, 1, 1], [], []>} : vector<8x32xbf16>, vector<32x64xbf16>, vector<8x64xf32> -> vector<8x64xf32>
    %255 = vector.broadcast %252 : vector<1x64xf32> to vector<8x64xf32>
    %256 = arith.addf %254, %255 : vector<8x64xf32>
    %cst_104 = arith.constant 0.000000e+00 : f32
    %257 = vector.broadcast %cst_104 : f32 to vector<8x64xf32>
    %258 = arith.maximumf %256, %257 : vector<8x64xf32>
    %c0_105 = arith.constant 0 : index
    %c0_106 = arith.constant 0 : index
    %c0_107 = arith.constant 0 : index
    %259 = vector.load %arg20[%c0_105, %c0_106, %c0_107] : memref<1x64x32xbf16, #tpu.memory_space<vmem>>, vector<1x64x32xbf16>
    %260 = vector.shape_cast %259 : vector<1x64x32xbf16> to vector<64x32xbf16>
    %c0_108 = arith.constant 0 : index
    %c0_109 = arith.constant 0 : index
    %c0_110 = arith.constant 0 : index
    %261 = vector.load %arg21[%c0_108, %c0_109, %c0_110] : memref<1x1x32xf32, #tpu.memory_space<vmem>>, vector<1x1x32xf32>
    %262 = vector.shape_cast %261 : vector<1x1x32xf32> to vector<1x32xf32>
    %263 = arith.truncf %258 : vector<8x64xf32> to vector<8x64xbf16>
    %cst_111 = arith.constant dense<0.000000e+00> : vector<8x32xf32>
    %264 = tpu.matmul %263, %260, %cst_111 {dimension_numbers = #tpu.dot_dimension_numbers<[1], [0], [0], [1], [0, 0, 1, 1], [], []>} : vector<8x64xbf16>, vector<64x32xbf16>, vector<8x32xf32> -> vector<8x32xf32>
    %265 = vector.broadcast %262 : vector<1x32xf32> to vector<8x32xf32>
    %266 = arith.addf %264, %265 : vector<8x32xf32>
    %267 = arith.addf %248, %266 : vector<8x32xf32>
    %c0_112 = arith.constant 0 : index
    %c0_113 = arith.constant 0 : index
    %c0_114 = arith.constant 0 : index
    %268 = vector.load %arg22[%c0_112, %c0_113, %c0_114] : memref<1x1x32xf32, #tpu.memory_space<vmem>>, vector<1x1x32xf32>
    %269 = vector.shape_cast %268 : vector<1x1x32xf32> to vector<1x32xf32>
    %c0_115 = arith.constant 0 : index
    %c0_116 = arith.constant 0 : index
    %c0_117 = arith.constant 0 : index
    %270 = vector.load %arg23[%c0_115, %c0_116, %c0_117] : memref<1x1x32xf32, #tpu.memory_space<vmem>>, vector<1x1x32xf32>
    %271 = vector.shape_cast %270 : vector<1x1x32xf32> to vector<1x32xf32>
    %cst_118 = arith.constant dense<0.000000e+00> : vector<8xf32>
    %272 = vector.multi_reduction <add>, %267, %cst_118 [1] : vector<8x32xf32> to vector<8xf32>
    %273 = vector.shape_cast %272 : vector<8xf32> to vector<8x1xf32>
    %cst_119 = arith.constant 3.200000e+01 : f32
    %274 = vector.broadcast %cst_119 : f32 to vector<8x1xf32>
    %275 = arith.divf %273, %274 : vector<8x1xf32>
    %276 = arith.mulf %267, %267 : vector<8x32xf32>
    %cst_120 = arith.constant dense<0.000000e+00> : vector<8xf32>
    %277 = vector.multi_reduction <add>, %276, %cst_120 [1] : vector<8x32xf32> to vector<8xf32>
    %278 = vector.shape_cast %277 : vector<8xf32> to vector<8x1xf32>
    %cst_121 = arith.constant 3.200000e+01 : f32
    %279 = vector.broadcast %cst_121 : f32 to vector<8x1xf32>
    %280 = arith.divf %278, %279 : vector<8x1xf32>
    %281 = arith.mulf %275, %275 : vector<8x1xf32>
    %282 = arith.subf %280, %281 : vector<8x1xf32>
    %cst_122 = arith.constant 0.000000e+00 : f32
    %283 = vector.broadcast %cst_122 : f32 to vector<8x1xf32>
    %284 = arith.maximumf %282, %283 : vector<8x1xf32>
    %285 = vector.broadcast %275 : vector<8x1xf32> to vector<8x32xf32>
    %286 = arith.subf %267, %285 : vector<8x32xf32>
    %cst_123 = arith.constant 9.99999974E-6 : f32
    %287 = vector.broadcast %cst_123 : f32 to vector<8x1xf32>
    %288 = arith.addf %284, %287 : vector<8x1xf32>
    %289 = math.rsqrt %288 : vector<8x1xf32>
    %290 = vector.broadcast %289 : vector<8x1xf32> to vector<8x32xf32>
    %291 = arith.mulf %286, %290 : vector<8x32xf32>
    %292 = vector.broadcast %269 : vector<1x32xf32> to vector<8x32xf32>
    %293 = arith.mulf %291, %292 : vector<8x32xf32>
    %294 = vector.broadcast %271 : vector<1x32xf32> to vector<8x32xf32>
    %295 = arith.addf %293, %294 : vector<8x32xf32>
    %c0_124 = arith.constant 0 : index
    %c0_125 = arith.constant 0 : index
    %296 = vector.load %arg29[%c0_124, %c0_125] : memref<8x32xf32, #tpu.memory_space<vmem>>, vector<8x32xf32>
    tpu.vector_store %arg29[%c0_124, %c0_125], %295 {strides = array<i32>} : memref<8x32xf32, #tpu.memory_space<vmem>>, vector<8x32xf32>,
    %c1_i32 = arith.constant 1 : i32
    %297 = arith.cmpi eq, %arg1, %c1_i32 : i32
    %298 = arith.extui %297 : i1 to i32
    %c0_i32_126 = arith.constant 0 : i32
    %299 = arith.cmpi ne, %298, %c0_i32_126 : i32
    scf.if %299 {
      %c0_127 = arith.constant 0 : index
      %c0_128 = arith.constant 0 : index
      %300 = vector.load %arg24[%c0_127, %c0_128] : memref<1x32xf32, #tpu.memory_space<vmem>>, vector<1x32xf32>
      %c0_129 = arith.constant 0 : index
      %c0_130 = arith.constant 0 : index
      %301 = vector.load %arg25[%c0_129, %c0_130] : memref<1x32xf32, #tpu.memory_space<vmem>>, vector<1x32xf32>
      %cst_131 = arith.constant dense<0.000000e+00> : vector<8xf32>
      %302 = vector.multi_reduction <add>, %295, %cst_131 [1] : vector<8x32xf32> to vector<8xf32>
      %303 = vector.shape_cast %302 : vector<8xf32> to vector<8x1xf32>
      %cst_132 = arith.constant 3.200000e+01 : f32
      %304 = vector.broadcast %cst_132 : f32 to vector<8x1xf32>
      %305 = arith.divf %303, %304 : vector<8x1xf32>
      %306 = arith.mulf %295, %295 : vector<8x32xf32>
      %cst_133 = arith.constant dense<0.000000e+00> : vector<8xf32>
      %307 = vector.multi_reduction <add>, %306, %cst_133 [1] : vector<8x32xf32> to vector<8xf32>
      %308 = vector.shape_cast %307 : vector<8xf32> to vector<8x1xf32>
      %cst_134 = arith.constant 3.200000e+01 : f32
      %309 = vector.broadcast %cst_134 : f32 to vector<8x1xf32>
      %310 = arith.divf %308, %309 : vector<8x1xf32>
      %311 = arith.mulf %305, %305 : vector<8x1xf32>
      %312 = arith.subf %310, %311 : vector<8x1xf32>
      %cst_135 = arith.constant 0.000000e+00 : f32
      %313 = vector.broadcast %cst_135 : f32 to vector<8x1xf32>
      %314 = arith.maximumf %312, %313 : vector<8x1xf32>
      %315 = vector.broadcast %305 : vector<8x1xf32> to vector<8x32xf32>
      %316 = arith.subf %295, %315 : vector<8x32xf32>
      %cst_136 = arith.constant 9.99999974E-6 : f32
      %317 = vector.broadcast %cst_136 : f32 to vector<8x1xf32>
      %318 = arith.addf %314, %317 : vector<8x1xf32>
      %319 = math.rsqrt %318 : vector<8x1xf32>
      %320 = vector.broadcast %319 : vector<8x1xf32> to vector<8x32xf32>
      %321 = arith.mulf %316, %320 : vector<8x32xf32>
      %322 = vector.broadcast %300 : vector<1x32xf32> to vector<8x32xf32>
      %323 = arith.mulf %321, %322 : vector<8x32xf32>
      %324 = vector.broadcast %301 : vector<1x32xf32> to vector<8x32xf32>
      %325 = arith.addf %323, %324 : vector<8x32xf32>
      %c0_137 = arith.constant 0 : index
      %c0_138 = arith.constant 0 : index
      %326 = vector.load %arg26[%c0_137, %c0_138] : memref<32x128xbf16, #tpu.memory_space<vmem>>, vector<32x128xbf16>
      %c0_139 = arith.constant 0 : index
      %c0_140 = arith.constant 0 : index
      %327 = vector.load %arg27[%c0_139, %c0_140] : memref<1x128xf32, #tpu.memory_space<vmem>>, vector<1x128xf32>
      %328 = arith.truncf %325 : vector<8x32xf32> to vector<8x32xbf16>
      %cst_141 = arith.constant dense<0.000000e+00> : vector<8x128xf32>
      %329 = tpu.matmul %328, %326, %cst_141 {dimension_numbers = #tpu.dot_dimension_numbers<[1], [0], [0], [1], [0, 0, 1, 1], [], []>} : vector<8x32xbf16>, vector<32x128xbf16>, vector<8x128xf32> -> vector<8x128xf32>
      %330 = vector.broadcast %327 : vector<1x128xf32> to vector<8x128xf32>
      %331 = arith.addf %329, %330 : vector<8x128xf32>
      %c0_142 = arith.constant 0 : index
      %c0_143 = arith.constant 0 : index
      %c0_144 = arith.constant 0 : index
      %332 = vector.load %arg28[%c0_142, %c0_143, %c0_144] : memref<1x8x128xf32, #tpu.memory_space<vmem>>, vector<1x8x128xf32>
      %333 = vector.shape_cast %332 : vector<1x8x128xf32> to vector<8x128xf32>
      %334 = vector.shape_cast %331 : vector<8x128xf32> to vector<1x8x128xf32>
      tpu.vector_store %arg28[%c0_142, %c0_143, %c0_144], %334 {strides = array<i32>} : memref<1x8x128xf32, #tpu.memory_space<vmem>>, vector<1x8x128xf32>,
    } else {
    }
    return
  }
  func.func @transform_0(%arg0: i32, %arg1: i32) -> (i32, i32, i32) {
    %c0_i32 = arith.constant 0 : i32
    %c0_i32_0 = arith.constant 0 : i32
    %c0_i32_1 = arith.constant 0 : i32
    return %arg0, %c0_i32, %c0_i32_0 : i32, i32, i32
  }
  func.func @transform_1(%arg0: i32, %arg1: i32) -> (i32, i32, i32) {
    %c0_i32 = arith.constant 0 : i32
    %c0_i32_0 = arith.constant 0 : i32
    %c0_i32_1 = arith.constant 0 : i32
    return %arg0, %c0_i32, %c0_i32_0 : i32, i32, i32
  }
  func.func @transform_2(%arg0: i32, %arg1: i32) -> (i32, i32, i32) {
    %c0_i32 = arith.constant 0 : i32
    %c0_i32_0 = arith.constant 0 : i32
    %c0_i32_1 = arith.constant 0 : i32
    return %arg1, %c0_i32, %c0_i32_0 : i32, i32, i32
  }
  func.func @transform_3(%arg0: i32, %arg1: i32) -> (i32, i32, i32) {
    %c0_i32 = arith.constant 0 : i32
    %c0_i32_0 = arith.constant 0 : i32
    %c0_i32_1 = arith.constant 0 : i32
    return %arg1, %c0_i32, %c0_i32_0 : i32, i32, i32
  }
  func.func @transform_4(%arg0: i32, %arg1: i32) -> (i32, i32, i32) {
    %c0_i32 = arith.constant 0 : i32
    %c0_i32_0 = arith.constant 0 : i32
    %c0_i32_1 = arith.constant 0 : i32
    return %arg1, %c0_i32, %c0_i32_0 : i32, i32, i32
  }
  func.func @transform_5(%arg0: i32, %arg1: i32) -> (i32, i32, i32) {
    %c0_i32 = arith.constant 0 : i32
    %c0_i32_0 = arith.constant 0 : i32
    %c0_i32_1 = arith.constant 0 : i32
    return %arg1, %c0_i32, %c0_i32_0 : i32, i32, i32
  }
  func.func @transform_6(%arg0: i32, %arg1: i32) -> (i32, i32, i32) {
    %c0_i32 = arith.constant 0 : i32
    %c0_i32_0 = arith.constant 0 : i32
    %c0_i32_1 = arith.constant 0 : i32
    return %arg1, %c0_i32, %c0_i32_0 : i32, i32, i32
  }
  func.func @transform_7(%arg0: i32, %arg1: i32) -> (i32, i32, i32) {
    %c0_i32 = arith.constant 0 : i32
    %c0_i32_0 = arith.constant 0 : i32
    %c0_i32_1 = arith.constant 0 : i32
    return %arg1, %c0_i32, %c0_i32_0 : i32, i32, i32
  }
  func.func @transform_8(%arg0: i32, %arg1: i32) -> (i32, i32, i32) {
    %c0_i32 = arith.constant 0 : i32
    %c0_i32_0 = arith.constant 0 : i32
    %c0_i32_1 = arith.constant 0 : i32
    return %arg1, %c0_i32, %c0_i32_0 : i32, i32, i32
  }
  func.func @transform_9(%arg0: i32, %arg1: i32) -> (i32, i32, i32) {
    %c0_i32 = arith.constant 0 : i32
    %c0_i32_0 = arith.constant 0 : i32
    %c0_i32_1 = arith.constant 0 : i32
    return %arg1, %c0_i32, %c0_i32_0 : i32, i32, i32
  }
  func.func @transform_10(%arg0: i32, %arg1: i32) -> (i32, i32, i32) {
    %c0_i32 = arith.constant 0 : i32
    %c0_i32_0 = arith.constant 0 : i32
    %c0_i32_1 = arith.constant 0 : i32
    return %arg1, %c0_i32, %c0_i32_0 : i32, i32, i32
  }
  func.func @transform_11(%arg0: i32, %arg1: i32) -> (i32, i32, i32) {
    %c0_i32 = arith.constant 0 : i32
    %c0_i32_0 = arith.constant 0 : i32
    %c0_i32_1 = arith.constant 0 : i32
    return %arg1, %c0_i32, %c0_i32_0 : i32, i32, i32
  }
  func.func @transform_12(%arg0: i32, %arg1: i32) -> (i32, i32, i32) {
    %c0_i32 = arith.constant 0 : i32
    %c0_i32_0 = arith.constant 0 : i32
    %c0_i32_1 = arith.constant 0 : i32
    return %arg1, %c0_i32, %c0_i32_0 : i32, i32, i32
  }
  func.func @transform_13(%arg0: i32, %arg1: i32) -> (i32, i32, i32) {
    %c0_i32 = arith.constant 0 : i32
    %c0_i32_0 = arith.constant 0 : i32
    %c0_i32_1 = arith.constant 0 : i32
    return %arg1, %c0_i32, %c0_i32_0 : i32, i32, i32
  }
  func.func @transform_14(%arg0: i32, %arg1: i32) -> (i32, i32, i32) {
    %c0_i32 = arith.constant 0 : i32
    %c0_i32_0 = arith.constant 0 : i32
    %c0_i32_1 = arith.constant 0 : i32
    return %arg1, %c0_i32, %c0_i32_0 : i32, i32, i32
  }
  func.func @transform_15(%arg0: i32, %arg1: i32) -> (i32, i32, i32) {
    %c0_i32 = arith.constant 0 : i32
    %c0_i32_0 = arith.constant 0 : i32
    %c0_i32_1 = arith.constant 0 : i32
    return %arg1, %c0_i32, %c0_i32_0 : i32, i32, i32
  }
  func.func @transform_16(%arg0: i32, %arg1: i32) -> (i32, i32, i32) {
    %c0_i32 = arith.constant 0 : i32
    %c0_i32_0 = arith.constant 0 : i32
    %c0_i32_1 = arith.constant 0 : i32
    return %arg1, %c0_i32, %c0_i32_0 : i32, i32, i32
  }
  func.func @transform_17(%arg0: i32, %arg1: i32) -> (i32, i32, i32) {
    %c0_i32 = arith.constant 0 : i32
    %c0_i32_0 = arith.constant 0 : i32
    %c0_i32_1 = arith.constant 0 : i32
    return %arg1, %c0_i32, %c0_i32_0 : i32, i32, i32
  }
  func.func @transform_18(%arg0: i32, %arg1: i32) -> (i32, i32, i32) {
    %c0_i32 = arith.constant 0 : i32
    %c0_i32_0 = arith.constant 0 : i32
    %c0_i32_1 = arith.constant 0 : i32
    return %arg1, %c0_i32, %c0_i32_0 : i32, i32, i32
  }
  func.func @transform_19(%arg0: i32, %arg1: i32) -> (i32, i32, i32) {
    %c0_i32 = arith.constant 0 : i32
    %c0_i32_0 = arith.constant 0 : i32
    %c0_i32_1 = arith.constant 0 : i32
    return %arg1, %c0_i32, %c0_i32_0 : i32, i32, i32
  }
  func.func @transform_20(%arg0: i32, %arg1: i32) -> (i32, i32, i32) {
    %c0_i32 = arith.constant 0 : i32
    %c0_i32_0 = arith.constant 0 : i32
    %c0_i32_1 = arith.constant 0 : i32
    return %arg1, %c0_i32, %c0_i32_0 : i32, i32, i32
  }
  func.func @transform_21(%arg0: i32, %arg1: i32) -> (i32, i32, i32) {
    %c0_i32 = arith.constant 0 : i32
    %c0_i32_0 = arith.constant 0 : i32
    %c0_i32_1 = arith.constant 0 : i32
    return %arg1, %c0_i32, %c0_i32_0 : i32, i32, i32
  }
  func.func @transform_22(%arg0: i32, %arg1: i32) -> (i32, i32) {
    %c0_i32 = arith.constant 0 : i32
    %c0_i32_0 = arith.constant 0 : i32
    %c0_i32_1 = arith.constant 0 : i32
    return %c0_i32, %c0_i32_0 : i32, i32
  }
  func.func @transform_23(%arg0: i32, %arg1: i32) -> (i32, i32) {
    %c0_i32 = arith.constant 0 : i32
    %c0_i32_0 = arith.constant 0 : i32
    %c0_i32_1 = arith.constant 0 : i32
    return %c0_i32, %c0_i32_0 : i32, i32
  }
  func.func @transform_24(%arg0: i32, %arg1: i32) -> (i32, i32) {
    %c0_i32 = arith.constant 0 : i32
    %c0_i32_0 = arith.constant 0 : i32
    %c0_i32_1 = arith.constant 0 : i32
    return %c0_i32, %c0_i32_0 : i32, i32
  }
  func.func @transform_25(%arg0: i32, %arg1: i32) -> (i32, i32) {
    %c0_i32 = arith.constant 0 : i32
    %c0_i32_0 = arith.constant 0 : i32
    %c0_i32_1 = arith.constant 0 : i32
    return %c0_i32, %c0_i32_0 : i32, i32
  }
  func.func @transform_26(%arg0: i32, %arg1: i32) -> (i32, i32, i32) {
    %c0_i32 = arith.constant 0 : i32
    %c0_i32_0 = arith.constant 0 : i32
    %c0_i32_1 = arith.constant 0 : i32
    return %arg0, %c0_i32, %c0_i32_0 : i32, i32, i32
  }
}

</mosaic_0001>

<bundles_post_ra>
// kernel: forward.2
= control target key start
LH: loop header
LB: loop body
LE: loop exit
PB: predicated region body
PF: predicated region fallthrough
CT: control target
= control target key end

     0   :  { %s2134_s18 = smov 0   ;;  %s2136_s19 = smov 0   ;;  %s2395_s0 = inlined_call_operand.vmem [shape: f32[2,8,32], index: 0, kind: input, shape index: {}]   ;;  %s2396_s1 = inlined_call_operand.vmem [shape: bf16[2,32,96], index: 1, kind: input, shape index: {}]   ;;  %s2397_s2 = inlined_call_operand.vmem [shape: f32[2,1,96], index: 2, kind: input, shape index: {}]   ;;  %s2398_s3 = inlined_call_operand.vmem [shape: bf16[2,32,32], index: 3, kind: input, shape index: {}]   ;;  %s2399_s4 = inlined_call_operand.vmem [shape: f32[2,1,32], index: 4, kind: input, shape index: {}]   ;;  %s2400_s5 = inlined_call_operand.vmem [shape: f32[2,1,32], index: 5, kind: input, shape index: {}]   ;;  %s2401_s6 = inlined_call_operand.vmem [shape: f32[2,1,32], index: 6, kind: input, shape index: {}]   ;;  %s2402_s7 = inlined_call_operand.vmem [shape: bf16[2,32,64], index: 7, kind: input, shape index: {}]   ;;  %s2403_s8 = inlined_call_operand.vmem [shape: f32[2,1,64], index: 8, kind: input, shape index: {}]   ;;  %s2404_s9 = inlined_call_operand.vmem [shape: bf16[2,64,32], index: 9, kind: input, shape index: {}]   ;;  %s2405_s10 = inlined_call_operand.vmem [shape: f32[2,1,32], index: 10, kind: input, shape index: {}]   ;;  %s2406_s11 = inlined_call_operand.vmem [shape: f32[2,1,32], index: 11, kind: input, shape index: {}]   ;;  %s2407_s12 = inlined_call_operand.vmem [shape: f32[2,1,32], index: 12, kind: input, shape index: {}]   ;;  %s2408_s13 = inlined_call_operand.vmem [shape: f32[1,32], index: 13, kind: input, shape index: {}]   ;;  %s2409_s14 = inlined_call_operand.vmem [shape: f32[1,32], index: 14, kind: input, shape index: {}]   ;;  %s2410_s15 = inlined_call_operand.vmem [shape: f32[2,8,32], index: 15, kind: output, shape index: {}]  }
   0x1   :  { %2415 = sst [smem:[#allocation9_spill]] %s2395_s0  ;;  %s2138_s20 = smov 0  }
   0x2   :  { %2416 = sst [smem:[#allocation10_spill]] %s2396_s1  ;;  %s2140_s21 = smov 0  }
   0x3   :  { %2417 = sst [smem:[#allocation11_spill]] %s2398_s3  ;;  %s2142_s22 = smov 0  }
   0x4   :  { %2418 = sst [smem:[#allocation12_spill]] %s2402_s7 }
   0x5   :  { %2419 = sst [smem:[#allocation13_spill]] %s2403_s8 }
   0x6   :  { %2420 = sst [smem:[#allocation14_spill]] %s2407_s12 }
   0x7   :  { %2421 = sst [smem:[#allocation15_spill]] %s2408_s13 }
   0x8   :  { %2422 = sst [smem:[#allocation16_spill]] %s2409_s14 }
   0x9   :  { %2423 = sst [smem:[#allocation17_spill]] %s2410_s15 }
   0xa LB: > { %2424 = sst [smem:[#allocation3_spill]] %s2020_s18  ;;  %s34_s23 = sadd.s32 1, %s2028_s20  ;;  %s2036_s22 = sphi %s2142_s22, %s25_s22   ;;  %s2032_s21 = sphi %s2140_s21, %s2452_s21   ;;  %s2028_s20 = sphi %s2138_s20, %s2451_s20   ;;  %s2024_s19 = sphi %s2136_s19, %s2450_s19   ;;  %s2020_s18 = sphi %s2134_s18, %s2449_s18  }
   0xb   : > { %2425 = sst [smem:[#allocation4_spill]] %s2028_s20  ;;  %s37_s24 = sadd.s32 1, %s2032_s21 }
   0xc   : > { %2426 = sst [smem:[#allocation5_spill]] %s2032_s21  ;;  %p35_p0 = scmp.ge.s32.totalorder %s34_s23, 2 }
   0xd   : > { %2427 = sst [smem:[#allocation6_spill]] %s2036_s22  ;;  %p1745_p1 = scmp.ge.s32.totalorder %s2036_s22, 1 }
   0xe   : > { %p552_p2 = scmp.lt.s32.totalorder %s2036_s22, 5  ;;  %s2454_s23 = smov (%p35_p0, %s34_s23), 0 }
   0xf   : > { %2428 = sst [smem:[#allocation7_spill]] %s2454_s23  ;;  %s2456_s24 = smov (!%p35_p0, %s37_s24), %s2032_s21 }
  0x10   : > { %p553_p3 = pnand %p1745_p1, %p552_p2  ;;  %p39_p4 = scmp.ge.s32.totalorder %s2456_s24, 2 }
  0x11   : > { %p642_p5 = scmp.lt.s32.totalorder (!%p553_p3), %s2024_s19, 1  ;;  %p646_p6 = scmp.lt.s32.totalorder (!%p553_p3), %s2020_s18, 1 }
  0x12   : > { %s2458_s24 = smov (%p39_p4, %s2456_s24), 0  ;;  %556 = sbr.rel (%p553_p3) target bundleno = 2362 (0x93a), region = 80 }
  0x13   : > { %2429 = sst [smem:[#allocation8_spill]] %s2458_s24 }
  0x14   : > { %s2430_s0 = sld [smem:[#allocation9_spill]] (!%p553_p3) }
  0x15   : > { %s2431_s1 = sld [smem:[#allocation10_spill]] (!%p553_p3) }
  0x16   : > { %s2432_s3 = sld [smem:[#allocation11_spill]] (!%p553_p3) }
  0x17   : > { %s2460_s19 = smov (!%p642_p5, %s2024_s19), 1  ;;  %s2433_s7 = sld [smem:[#allocation12_spill]] }
  0x18   : > { %s2168_s25 = scalar_select %p646_p6, %s2020_s18, 1 }
  0x19   : > { %s1746_s26 = sshll.u32 %s2460_s19, 3  ;;  %s2435_s17 = sld [smem:[#allocation14_spill]] }
  0x1a   : > { %s645_s29 = scalar_lea.vmem %s2430_s0, %s1746_s26  ;;  %s1792_s30 = sshll.u32 %s2168_s25, 4 }
  0x1b   : > { %s650_s24 = scalar_lea.vmem %s2431_s1, %s1792_s30  ;;  %s683_s15 = scalar_lea.vmem %s2405_s10, %s2168_s25 }
  0x1c   : > { %s2184_s13 = scalar_lea.vmem %s2432_s3, %s1792_s30  ;;  %s1795_s3 = sshll.u32 %s2168_s25, 5 }
  0x1d   : > { %s2201_s23 = scalar_lea.vmem %s2433_s7, %s1792_s30  ;;  %s2215_s0 = scalar_lea.vmem %s2404_s9, %s1795_s3 }
  0x1e   : > { %s686_s1 = scalar_lea.vmem %s2406_s11, %s2168_s25  ;;  %s2436_s20 = sld [smem:[#allocation17_spill]] }
  0x1f   : > { %s689_s7 = scalar_lea.vmem %s2435_s17, %s2168_s25  ;;  %s2437_s18 = sld [smem:[#allocation3_spill]] }
  0x24   : > { %s2228_s8 = scalar_lea.vmem %s2436_s20, %s1746_s26 }
  0x25   : > { %p1756_p7 = scmp.ne.s32.totalorder %s2437_s18, 0 }
  0x27   : > { %698 = sbr.rel (%p1756_p7) target bundleno = 46 (0x2e), region = 84 }
  0x2c   : > { %v699_v0 = vld [vmem:[%s645_s29] sm:$0xff]  ;;  %vm700_vm0 = vcmask 261120  }
  0x2d   : > { %701 = vst.msk [vmem:[#allocation2] sm:$0xff] %vm700_vm0, %v699_v0 }
  0x2e PF: > { %v1966_v1 = vld [vmem:[%s650_s24 + $0x8] sm:$0xff]   ;;  %v2038_v2 = vmov 0.0   ;;  %v1967_v3 = vld [vmem:[%s650_s24] sm:$0xff]   ;;  %vm2039_vm1 = vmmov 0   ;;  %vm727_vm2 = vcmask 261120   ;;  %s2438_s24 = scalar_lea.vmem %s2397_s2, %s2168_s25  ;;  %s2040_s26 = smov 96  }
  0x2f   : > { %1826 = vmatprep.subr.bf16.mxu0 %v2038_v2  ;;  %1834 = vmatprep.subr.bf16.mxu1 %v2038_v2  ;;  %v1757_v6 = vld [vmem:[%s2438_s24] ss:$0 sm:$0xff]  ;;  %s2041_s29 = smov 120   ;;  %s2042_s17 = smov 88   ;;  %vm782_vm3 = vcmask 64512   ;;  %vm846_vm4 = vcmask 1043456  }
  0x30   : > { %1827 = vmatpush3.bf16.msra.mxu0 %v1966_v1  ;;  %1830 = vmatprep.mubr.msk.bf16.mxu0 %vm2039_vm1, %v2038_v2  ;;  %s2043_s19 = smov 80   ;;  %s2044_s27 = smov 112   ;;  %vm1234_vm5 = vcmask 130048   ;;  %vm1236_vm6 = vcmask 195584   ;;  %vm1442_vm7 = vcmask 523264  }
  0x31   : > { %1828 = vmatprep.subr.bf16.mxu0 %v2038_v2  ;;  %1836 = vmatprep.mubr.msk.bf16.mxu1 %vm2039_vm1, %v2038_v2  ;;  %s2045_s28 = smov 72   ;;  %s2046_s12 = smov 104  }
  0x32   : > { %s2047_s16 = smov 56   ;;  %s2048_s30 = smov 64  }
  0x33   : > { %s2049_s21 = smov 40   ;;  %s2050_s14 = smov 48  }
  0x34   : > { %v2235_v4 = vld [vmem:[#allocation2] sm:$0xff]  ;;  %1829 = vmatpush3.bf16.msra.mxu0 %v1967_v3  ;;  %s2051_s22 = smov 8   ;;  %s2052_s18 = smov 16  }
  0x35   : > { %v708_v5 = vpack.c.bf16 %v2235_v4, %v2235_v4  ;;  %1840 = vmatprep.subr.bf16.mxu0 %v2038_v2  ;;  %s2053_s3 = smov 24   ;;  %s2439_s24 = scalar_lea.vmem %s2399_s4, %s2168_s25 }
  0x37   : > { %1831 = vmatmul.mubr.msk.bf16.vlgmr.msra.gmra.mxu0 %vm727_vm2, %v708_v5 }
  0x38   : > { %1842 = vmatprep.mubr.msk.bf16.mxu0 %vm2039_vm1, %v2038_v2 }
  0xf7   : > { %v765_v7 = vpop.f32.mrf.mxu0 }
  0xf8   : > { %v766_v8 = vadd.f32 %v1757_v6, %v765_v7 }
  0xf9   : > { %v1832_v9 = vpop.f32.mrf.mxu0 }
  0xfa   : > { %v776_v10 = vmul.f32 0.35355338, %v766_v8  ;;  %v2251_v11 = vpack.c.bf16 %v766_v8, %v766_v8 }
  0xfb   : > { %v768_v12 = vpop.f32.mrf.mxu0 }
  0xfc   : > { %v777_v13 = vpack.c.bf16 %v776_v10, %v776_v10  ;;  %780 = vrot.lane.b32.xlu0 %v2251_v11, %s2040_s26 }
  0xfd   : > { %v1833_v14 = vpop.f32.mrf.mxu0 }
  0xfe   : > { %891 = vrot.lane.b32.xlu1 %v777_v13, %s2041_s29  ;;  %s2440_s29 = scalar_lea.vmem %s2400_s5, %s2168_s25 }
 0x100   : > { %893 = vrot.lane.b32.xlu0 %v2251_v11, %s2042_s17 }
 0x102   : > { %1003 = vrot.lane.b32.xlu1 %v2251_v11, %s2043_s19 }
 0x104   : > { %1001 = vrot.lane.b32.xlu0 %v777_v13, %s2044_s27  ;;  %s2441_s27 = scalar_lea.vmem %s2401_s6, %s2168_s25 }
 0x106   : > { %1113 = vrot.lane.b32.xlu1 %v2251_v11, %s2045_s28 }
 0x108   : > { %1111 = vrot.lane.b32.xlu0 %v777_v13, %s2046_s12 }
 0x16e   : > { %v781_v15 = vpop.permute.xlu0 %780 }
 0x16f   : > { %v787_v16 = vsel %vm782_vm3, %v781_v15, 0 }
 0x170   : > { %1835 = vmatpush3.bf16.xpose.msra.mxu1 %v787_v16  ;;  %v892_v18 = vpop.permute.xlu1 %891 }
 0x171   : > { %1846 = vmatprep.subr.bf16.mxu1 %v2038_v2 }
 0x172   : > { %v894_v17 = vpop.permute.xlu0 %893 }
 0x173   : > { %v899_v19 = vsel %vm782_vm3, %v894_v17, 0 }
 0x174   : > { %v1004_v20 = vpop.permute.xlu1 %1003 }
 0x175   : > { %v1009_v21 = vsel %vm782_vm3, %v1004_v20, 0 }
 0x176   : > { %v1002_v23 = vpop.permute.xlu0 %1001 }
 0x177   : > { %1837 = vmatmul.mubr.msk.bf16.vlgmr.msra.gmra.mxu1 %vm782_vm3, %v777_v13 }
 0x178   : > { %1847 = vmatpush3.bf16.xpose.msra.mxu1 %v899_v19  ;;  %1848 = vmatprep.mubr.msk.bf16.mxu1 %vm2039_vm1, %v2038_v2  ;;  %v1114_v22 = vpop.permute.xlu1 %1113 }
 0x179   : > { %1858 = vmatprep.subr.bf16.mxu1 %v2038_v2  ;;  %v1119_v24 = vsel %vm782_vm3, %v1114_v22, 0 }
 0x17a   : > { %v1112_v25 = vpop.permute.xlu0 %1111 }
 0x17f   : > { %1849 = vmatmul.mubr.msk.bf16.vlgmr.msra.gmra.mxu1 %vm782_vm3, %v892_v18 }
 0x180   : > { %1859 = vmatpush3.bf16.xpose.msra.mxu1 %v1009_v21  ;;  %1860 = vmatprep.mubr.msk.bf16.mxu1 %vm2039_vm1, %v2038_v2 }
 0x181   : > { %1870 = vmatprep.subr.bf16.mxu1 %v2038_v2 }
 0x187   : > { %1861 = vmatmul.mubr.msk.bf16.vlgmr.msra.gmra.mxu1 %vm782_vm3, %v1002_v23 }
 0x188   : > { %1871 = vmatpush3.bf16.xpose.msra.mxu1 %v1119_v24  ;;  %1872 = vmatprep.mubr.msk.bf16.mxu1 %vm2039_vm1, %v2038_v2 }
 0x189   : > { %1882 = vmatprep.subr.bf16.mxu1 %v2038_v2 }
 0x18f   : > { %1873 = vmatmul.mubr.msk.bf16.vlgmr.msra.gmra.mxu1 %vm782_vm3, %v1112_v25 }
 0x190   : > { %1886 = vmatprep.mubr.msk.bf16.mxu1 %vm2039_vm1, %v2038_v2 }
 0x237   : > { %v823_v26 = vpop.f32.mrf.mxu1 }
 0x238   : > { %v829_v27 = vsel %vm782_vm3, %v823_v26, -inf }
 0x239   : > { %830 = vmax.xlane.f32.xlu1 %v829_v27  ;;  %v1838_v28 = vpop.f32.mrf.mxu1 }
 0x23b   : > { %v826_v29 = vpop.f32.mrf.mxu1 }
 0x23d   : > { %v1839_v30 = vpop.f32.mrf.mxu1 }
 0x23f   : > { %v935_v31 = vpop.f32.mrf.mxu1 }
 0x240   : > { %v941_v32 = vsel %vm782_vm3, %v935_v31, -inf }
 0x241   : > { %942 = vmax.xlane.f32.xlu0 %v941_v32  ;;  %v1850_v33 = vpop.f32.mrf.mxu1 }
 0x243   : > { %v938_v34 = vpop.f32.mrf.mxu1 }
 0x245   : > { %v1851_v35 = vpop.f32.mrf.mxu1 }
 0x247   : > { %v1045_v36 = vpop.f32.mrf.mxu1 }
 0x248   : > { %v1051_v37 = vsel %vm782_vm3, %v1045_v36, -inf }
 0x249   : > { %1052 = vmax.xlane.f32.xlu0 %v1051_v37  ;;  %v1862_v38 = vpop.f32.mrf.mxu1  ;;  %v1969_v37 = vld [vmem:[%s2184_s13] sm:$0xff]  }
 0x24b   : > { %v1048_v39 = vpop.f32.mrf.mxu1 }
 0x24d   : > { %v1863_v40 = vpop.f32.mrf.mxu1 }
 0x24f   : > { %v1155_v41 = vpop.f32.mrf.mxu1 }
 0x250   : > { %v1161_v42 = vsel %vm782_vm3, %v1155_v41, -inf }
 0x251   : > { %1162 = vmax.xlane.f32.xlu1 %v1161_v42  ;;  %v1874_v43 = vpop.f32.mrf.mxu1 }
 0x253   : > { %v1158_v44 = vpop.f32.mrf.mxu1 }
 0x255   : > { %v1875_v45 = vpop.f32.mrf.mxu1 }
 0x2c2   : > { %v831_v46 = vpop.xlane.xlu1 %830 }
 0x2c3   : > { %v832_v47 = vsub.f32 %v823_v26, %v831_v46 }
 0x2c5   : > { %v833_v48 = vmul.f32 1.442695, %v832_v47 }
 0x2c7   : > { %1976 = vpow2.f32 %v833_v48 }
 0x2ca   : > { %v943_v49 = vpop.xlane.xlu0 %942 }
 0x2cb   : > { %v944_v50 = vsub.f32 %v935_v31, %v943_v49 }
 0x2cd   : > { %v945_v51 = vmul.f32 1.442695, %v944_v50 }
 0x2cf   : > { %1978 = vpow2.f32 %v945_v51 }
 0x2d2   : > { %v1053_v52 = vpop.xlane.xlu0 %1052 }
 0x2d3   : > { %v1054_v53 = vsub.f32 %v1045_v36, %v1053_v52  ;;  %v1968_v36 = vld [vmem:[%s2184_s13 + $0x8] sm:$0xff]   ;;  %s2445_s13 = sld [smem:[#allocation3_spill]] }
 0x2d4   : > { %v1977_v54 = vpop.eup %1976  ;;  %1883 = vmatpush3.bf16.msra.mxu1 %v1968_v36 }
 0x2d5   : > { %v1055_v55 = vmul.f32 1.442695, %v1054_v53  ;;  %v835_v56 = vsel %vm782_vm3, %v1977_v54, 0.0  ;;  %1884 = vmatprep.subr.bf16.mxu1 %v2038_v2  ;;  %v1769_v53 = vld [vmem:[%s2439_s24] ss:$0 sm:$0xff] }
 0x2d6   : > { %836 = vadd.xlane.f32.xlu0 %v835_v56 }
 0x2d7   : > { %1980 = vpow2.f32 %v1055_v55 }
 0x2d8   : > { %1885 = vmatpush3.bf16.msra.mxu1 %v1969_v37 }
 0x2d9   : > { %1898 = vmatprep.subr.bf16.mxu1 %v2038_v2  ;;  %p1787_p8 = scmp.ne.s32.totalorder %s2445_s13, 1 }
 0x2da   : > { %v1163_v61 = vpop.xlane.xlu1 %1162 }
 0x2db   : > { %v1164_v62 = vsub.f32 %v1155_v41, %v1163_v61 }
 0x2dc   : > { %v1979_v57 = vpop.eup %1978 }
 0x2dd   : > { %v947_v58 = vsel %vm782_vm3, %v1979_v57, 0.0  ;;  %v1165_v63 = vmul.f32 1.442695, %v1164_v62 }
 0x2de   : > { %948 = vadd.xlane.f32.xlu1 %v947_v58 }
 0x2df   : > { %1982 = vpow2.f32 %v1165_v63  ;;  %v1970_v63 = vld [vmem:[%s2201_s23 + $0x8] sm:$0xff]  }
 0x2e4   : > { %v1981_v59 = vpop.eup %1980 }
 0x2e5   : > { %v1057_v60 = vsel %vm782_vm3, %v1981_v59, 0.0 }
 0x2e6   : > { %1058 = vadd.xlane.f32.xlu0 %v1057_v60 }
 0x2ec   : > { %v1983_v0 = vpop.eup %1982 }
 0x2ed   : > { %v1167_v1 = vsel %vm782_vm3, %v1983_v0, 0.0 }
 0x2ef   : > { %953 = vrot.lane.b32.xlu1 %v2251_v11, %s2047_s16  ;;  %s2442_s16 = sld [smem:[#allocation13_spill]] }
 0x2fc   : > { %841 = vrot.lane.b32.xlu0 %v2251_v11, %s2048_s30  ;;  %s2443_s30 = scalar_lea.vmem %s2442_s16, %s2168_s25 }
 0x300   : > { %1173 = vrot.lane.b32.xlu0 %v2251_v11, %s2049_s21 }
 0x313   : > { %1168 = vadd.xlane.f32.xlu1 %v1167_v1  ;;  %v1972_v1 = vld [vmem:[%s2215_s0 + $0x18] sm:$0xff]  }
 0x324   : > { %1063 = vrot.lane.b32.xlu1 %v2251_v11, %s2050_s14 }
 0x35f   : > { %v837_v3 = vpop.xlane.xlu0 %836 }
 0x360   : > { %1984 = vrcp.f32 %v837_v3  ;;  %v1973_v3 = vld [vmem:[%s2215_s0 + $0x10] sm:$0xff]  }
 0x367   : > { %v949_v5 = vpop.xlane.xlu1 %948 }
 0x368   : > { %1986 = vrcp.f32 %v949_v5 }
 0x36b   : > { %v954_v12 = vpop.permute.xlu1 %953 }
 0x36c   : > { %v959_v15 = vsel %vm846_vm4, %v954_v12, 0 }
 0x36d   : > { %v1985_v6 = vpop.eup %1984 }
 0x36e   : > { %v839_v8 = vmul.f32 %v1985_v6, %v1977_v54 }
 0x36f   : > { %v1059_v7 = vpop.xlane.xlu0 %1058 }
 0x370   : > { %v840_v13 = vpack.c.bf16 %v839_v8, %v839_v8  ;;  %1988 = vrcp.f32 %v1059_v7 }
 0x373   : > { %v842_v9 = vpop.permute.xlu0 %841 }
 0x374   : > { %v848_v10 = vsel %vm846_vm4, %v842_v9, 0 }
 0x375   : > { %1841 = vmatpush3.bf16.msra.mxu0 %v848_v10  ;;  %v1987_v14 = vpop.eup %1986 }
 0x376   : > { %1852 = vmatprep.subr.bf16.mxu0 %v2038_v2  ;;  %v951_v11 = vmul.f32 %v1987_v14, %v1979_v57 }
 0x377   : > { %v1174_v22 = vpop.permute.xlu0 %1173 }
 0x378   : > { %1843 = vmatmul.mubr.msk.bf16.vlgmr.msra.gmra.mxu0 %vm782_vm3, %v840_v13  ;;  %v952_v16 = vpack.c.bf16 %v951_v11, %v951_v11  ;;  %v1179_v24 = vsel %vm846_vm4, %v1174_v22, 0  ;;  %v1775_v22 = vld [vmem:[%s2443_s30] ss:$0 sm:$0xff] }
 0x379   : > { %1853 = vmatpush3.bf16.msra.mxu0 %v959_v15  ;;  %1854 = vmatprep.mubr.msk.bf16.mxu0 %vm2039_vm1, %v2038_v2  ;;  %v1773_v15 = vld [vmem:[%s2440_s29] ss:$0 sm:$0xff] }
 0x37a   : > { %1864 = vmatprep.subr.bf16.mxu0 %v2038_v2 }
 0x37d   : > { %v1989_v17 = vpop.eup %1988 }
 0x37e   : > { %v1061_v19 = vmul.f32 %v1989_v17, %v1981_v59 }
 0x380   : > { %1855 = vmatmul.mubr.msk.bf16.vlgmr.msra.gmra.mxu0 %vm782_vm3, %v952_v16  ;;  %v1062_v23 = vpack.c.bf16 %v1061_v19, %v1061_v19  ;;  %v1774_v16 = vld [vmem:[%s2441_s27] ss:$0 sm:$0xff] }
 0x381   : > { %1866 = vmatprep.mubr.msk.bf16.mxu0 %vm2039_vm1, %v2038_v2 }
 0x39c   : > { %v1169_v18 = vpop.xlane.xlu1 %1168 }
 0x39d   : > { %1990 = vrcp.f32 %v1169_v18 }
 0x3a0   : > { %v1064_v20 = vpop.permute.xlu1 %1063 }
 0x3a1   : > { %v1069_v21 = vsel %vm846_vm4, %v1064_v20, 0  ;;  %v1974_v20 = vld [vmem:[%s2215_s0 + $0x8] sm:$0xff]  }
 0x3a2   : > { %1865 = vmatpush3.bf16.msra.mxu0 %v1069_v21  ;;  %v1975_v21 = vld [vmem:[%s2215_s0] sm:$0xff]  }
 0x3a3   : > { %1876 = vmatprep.subr.bf16.mxu0 %v2038_v2 }
 0x3a5   : > { %1867 = vmatmul.mubr.msk.bf16.vlgmr.msra.gmra.mxu0 %vm782_vm3, %v1062_v23 }
 0x3a6   : > { %1877 = vmatpush3.bf16.msra.mxu0 %v1179_v24  ;;  %1878 = vmatprep.mubr.msk.bf16.mxu0 %vm2039_vm1, %v2038_v2 }
 0x3a7   : > { %1890 = vmatprep.subr.bf16.mxu0 %v2038_v2 }
 0x3aa   : > { %v1991_v25 = vpop.eup %1990 }
 0x3ab   : > { %v1171_v26 = vmul.f32 %v1991_v25, %v1983_v0  ;;  %v1971_v0 = vld [vmem:[%s2201_s23] sm:$0xff]   ;;  %s2447_s23 = sld [smem:[#allocation16_spill]] (!%p1787_p8) }
 0x3ad   : > { %v1172_v27 = vpack.c.bf16 %v1171_v26, %v1171_v26 }
 0x3af   : > { %1879 = vmatmul.mubr.msk.bf16.vlgmr.msra.gmra.mxu0 %vm782_vm3, %v1172_v27 }
 0x3b0   : > { %1894 = vmatprep.mubr.msk.bf16.mxu0 %vm2039_vm1, %v2038_v2  ;;  %1891 = vmatpush3.bf16.msra.mxu0 %v1970_v63 }
 0x3b1   : > { %1892 = vmatprep.subr.bf16.mxu0 %v2038_v2 }
 0x3b4   : > { %1893 = vmatpush3.bf16.msra.mxu0 %v1971_v0 }
 0x438   : > { %v884_v28 = vpop.f32.mrf.mxu0 }
 0x43a   : > { %v1844_v29 = vpop.f32.mrf.mxu0 }
 0x43c   : > { %v887_v30 = vpop.f32.mrf.mxu0 }
 0x43e   : > { %v1845_v31 = vpop.f32.mrf.mxu0 }
 0x440   : > { %v995_v32 = vpop.f32.mrf.mxu0 }
 0x441   : > { %1222 = vrot.lane.b32.xlu1 %v995_v32, %s2051_s22 }
 0x442   : > { %v1856_v33 = vpop.f32.mrf.mxu0 }
 0x444   : > { %v998_v34 = vpop.f32.mrf.mxu0 }
 0x446   : > { %v1857_v35 = vpop.f32.mrf.mxu0 }
 0x465   : > { %v1105_v38 = vpop.f32.mrf.mxu0 }
 0x466   : > { %1226 = vrot.lane.b32.xlu0 %v1105_v38, %s2052_s18 }
 0x467   : > { %v1868_v39 = vpop.f32.mrf.mxu0 }
 0x469   : > { %v1108_v40 = vpop.f32.mrf.mxu0 }
 0x46b   : > { %v1869_v41 = vpop.f32.mrf.mxu0 }
 0x46f   : > { %v1215_v42 = vpop.f32.mrf.mxu0 }
 0x470   : > { %1230 = vrot.lane.b32.xlu1 %v1215_v42, %s2053_s3 }
 0x471   : > { %v1880_v43 = vpop.f32.mrf.mxu0 }
 0x473   : > { %v1218_v44 = vpop.f32.mrf.mxu0 }
 0x475   : > { %v1881_v45 = vpop.f32.mrf.mxu0 }
 0x4b3   : > { %v1223_v46 = vpop.permute.xlu1 %1222 }
 0x4b4   : > { %v1233_v48 = vsel %vm782_vm3, %v884_v28, %v1223_v46 }
 0x4d8   : > { %v1227_v47 = vpop.permute.xlu0 %1226 }
 0x4d9   : > { %v1235_v49 = vsel %vm1234_vm5, %v1233_v48, %v1227_v47 }
 0x4e2   : > { %v1231_v50 = vpop.permute.xlu1 %1230 }
 0x4e3   : > { %v1237_v51 = vsel %vm1236_vm6, %v1235_v49, %v1231_v50  ;;  %v1785_v49 = vld [vmem:[%s686_s1] ss:$0 sm:$0xff]  ;;  %s2446_s1 = sld [smem:[#allocation15_spill]] (!%p1787_p8) }
 0x4e4   : > { %v1238_v52 = vpack.c.bf16 %v1237_v51, %v1237_v51  ;;  %v1786_v51 = vld [vmem:[%s689_s7] ss:$0 sm:$0xff] }
 0x4e6   : > { %1887 = vmatmul.mubr.msk.bf16.vlgmr.msra.gmra.mxu1 %vm727_vm2, %v1238_v52 }
 0x4e7   : > { %1906 = vmatprep.mubr.msk.bf16.mxu1 %vm2039_vm1, %v2038_v2  ;;  %1899 = vmatpush3.bf16.msra.mxu1 %v1972_v1 }
 0x4e8   : > { %1900 = vmatprep.subr.bf16.mxu1 %v2038_v2 }
 0x4eb   : > { %1901 = vmatpush3.bf16.msra.mxu1 %v1973_v3 }
 0x4ec   : > { %1902 = vmatprep.subr.bf16.mxu1 %v2038_v2 }
 0x4ef   : > { %1903 = vmatpush3.bf16.msra.mxu1 %v1974_v20 }
 0x4f0   : > { %1904 = vmatprep.subr.bf16.mxu1 %v2038_v2  ;;  %v1779_v2 = vld [vmem:[%s683_s15] ss:$0 sm:$0xff] }
 0x4f3   : > { %1905 = vmatpush3.bf16.msra.mxu1 %v1975_v21 }
 0x5a6   : > { %v1294_v54 = vpop.f32.mrf.mxu1 }
 0x5a7   : > { %v1295_v55 = vadd.f32 %v1769_v53, %v1294_v54 }
 0x5a8   : > { %v1888_v56 = vpop.f32.mrf.mxu1 }
 0x5a9   : > { %v1300_v57 = vadd.f32 %v1295_v55, %v2235_v4 }
 0x5aa   : > { %v1297_v58 = vpop.f32.mrf.mxu1 }
 0x5ab   : > { %v1303_v59 = vsel %vm727_vm2, %v1300_v57, 0.0  ;;  %v1308_v60 = vmul.f32 %v1300_v57, %v1300_v57 }
 0x5ac   : > { %1304 = vadd.xlane.f32.xlu0 %v1303_v59  ;;  %v1889_v61 = vpop.f32.mrf.mxu1 }
 0x5ad   : > { %v1309_v62 = vsel %vm727_vm2, %v1308_v60, 0.0 }
 0x5ae   : > { %1310 = vadd.xlane.f32.xlu1 %v1309_v62 }
 0x635   : > { %v1305_v4 = vpop.xlane.xlu0 %1304 }
 0x636   : > { %v1307_v5 = vmul.f32 0.03125, %v1305_v4 }
 0x637   : > { %v1311_v6 = vpop.xlane.xlu1 %1310 }
 0x638   : > { %v1313_v7 = vmul.f32 %v1307_v5, %v1307_v5  ;;  %v1312_v8 = vmul.f32 0.03125, %v1311_v6  ;;  %v1316_v13 = vsub.f32 %v1300_v57, %v1307_v5 }
 0x63a   : > { %v1314_v9 = vsub.f32 %v1312_v8, %v1313_v7 }
 0x63c   : > { %v1315_v10 = vmax.f32 %v1314_v9, 0.0 }
 0x63e   : > { %v1317_v12 = vadd.f32 1e-05, %v1315_v10 }
 0x640   : > { %1992 = vrsqrt.f32 %v1317_v12 }
 0x64d   : > { %v1993_v14 = vpop.eup %1992 }
 0x64e   : > { %v1319_v11 = vmul.f32 %v1993_v14, %v1316_v13 }
 0x650   : > { %v1326_v17 = vmul.f32 %v1773_v15, %v1319_v11 }
 0x652   : > { %v1333_v18 = vadd.f32 %v1774_v16, %v1326_v17 }
 0x654   : > { %v1339_v19 = vpack.c.bf16 %v1333_v18, %v1333_v18 }
 0x656   : > { %1895 = vmatmul.mubr.msk.bf16.vlgmr.msra.gmra.mxu0 %vm727_vm2, %v1339_v19 }
 0x716   : > { %v1395_v23 = vpop.f32.mrf.mxu0 }
 0x717   : > { %v1396_v24 = vadd.f32 %v1775_v22, %v1395_v23 }
 0x718   : > { %v1896_v25 = vpop.f32.mrf.mxu0 }
 0x719   : > { %v1401_v26 = vmax.f32 %v1396_v24, 0.0 }
 0x71a   : > { %v1398_v27 = vpop.f32.mrf.mxu0 }
 0x71b   : > { %v1411_v28 = vpack.c.bf16 %v1401_v26, %v1401_v26 }
 0x71c   : > { %v1897_v29 = vpop.f32.mrf.mxu0 }
 0x71d   : > { %1907 = vmatmul.mubr.msk.bf16.vlgmr.msra.gmra.mxu1 %vm1442_vm7, %v1411_v28 }
 0x7dd   : > { %v1480_v30 = vpop.f32.mrf.mxu1 }
 0x7de   : > { %v1481_v31 = vadd.f32 %v1779_v2, %v1480_v30 }
 0x7df   : > { %v1908_v32 = vpop.f32.mrf.mxu1 }
 0x7e0   : > { %v1486_v33 = vadd.f32 %v1481_v31, %v1333_v18 }
 0x7e1   : > { %v1483_v34 = vpop.f32.mrf.mxu1 }
 0x7e2   : > { %v1489_v35 = vsel %vm727_vm2, %v1486_v33, 0.0  ;;  %v1493_v36 = vmul.f32 %v1486_v33, %v1486_v33 }
 0x7e3   : > { %1490 = vadd.xlane.f32.xlu0 %v1489_v35  ;;  %v1909_v37 = vpop.f32.mrf.mxu1 }
 0x7e4   : > { %v1494_v38 = vsel %vm727_vm2, %v1493_v36, 0.0 }
 0x7e7   : > { %1495 = vadd.xlane.f32.xlu0 %v1494_v38 }
 0x86c   : > { %v1491_v39 = vpop.xlane.xlu0 %1490 }
 0x86d   : > { %v1492_v40 = vmul.f32 0.03125, %v1491_v39 }
 0x86f   : > { %v1498_v42 = vmul.f32 %v1492_v40, %v1492_v40  ;;  %v1501_v47 = vsub.f32 %v1486_v33, %v1492_v40 }
 0x870   : > { %v1496_v41 = vpop.xlane.xlu0 %1495 }
 0x871   : > { %v1497_v43 = vmul.f32 0.03125, %v1496_v41 }
 0x873   : > { %v1499_v44 = vsub.f32 %v1497_v43, %v1498_v42 }
 0x875   : > { %v1500_v45 = vmax.f32 %v1499_v44, 0.0 }
 0x877   : > { %v1502_v46 = vadd.f32 1e-05, %v1500_v45 }
 0x879   : > { %1994 = vrsqrt.f32 %v1502_v46 }
 0x886   : > { %v1995_v48 = vpop.eup %1994 }
 0x887   : > { %v1504_v50 = vmul.f32 %v1995_v48, %v1501_v47 }
 0x889   : > { %v1511_v52 = vmul.f32 %v1785_v49, %v1504_v50  ;;  %1523 = sbr.rel (%p1787_p8) target bundleno = 2362 (0x93a), region = 88 }
 0x88b   : > { %v1518_v53 = vadd.f32 %v1786_v51, %v1511_v52 }
 0x88d   : > { %1519 = vst.msk [vmem:[#allocation2] sm:$0xff] %vm727_vm2, %v1518_v53 }
 0x88e   : > { %v1526_v54 = vsel %vm727_vm2, %v1518_v53, 0.0  ;;  %v1530_v55 = vmul.f32 %v1518_v53, %v1518_v53  ;;  %v1788_v4 = vld [vmem:[%s2446_s1] ss:$0 sm:$0xff] }
 0x88f   : > { %1527 = vadd.xlane.f32.xlu0 %v1526_v54  ;;  %v1789_v6 = vld [vmem:[%s2447_s23] ss:$0 sm:$0xff] }
 0x890   : > { %v1531_v56 = vsel %vm727_vm2, %v1530_v55, 0.0 }
 0x893   : > { %1532 = vadd.xlane.f32.xlu0 %v1531_v56 }
 0x918   : > { %v1528_v57 = vpop.xlane.xlu0 %1527 }
 0x919   : > { %v1529_v58 = vmul.f32 0.03125, %v1528_v57 }
 0x91b   : > { %v1535_v60 = vmul.f32 %v1529_v58, %v1529_v58  ;;  %v1538_v1 = vsub.f32 %v1518_v53, %v1529_v58 }
 0x91c   : > { %v1533_v59 = vpop.xlane.xlu0 %1532 }
 0x91d   : > { %v1534_v61 = vmul.f32 0.03125, %v1533_v59 }
 0x91f   : > { %v1536_v62 = vsub.f32 %v1534_v61, %v1535_v60 }
 0x921   : > { %v1537_v63 = vmax.f32 %v1536_v62, 0.0 }
 0x923   : > { %v1539_v0 = vadd.f32 1e-05, %v1537_v63 }
 0x925   : > { %1996 = vrsqrt.f32 %v1539_v0 }
 0x932   : > { %v1997_v3 = vpop.eup %1996 }
 0x933   : > { %v1541_v5 = vmul.f32 %v1997_v3, %v1538_v1 }
 0x935   : > { %v1548_v7 = vmul.f32 %v1788_v4, %v1541_v5 }
 0x937   : > { %v1555_v8 = vadd.f32 %v1789_v6, %v1548_v7 }
 0x939   : > { %1556 = vst.msk [vmem:[%s2228_s8] sm:$0xff] %vm727_vm2, %v1555_v8 }
 0x93a PF: > { %s2448_s26 = sld [smem:[#allocation6_spill]] }
 0x93b   : > { %s2449_s18 = sld [smem:[#allocation4_spill]] }
 0x93c   : > { %s2450_s19 = sld [smem:[#allocation5_spill]] }
 0x93d   : > { %s2451_s20 = sld [smem:[#allocation7_spill]] }
 0x93e   : > { %s2452_s21 = sld [smem:[#allocation8_spill]] }
 0x940   : > { %s25_s22 = sadd.s32 1, %s2448_s26  }
 0x941   : > { %p22_p9 = scmp.ge.s32.totalorder %s25_s22, 6  }
 0x943   :  { %24 = sbr.rel (!%p22_p9) target bundleno = 10 (0xa), region = 154 }

// kernel: forward.3
= control target key start
LH: loop header
LB: loop body
LE: loop exit
PB: predicated region body
PF: predicated region fallthrough
CT: control target
= control target key end

     0   :  { %s4294_s0 = inlined_call_operand.vmem [shape: f32[2,8,32], index: 0, kind: input, shape index: {}]   ;;  %s4295_s1 = inlined_call_operand.vmem [shape: f32[2,8,32], index: 1, kind: input, shape index: {}]   ;;  %s4296_s2 = inlined_call_operand.vmem [shape: bf16[2,32,96], index: 2, kind: input, shape index: {}]   ;;  %s4297_s3 = inlined_call_operand.vmem [shape: f32[2,1,96], index: 3, kind: input, shape index: {}]   ;;  %s4298_s4 = inlined_call_operand.vmem [shape: bf16[2,32,32], index: 4, kind: input, shape index: {}]   ;;  %s4299_s5 = inlined_call_operand.vmem [shape: f32[2,1,32], index: 5, kind: input, shape index: {}]   ;;  %s4300_s6 = inlined_call_operand.vmem [shape: f32[2,1,32], index: 6, kind: input, shape index: {}]   ;;  %s4301_s7 = inlined_call_operand.vmem [shape: f32[2,1,32], index: 7, kind: input, shape index: {}]   ;;  %s4302_s8 = inlined_call_operand.vmem [shape: bf16[2,32,32], index: 8, kind: input, shape index: {}]   ;;  %s4303_s9 = inlined_call_operand.vmem [shape: f32[2,1,32], index: 9, kind: input, shape index: {}]   ;;  %s4304_s10 = inlined_call_operand.vmem [shape: bf16[2,32,64], index: 10, kind: input, shape index: {}]   ;;  %s4305_s11 = inlined_call_operand.vmem [shape: f32[2,1,64], index: 11, kind: input, shape index: {}]   ;;  %s4306_s12 = inlined_call_operand.vmem [shape: bf16[2,32,32], index: 12, kind: input, shape index: {}]   ;;  %s4307_s13 = inlined_call_operand.vmem [shape: f32[2,1,32], index: 13, kind: input, shape index: {}]   ;;  %s4308_s14 = inlined_call_operand.vmem [shape: f32[2,1,32], index: 14, kind: input, shape index: {}]   ;;  %s4309_s15 = inlined_call_operand.vmem [shape: f32[2,1,32], index: 15, kind: input, shape index: {}]   ;;  %s4310_s16 = inlined_call_operand.vmem [shape: bf16[2,32,64], index: 16, kind: input, shape index: {}]   ;;  %s4311_s17 = inlined_call_operand.vmem [shape: f32[2,1,64], index: 17, kind: input, shape index: {}]   ;;  %s4312_s18 = inlined_call_operand.vmem [shape: bf16[2,64,32], index: 18, kind: input, shape index: {}]   ;;  %s4313_s19 = inlined_call_operand.vmem [shape: f32[2,1,32], index: 19, kind: input, shape index: {}]   ;;  %s4314_s20 = inlined_call_operand.vmem [shape: f32[2,1,32], index: 20, kind: input, shape index: {}]   ;;  %s4315_s21 = inlined_call_operand.vmem [shape: f32[2,1,32], index: 21, kind: input, shape index: {}]   ;;  %s4316_s22 = inlined_call_operand.vmem [shape: f32[1,32], index: 22, kind: input, shape index: {}]   ;;  %s4317_s23 = inlined_call_operand.vmem [shape: f32[1,32], index: 23, kind: input, shape index: {}]   ;;  %s4318_s24 = inlined_call_operand.vmem [shape: bf16[32,128], index: 24, kind: input, shape index: {}]   ;;  %s4319_s25 = inlined_call_operand.vmem [shape: f32[1,128], index: 25, kind: input, shape index: {}]   ;;  %s4320_s26 = inlined_call_operand.hbm [shape: f32[2,8,128], index: 26, kind: output, shape index: {}]  }
   0x1   :  { %4339 = sst [smem:[#allocation22_spill]] %s4294_s0 }
   0x2   :  { %4340 = sst [smem:[#allocation23_spill]] %s4295_s1 }
   0x3   :  { %4341 = sst [smem:[#allocation24_spill]] %s4296_s2 }
   0x4   :  { %4342 = sst [smem:[#allocation25_spill]] %s4297_s3 }
   0x5   :  { %4343 = sst [smem:[#allocation26_spill]] %s4298_s4 }
   0x6   :  { %4344 = sst [smem:[#allocation27_spill]] %s4299_s5 }
   0x7   :  { %4345 = sst [smem:[#allocation28_spill]] %s4300_s6 }
   0x8   :  { %4346 = sst [smem:[#allocation29_spill]] %s4301_s7 }
   0x9   :  { %4347 = sst [smem:[#allocation30_spill]] %s4302_s8 }
   0xa   :  { %4348 = sst [smem:[#allocation31_spill]] %s4303_s9 }
   0xb   :  { %4349 = sst [smem:[#allocation32_spill]] %s4304_s10 }
   0xc   :  { %4350 = sst [smem:[#allocation33_spill]] %s4306_s12 }
   0xd   :  { %4351 = sst [smem:[#allocation34_spill]] %s4309_s15 }
   0xe   :  { %4352 = sst [smem:[#allocation35_spill]] %s4310_s16 }
   0xf   :  { %4353 = sst [smem:[#allocation36_spill]] %s4314_s20 }
  0x10   :  { %4354 = sst [smem:[#allocation37_spill]] %s4315_s21 }
  0x11   :  { %4355 = sst [smem:[#allocation38_spill]] %s4316_s22 }
  0x12   :  { %4356 = sst [smem:[#allocation39_spill]] %s4317_s23 }
  0x13   :  { %4357 = sst [smem:[#allocation40_spill]] %s4318_s24 }
  0x14   :  { %4358 = sst [smem:[#allocation41_spill]] %s4319_s25 }
  0x15   :  { %4359 = sst [smem:[#allocation42_spill]] %s4320_s26 }
  0x16   :  { %31 = vsyncpa [#allocation4], 0 }
  0x17   :  { %33 = vsyncpa [#allocation4 + $0x1], 0  ;;  %s3766_s27 = smov 0   ;;  %s3768_s3 = smov 0  }
  0x18   :  { %s3770_s7 = smov 0   ;;  %s3772_s28 = smov 0  }
  0x19   :  { %s3774_s8 = smov 0   ;;  %s3776_s4 = smov 0  }
  0x1a   :  { %s3778_s29 = smov 0   ;;  %s3780_s0 = smov 0  }
  0x1b LB: > { %4360 = sst [smem:[#allocation6_spill]] %s3582_s27  ;;  %s3056_s9 = sadd.s32 4294967295, %s3610_s0   ;;  %s3610_s0 = sphi %s3780_s0, %s39_s0   ;;  %s3606_s29 = sphi %s3778_s29, %s4438_s29   ;;  %s3602_s4 = sphi %s3776_s4, %s4437_s4   ;;  %s3598_s8 = sphi %s3774_s8, %s4436_s8   ;;  %s3594_s28 = sphi %s3772_s28, %s4435_s28   ;;  %s3590_s7 = sphi %s3770_s7, %s4434_s7   ;;  %s3586_s3 = sphi %s3768_s3, %s4433_s3   ;;  %s3582_s27 = sphi %s3766_s27, %s4432_s27  }
  0x1c   : > { %4361 = sst [smem:[#allocation7_spill]] %s3586_s3  ;;  %s3057_s30 = sadd.s32 4294967294, %s3610_s0  }
  0x1d   : > { %4362 = sst [smem:[#allocation8_spill]] %s3590_s7  ;;  %s48_s2 = sadd.s32 1, %s3602_s4 }
  0x1e   : > { %4363 = sst [smem:[#allocation9_spill]] %s3594_s28  ;;  %p49_p0 = scmp.ge.s32.totalorder %s48_s2, 2 }
  0x1f   : > { %4364 = sst [smem:[#allocation10_spill]] %s3598_s8  ;;  %s51_s5 = sadd.s32 1, %s3606_s29 }
  0x20   : > { %4365 = sst [smem:[#allocation11_spill]] %s3602_s4  ;;  %p724_p1 = scmp.ne.s32.totalorder %s3590_s7, %s3586_s3 }
  0x21   : > { %4366 = sst [smem:[#allocation12_spill]] %s3606_s29  ;;  %p725_p2 = scmp.eq.s32.totalorder %s3056_s9, 3 }
  0x22   : > { %4367 = sst [smem:[#allocation13_spill]] %s3610_s0  ;;  %s4440_s2 = smov (%p49_p0, %s48_s2), 0 }
  0x23   : > { %4368 = sst [smem:[#allocation14_spill]] %s4440_s2  ;;  %s4442_s5 = smov (!%p49_p0, %s51_s5), %s3606_s29 }
  0x24   : > { %p3815_p3 = por %p725_p2, %p724_p1  ;;  %p730_p4 = scmp.ne.s32.totalorder %s3586_s3, %s3582_s27 }
  0x25   : > { %p53_p5 = scmp.ge.s32.totalorder %s4442_s5, 2  ;;  %p731_p6 = scmp.eq.s32.totalorder %s3057_s30, 3 }
  0x26   : > { %s4369_s10 = scalar_select %p3815_p3, 1, 0 }
  0x27   : > { %p3060_p7 = scmp.ge.s32.totalorder %s3610_s0, 1  ;;  %p909_p8 = scmp.lt.s32.totalorder %s3610_s0, 5 }
  0x28   : > { %4370 = sst [smem:[#allocation15_spill]] %s4369_s10  ;;  %s4444_s5 = smov (%p53_p5, %s4442_s5), 0 }
  0x29   : > { %4371 = sst [smem:[#allocation16_spill]] %s4444_s5  ;;  %p3825_p9 = por %p731_p6, %p730_p4 }
  0x2a   : > { %p910_p10 = pnand %p3060_p7, %p909_p8  ;;  %s711_s1 = ssub.s32 %s3606_s29, %s4444_s5 }
  0x2b   : > { %s4372_s6 = scalar_select %p3825_p9, 1, 0 }
  0x2c   : > { %s714_s9 = sadd.s32 1, %s3590_s7  ;;  %p712_p11 = scmp.eq.s32.totalorder %s711_s1, 0 }
  0x2d   : > { %4373 = sst [smem:[#allocation17_spill]] %s4372_s6  ;;  %913 = sbr.rel (%p910_p10) target bundleno = 4145 (0x1031), region = 124 }
  0x2e   : > { %s3833_s2 = scalar_select %p712_p11, %s3590_s7, %s714_s9  }
  0x30   : > { %4374 = sst [smem:[#allocation18_spill]] %s3833_s2 }
  0x32   : > { %s4326_s30 = sand.u32 1, %s3586_s3   ;;  %p1056_p12 = scmp.lt.s32.totalorder %s3598_s8, 1 }
  0x33   : > { %s3839_s4 = sshll.u32 %s4326_s30, 3  ;;  %p1064_p13 = scmp.lt.s32.totalorder %s3594_s28, 1 }
  0x34   : > { %s1057_s6 = scalar_select %p1056_p12, %s3598_s8, 1 }
  0x35   : > { %s3844_s27 = scalar_select %p1064_p13, %s3594_s28, 1 }
  0x36   : > { %s3062_s1 = sshll.u32 %s1057_s6, 3  ;;  %s4375_s29 = sld [smem:[#allocation22_spill]] }
  0x37   : > { %s4376_s0 = sld [smem:[#allocation23_spill]]  ;;  %s3142_s10 = sshll.u32 %s3844_s27, 4 }
  0x38   : > { %s4379_s6 = sld [smem:[#allocation24_spill]]  ;;  %s1123_s23 = scalar_lea.vmem %s4311_s17, %s3844_s27 }
  0x39   : > { %s4381_s9 = sld [smem:[#allocation26_spill]] }
  0x3a   : > { %s4386_s5 = sld [smem:[#allocation30_spill]] }
  0x3b   : > { %s4389_s12 = sld [smem:[#allocation33_spill]] }
  0x3c   : > { %s1059_s2 = scalar_lea.vmem %s4375_s29, %s3062_s1  ;;  %s4391_s16 = sld [smem:[#allocation35_spill]] }
  0x3d   : > { %s3852_s26 = scalar_lea.vmem %s4376_s0, %s3062_s1  ;;  %s4394_s24 = sld [smem:[#allocation9_spill]] }
  0x3e   : > { %4377 = sst [smem:[#allocation19_spill]] %s3852_s26  ;;  %s3862_s28 = scalar_lea.vmem %s4379_s6, %s3142_s10 }
  0x3f   : > { %4380 = sst [smem:[#allocation20_spill]] %s3862_s28  ;;  %s3867_s21 = scalar_lea.vmem %s4381_s9, %s3142_s10 }
  0x40   : > { %4382 = sst [smem:[#allocation21_spill]] %s3867_s21  ;;  %s3884_s29 = scalar_lea.vmem %s4386_s5, %s3142_s10 }
  0x41   : > { %s4388_s26 = sld [smem:[#allocation32_spill]]  ;;  %s3902_s20 = scalar_lea.vmem %s4389_s12, %s3142_s10 }
  0x42   : > { %s3919_s8 = scalar_lea.vmem %s4391_s16, %s3142_s10  ;;  %s3148_s12 = sshll.u32 %s3844_s27, 5 }
  0x43   : > { %s3929_s6 = scalar_lea.vmem %s4312_s18, %s3148_s12  ;;  %s1131_s21 = scalar_lea.vmem %s4313_s19, %s3844_s27 }
  0x44   : > { %p3078_p0 = scmp.ne.s32.totalorder %s4394_s24, 0 }
  0x46   : > { %1142 = sbr.rel (%p3078_p0) target bundleno = 77 (0x4d), region = 128 }
  0x47   : > { %s3893_s3 = scalar_lea.vmem %s4388_s26, %s3142_s10 }
  0x4b   : > { %v1143_v0 = vld [vmem:[%s1059_s2] sm:$0xff]  ;;  %vm1144_vm0 = vcmask 261120  }
  0x4c   : > { %1145 = vst.msk [vmem:[#allocation2] sm:$0xff] %vm1144_vm0, %v1143_v0 }
  0x4d PF: > { %s4395_s12 = sld [smem:[#allocation20_spill]]  ;;  %v3612_v2 = vmov 0.0   ;;  %vm3613_vm1 = vmmov 0   ;;  %vm1172_vm2 = vcmask 261120   ;;  %s3614_s28 = smov 96   ;;  %vm1227_vm3 = vcmask 64512  }
  0x4e   : > { %3207 = vmatprep.subr.bf16.mxu1 %v3612_v2  ;;  %3221 = vmatprep.subr.bf16.mxu0 %v3612_v2  ;;  %s4396_s0 = sld [smem:[#allocation25_spill]]  ;;  %s3615_s5 = smov 120   ;;  %vm1291_vm4 = vcmask 1043456   ;;  %vm1679_vm5 = vcmask 130048   ;;  %vm1681_vm6 = vcmask 195584   ;;  %vm2577_vm7 = vcmask 523264  }
  0x4f   : > { %3211 = vmatprep.mubr.msk.bf16.mxu1 %vm3613_vm1, %v3612_v2  ;;  %3223 = vmatprep.mubr.msk.bf16.mxu0 %vm3613_vm1, %v3612_v2  ;;  %s3616_s9 = smov 88   ;;  %s3617_s7 = smov 80  }
  0x50   : > { %s3618_s1 = smov 112   ;;  %s3619_s10 = smov 72  }
  0x51   : > { %s3620_s25 = smov 104   ;;  %s3621_s24 = smov 56  }
  0x52   : > { %s3623_s16 = smov 40   ;;  %s3624_s2 = smov 48  }
  0x53   : > { %v3460_v1 = vld [vmem:[%s4395_s12 + $0x8] sm:$0xff]   ;;  %v3461_v3 = vld [vmem:[%s4395_s12] sm:$0xff]   ;;  %s3622_s12 = smov 64   ;;  %s4401_s15 = sld [smem:[#allocation19_spill]] }
  0x54   : > { %3208 = vmatpush3.bf16.msra.mxu1 %v3460_v1  ;;  %v3951_v4 = vld [vmem:[#allocation2] sm:$0xff]  ;;  %s4397_s26 = scalar_lea.vmem %s4396_s0, %s3844_s27  ;;  %s4398_s0 = sld [smem:[#allocation21_spill]] }
  0x55   : > { %3209 = vmatprep.subr.bf16.mxu1 %v3612_v2  ;;  %v1153_v5 = vpack.c.bf16 %v3951_v4, %v3951_v4  ;;  %v3079_v6 = vld [vmem:[%s4397_s26] ss:$0 sm:$0xff]  ;;  %s3625_s26 = smov 8  }
  0x58   : > { %3210 = vmatpush3.bf16.msra.mxu1 %v3461_v3 }
  0x59   : > { %3215 = vmatprep.subr.bf16.mxu1 %v3612_v2 }
  0x5b   : > { %3212 = vmatmul.mubr.msk.bf16.vlgmr.msra.gmra.mxu1 %vm1172_vm2, %v1153_v5 }
  0x5c   : > { %3217 = vmatprep.mubr.msk.bf16.mxu1 %vm3613_vm1, %v3612_v2 }
 0x11b   : > { %v1210_v7 = vpop.f32.mrf.mxu1 }
 0x11c   : > { %v1211_v8 = vadd.f32 %v3079_v6, %v1210_v7 }
 0x11d   : > { %v3213_v9 = vpop.f32.mrf.mxu1 }
 0x11e   : > { %v1221_v10 = vmul.f32 0.35355338, %v1211_v8  ;;  %v3967_v11 = vpack.c.bf16 %v1211_v8, %v1211_v8 }
 0x11f   : > { %v1213_v12 = vpop.f32.mrf.mxu1 }
 0x120   : > { %v1222_v13 = vpack.c.bf16 %v1221_v10, %v1221_v10  ;;  %1225 = vrot.lane.b32.xlu0 %v3967_v11, %s3614_s28 }
 0x121   : > { %v3214_v14 = vpop.f32.mrf.mxu1 }
 0x122   : > { %1336 = vrot.lane.b32.xlu1 %v1222_v13, %s3615_s5 }
 0x124   : > { %1338 = vrot.lane.b32.xlu0 %v3967_v11, %s3616_s9 }
 0x126   : > { %1448 = vrot.lane.b32.xlu1 %v3967_v11, %s3617_s7 }
 0x128   : > { %1446 = vrot.lane.b32.xlu0 %v1222_v13, %s3618_s1 }
 0x12a   : > { %1558 = vrot.lane.b32.xlu1 %v3967_v11, %s3619_s10 }
 0x12c   : > { %1556 = vrot.lane.b32.xlu0 %v1222_v13, %s3620_s25 }
 0x192   : > { %v1226_v15 = vpop.permute.xlu0 %1225 }
 0x193   : > { %v1232_v16 = vsel %vm1227_vm3, %v1226_v15, 0 }
 0x194   : > { %3216 = vmatpush3.bf16.xpose.msra.mxu1 %v1232_v16  ;;  %v1337_v18 = vpop.permute.xlu1 %1336 }
 0x195   : > { %3227 = vmatprep.subr.bf16.mxu1 %v3612_v2 }
 0x196   : > { %v1339_v17 = vpop.permute.xlu0 %1338 }
 0x197   : > { %v1344_v19 = vsel %vm1227_vm3, %v1339_v17, 0 }
 0x198   : > { %v1449_v20 = vpop.permute.xlu1 %1448 }
 0x199   : > { %v1454_v21 = vsel %vm1227_vm3, %v1449_v20, 0 }
 0x19a   : > { %v1447_v23 = vpop.permute.xlu0 %1446 }
 0x19b   : > { %3218 = vmatmul.mubr.msk.bf16.vlgmr.msra.gmra.mxu1 %vm1227_vm3, %v1222_v13 }
 0x19c   : > { %3228 = vmatpush3.bf16.xpose.msra.mxu1 %v1344_v19  ;;  %3229 = vmatprep.mubr.msk.bf16.mxu1 %vm3613_vm1, %v3612_v2  ;;  %v1559_v22 = vpop.permute.xlu1 %1558 }
 0x19d   : > { %3239 = vmatprep.subr.bf16.mxu1 %v3612_v2  ;;  %v1564_v24 = vsel %vm1227_vm3, %v1559_v22, 0 }
 0x19e   : > { %v1557_v25 = vpop.permute.xlu0 %1556 }
 0x1a3   : > { %3230 = vmatmul.mubr.msk.bf16.vlgmr.msra.gmra.mxu1 %vm1227_vm3, %v1337_v18 }
 0x1a4   : > { %3240 = vmatpush3.bf16.xpose.msra.mxu1 %v1454_v21  ;;  %3241 = vmatprep.mubr.msk.bf16.mxu1 %vm3613_vm1, %v3612_v2 }
 0x1a5   : > { %3251 = vmatprep.subr.bf16.mxu1 %v3612_v2 }
 0x1ab   : > { %3242 = vmatmul.mubr.msk.bf16.vlgmr.msra.gmra.mxu1 %vm1227_vm3, %v1447_v23 }
 0x1ac   : > { %3252 = vmatpush3.bf16.xpose.msra.mxu1 %v1564_v24  ;;  %3253 = vmatprep.mubr.msk.bf16.mxu1 %vm3613_vm1, %v3612_v2 }
 0x1ad   : > { %3263 = vmatprep.subr.bf16.mxu1 %v3612_v2 }
 0x1b3   : > { %3254 = vmatmul.mubr.msk.bf16.vlgmr.msra.gmra.mxu1 %vm1227_vm3, %v1557_v25 }
 0x1b4   : > { %3267 = vmatprep.mubr.msk.bf16.mxu1 %vm3613_vm1, %v3612_v2 }
 0x25b   : > { %v1268_v26 = vpop.f32.mrf.mxu1 }
 0x25c   : > { %v1274_v27 = vsel %vm1227_vm3, %v1268_v26, -inf }
 0x25d   : > { %1275 = vmax.xlane.f32.xlu1 %v1274_v27  ;;  %v3219_v28 = vpop.f32.mrf.mxu1 }
 0x25f   : > { %v1271_v29 = vpop.f32.mrf.mxu1 }
 0x261   : > { %v3220_v30 = vpop.f32.mrf.mxu1 }
 0x263   : > { %v1380_v31 = vpop.f32.mrf.mxu1 }
 0x264   : > { %v1386_v32 = vsel %vm1227_vm3, %v1380_v31, -inf }
 0x265   : > { %1387 = vmax.xlane.f32.xlu0 %v1386_v32  ;;  %v3231_v33 = vpop.f32.mrf.mxu1 }
 0x267   : > { %v1383_v34 = vpop.f32.mrf.mxu1 }
 0x269   : > { %v3232_v35 = vpop.f32.mrf.mxu1 }
 0x26b   : > { %v1490_v36 = vpop.f32.mrf.mxu1 }
 0x26c   : > { %v1496_v37 = vsel %vm1227_vm3, %v1490_v36, -inf }
 0x26d   : > { %1497 = vmax.xlane.f32.xlu0 %v1496_v37  ;;  %v3243_v38 = vpop.f32.mrf.mxu1  ;;  %v3463_v37 = vld [vmem:[%s4398_s0] sm:$0xff]  }
 0x26f   : > { %v1493_v39 = vpop.f32.mrf.mxu1 }
 0x271   : > { %v3244_v40 = vpop.f32.mrf.mxu1 }
 0x273   : > { %v1600_v41 = vpop.f32.mrf.mxu1 }
 0x274   : > { %v1606_v42 = vsel %vm1227_vm3, %v1600_v41, -inf }
 0x275   : > { %1607 = vmax.xlane.f32.xlu1 %v1606_v42  ;;  %v3255_v43 = vpop.f32.mrf.mxu1 }
 0x277   : > { %v1603_v44 = vpop.f32.mrf.mxu1 }
 0x279   : > { %v3256_v45 = vpop.f32.mrf.mxu1 }
 0x2e6   : > { %v1276_v46 = vpop.xlane.xlu1 %1275 }
 0x2e7   : > { %v1277_v47 = vsub.f32 %v1268_v26, %v1276_v46 }
 0x2e9   : > { %v1278_v48 = vmul.f32 1.442695, %v1277_v47 }
 0x2eb   : > { %3476 = vpow2.f32 %v1278_v48 }
 0x2ee   : > { %v1388_v49 = vpop.xlane.xlu0 %1387 }
 0x2ef   : > { %v1389_v50 = vsub.f32 %v1380_v31, %v1388_v49 }
 0x2f1   : > { %v1390_v51 = vmul.f32 1.442695, %v1389_v50 }
 0x2f3   : > { %3478 = vpow2.f32 %v1390_v51 }
 0x2f6   : > { %v1498_v52 = vpop.xlane.xlu0 %1497 }
 0x2f7   : > { %v1499_v53 = vsub.f32 %v1490_v36, %v1498_v52  ;;  %v3462_v36 = vld [vmem:[%s4398_s0 + $0x8] sm:$0xff]   ;;  %s4399_s0 = sld [smem:[#allocation27_spill]] }
 0x2f8   : > { %v3477_v54 = vpop.eup %3476  ;;  %3264 = vmatpush3.bf16.msra.mxu1 %v3462_v36 }
 0x2f9   : > { %v1500_v55 = vmul.f32 1.442695, %v1499_v53  ;;  %v1280_v56 = vsel %vm1227_vm3, %v3477_v54, 0.0  ;;  %3265 = vmatprep.subr.bf16.mxu1 %v3612_v2 }
 0x2fa   : > { %1281 = vadd.xlane.f32.xlu0 %v1280_v56 }
 0x2fb   : > { %3480 = vpow2.f32 %v1500_v55 }
 0x2fc   : > { %3266 = vmatpush3.bf16.msra.mxu1 %v3463_v37 }
 0x2fd   : > { %3279 = vmatprep.subr.bf16.mxu1 %v3612_v2  ;;  %s4400_s22 = scalar_lea.vmem %s4399_s0, %s3844_s27  ;;  %s4404_s0 = sld [smem:[#allocation29_spill]] }
 0x2fe   : > { %v1608_v61 = vpop.xlane.xlu1 %1607  ;;  %v3091_v53 = vld [vmem:[%s4400_s22] ss:$0 sm:$0xff] }
 0x2ff   : > { %v1609_v62 = vsub.f32 %v1600_v41, %v1608_v61 }
 0x300   : > { %v3479_v57 = vpop.eup %3478 }
 0x301   : > { %v1392_v58 = vsel %vm1227_vm3, %v3479_v57, 0.0  ;;  %v1610_v63 = vmul.f32 1.442695, %v1609_v62 }
 0x302   : > { %1393 = vadd.xlane.f32.xlu1 %v1392_v58 }
 0x303   : > { %3482 = vpow2.f32 %v1610_v63  ;;  %v3464_v63 = vld [vmem:[%s3893_s3 + $0x8] sm:$0xff]   ;;  %s4405_s30 = scalar_lea.vmem %s4404_s0, %s3844_s27 }
 0x308   : > { %v3481_v59 = vpop.eup %3480 }
 0x309   : > { %v1502_v60 = vsel %vm1227_vm3, %v3481_v59, 0.0 }
 0x30a   : > { %1503 = vadd.xlane.f32.xlu0 %v1502_v60 }
 0x310   : > { %v3483_v0 = vpop.eup %3482 }
 0x311   : > { %v1612_v1 = vsel %vm1227_vm3, %v3483_v0, 0.0 }
 0x313   : > { %1398 = vrot.lane.b32.xlu1 %v3967_v11, %s3621_s24  ;;  %s3626_s24 = smov 16  }
 0x320   : > { %1286 = vrot.lane.b32.xlu0 %v3967_v11, %s3622_s12  ;;  %s3627_s12 = smov 24  }
 0x324   : > { %1618 = vrot.lane.b32.xlu0 %v3967_v11, %s3623_s16  ;;  %s4407_s16 = sld [smem:[#allocation31_spill]] }
 0x337   : > { %1613 = vadd.xlane.f32.xlu1 %v1612_v1  ;;  %v3465_v1 = vld [vmem:[%s3893_s3] sm:$0xff]   ;;  %s4402_s3 = sld [smem:[#allocation28_spill]] }
 0x33d   : > { %s4403_s22 = scalar_lea.vmem %s4402_s3, %s3844_s27  ;;  %s4406_s3 = scalar_lea.vmem %s4305_s11, %s3844_s27 }
 0x348   : > { %1508 = vrot.lane.b32.xlu1 %v3967_v11, %s3624_s2  ;;  %s4408_s2 = scalar_lea.vmem %s4407_s16, %s3844_s27 }
 0x383   : > { %v1282_v3 = vpop.xlane.xlu0 %1281 }
 0x384   : > { %3484 = vrcp.f32 %v1282_v3  ;;  %v1147_v3 = vld [vmem:[%s4401_s15] sm:$0xff] }
 0x38b   : > { %v1394_v5 = vpop.xlane.xlu1 %1393 }
 0x38c   : > { %3486 = vrcp.f32 %v1394_v5  ;;  %v3467_v5 = vld [vmem:[%s3884_s29] sm:$0xff]  }
 0x38f   : > { %v1399_v12 = vpop.permute.xlu1 %1398 }
 0x390   : > { %v1404_v15 = vsel %vm1291_vm4, %v1399_v12, 0 }
 0x391   : > { %v3485_v6 = vpop.eup %3484 }
 0x392   : > { %v1284_v8 = vmul.f32 %v3485_v6, %v3477_v54 }
 0x393   : > { %v1504_v7 = vpop.xlane.xlu0 %1503 }
 0x394   : > { %v1285_v13 = vpack.c.bf16 %v1284_v8, %v1284_v8  ;;  %3488 = vrcp.f32 %v1504_v7 }
 0x397   : > { %v1287_v9 = vpop.permute.xlu0 %1286 }
 0x398   : > { %v1293_v10 = vsel %vm1291_vm4, %v1287_v9, 0 }
 0x399   : > { %3222 = vmatpush3.bf16.msra.mxu0 %v1293_v10  ;;  %v3487_v14 = vpop.eup %3486 }
 0x39a   : > { %3233 = vmatprep.subr.bf16.mxu0 %v3612_v2  ;;  %v1396_v11 = vmul.f32 %v3487_v14, %v3479_v57 }
 0x39b   : > { %v1619_v22 = vpop.permute.xlu0 %1618 }
 0x39c   : > { %3224 = vmatmul.mubr.msk.bf16.vlgmr.msra.gmra.mxu0 %vm1227_vm3, %v1285_v13  ;;  %v1397_v16 = vpack.c.bf16 %v1396_v11, %v1396_v11  ;;  %v1624_v24 = vsel %vm1291_vm4, %v1619_v22, 0  ;;  %v3101_v22 = vld [vmem:[%s4406_s3] ss:$0 sm:$0xff] }
 0x39d   : > { %3234 = vmatpush3.bf16.msra.mxu0 %v1404_v15  ;;  %3235 = vmatprep.mubr.msk.bf16.mxu0 %vm3613_vm1, %v3612_v2 }
 0x39e   : > { %3245 = vmatprep.subr.bf16.mxu0 %v3612_v2 }
 0x3a1   : > { %v3489_v17 = vpop.eup %3488 }
 0x3a2   : > { %v1506_v19 = vmul.f32 %v3489_v17, %v3481_v59 }
 0x3a4   : > { %3236 = vmatmul.mubr.msk.bf16.vlgmr.msra.gmra.mxu0 %vm1227_vm3, %v1397_v16  ;;  %v1507_v23 = vpack.c.bf16 %v1506_v19, %v1506_v19  ;;  %v3095_v16 = vld [vmem:[%s4403_s22] ss:$0 sm:$0xff]  ;;  %s4415_s22 = sld [smem:[#allocation37_spill]] }
 0x3a5   : > { %3247 = vmatprep.mubr.msk.bf16.mxu0 %vm3613_vm1, %v3612_v2 }
 0x3aa   : > { %s4416_s16 = scalar_lea.vmem %s4415_s22, %s3844_s27 }
 0x3c0   : > { %v1614_v18 = vpop.xlane.xlu1 %1613 }
 0x3c1   : > { %3490 = vrcp.f32 %v1614_v18  ;;  %v3096_v18 = vld [vmem:[%s4405_s30] ss:$0 sm:$0xff] }
 0x3c4   : > { %v1509_v20 = vpop.permute.xlu1 %1508 }
 0x3c5   : > { %v1514_v21 = vsel %vm1291_vm4, %v1509_v20, 0 }
 0x3c6   : > { %3246 = vmatpush3.bf16.msra.mxu0 %v1514_v21 }
 0x3c7   : > { %3257 = vmatprep.subr.bf16.mxu0 %v3612_v2 }
 0x3c9   : > { %3248 = vmatmul.mubr.msk.bf16.vlgmr.msra.gmra.mxu0 %vm1227_vm3, %v1507_v23 }
 0x3ca   : > { %3258 = vmatpush3.bf16.msra.mxu0 %v1624_v24  ;;  %3259 = vmatprep.mubr.msk.bf16.mxu0 %vm3613_vm1, %v3612_v2 }
 0x3cb   : > { %3271 = vmatprep.subr.bf16.mxu0 %v3612_v2 }
 0x3ce   : > { %v3491_v25 = vpop.eup %3490 }
 0x3cf   : > { %v1616_v26 = vmul.f32 %v3491_v25, %v3483_v0  ;;  %v3466_v0 = vld [vmem:[%s3884_s29 + $0x8] sm:$0xff]  }
 0x3d1   : > { %v1617_v27 = vpack.c.bf16 %v1616_v26, %v1616_v26 }
 0x3d3   : > { %3260 = vmatmul.mubr.msk.bf16.vlgmr.msra.gmra.mxu0 %vm1227_vm3, %v1617_v27 }
 0x3d4   : > { %3275 = vmatprep.mubr.msk.bf16.mxu0 %vm3613_vm1, %v3612_v2  ;;  %3272 = vmatpush3.bf16.msra.mxu0 %v3466_v0 }
 0x3d5   : > { %3273 = vmatprep.subr.bf16.mxu0 %v3612_v2 }
 0x3d8   : > { %3274 = vmatpush3.bf16.msra.mxu0 %v3467_v5 }
 0x3d9   : > { %3287 = vmatprep.subr.bf16.mxu0 %v3612_v2 }
 0x45c   : > { %v1329_v28 = vpop.f32.mrf.mxu0 }
 0x45e   : > { %v3225_v29 = vpop.f32.mrf.mxu0 }
 0x460   : > { %v1332_v30 = vpop.f32.mrf.mxu0 }
 0x461   : > { %v3097_v30 = vld [vmem:[%s4408_s2] ss:$0 sm:$0xff]  ;;  %s4417_s2 = sld [smem:[#allocation9_spill]] }
 0x462   : > { %v3226_v31 = vpop.f32.mrf.mxu0 }
 0x464   : > { %v1440_v32 = vpop.f32.mrf.mxu0 }
 0x465   : > { %1667 = vrot.lane.b32.xlu1 %v1440_v32, %s3625_s26 }
 0x466   : > { %v3237_v33 = vpop.f32.mrf.mxu0 }
 0x467   : > { %p3131_p1 = scmp.ne.s32.totalorder %s4417_s2, 1 }
 0x468   : > { %v1443_v34 = vpop.f32.mrf.mxu0  ;;  %s4421_s0 = sld [smem:[#allocation41_spill]] (!%p3131_p1)  ;;  %s4422_s15 = scalar_lea.vmem (!%p3131_p1), [#allocation3], %s3839_s4 }
 0x46a   : > { %v3238_v35 = vpop.f32.mrf.mxu0 }
 0x489   : > { %v1550_v38 = vpop.f32.mrf.mxu0 }
 0x48a   : > { %1671 = vrot.lane.b32.xlu0 %v1550_v38, %s3626_s24 }
 0x48b   : > { %v3249_v39 = vpop.f32.mrf.mxu0 }
 0x48d   : > { %v1553_v40 = vpop.f32.mrf.mxu0 }
 0x48f   : > { %v3250_v41 = vpop.f32.mrf.mxu0 }
 0x493   : > { %v1660_v42 = vpop.f32.mrf.mxu0 }
 0x494   : > { %1675 = vrot.lane.b32.xlu1 %v1660_v42, %s3627_s12 }
 0x495   : > { %v3261_v43 = vpop.f32.mrf.mxu0 }
 0x497   : > { %v1663_v44 = vpop.f32.mrf.mxu0 }
 0x499   : > { %v3262_v45 = vpop.f32.mrf.mxu0 }
 0x4d7   : > { %v1668_v46 = vpop.permute.xlu1 %1667 }
 0x4d8   : > { %v1678_v48 = vsel %vm1227_vm3, %v1329_v28, %v1668_v46 }
 0x4fc   : > { %v1672_v47 = vpop.permute.xlu0 %1671 }
 0x4fd   : > { %v1680_v49 = vsel %vm1679_vm5, %v1678_v48, %v1672_v47 }
 0x506   : > { %v1676_v50 = vpop.permute.xlu1 %1675 }
 0x507   : > { %v1682_v51 = vsel %vm1681_vm6, %v1680_v49, %v1676_v50 }
 0x508   : > { %v1683_v52 = vpack.c.bf16 %v1682_v51, %v1682_v51 }
 0x50a   : > { %3268 = vmatmul.mubr.msk.bf16.vlgmr.msra.gmra.mxu1 %vm1172_vm2, %v1683_v52 }
 0x50b   : > { %3283 = vmatprep.mubr.msk.bf16.mxu1 %vm3613_vm1, %v3612_v2  ;;  %3280 = vmatpush3.bf16.msra.mxu1 %v3464_v63 }
 0x50c   : > { %3281 = vmatprep.subr.bf16.mxu1 %v3612_v2 }
 0x50f   : > { %3282 = vmatpush3.bf16.msra.mxu1 %v3465_v1 }
 0x510   : > { %3293 = vmatprep.subr.bf16.mxu1 %v3612_v2 }
 0x5ca   : > { %v1739_v54 = vpop.f32.mrf.mxu1 }
 0x5cb   : > { %v1740_v55 = vadd.f32 %v3091_v53, %v1739_v54 }
 0x5cc   : > { %v3269_v56 = vpop.f32.mrf.mxu1 }
 0x5cd   : > { %v1745_v57 = vadd.f32 %v1740_v55, %v3951_v4  ;;  %v1851_v4 = vpack.c.bf16 %v1147_v3, %v1147_v3 }
 0x5ce   : > { %v1742_v58 = vpop.f32.mrf.mxu1 }
 0x5cf   : > { %v1748_v59 = vsel %vm1172_vm2, %v1745_v57, 0.0  ;;  %v1753_v60 = vmul.f32 %v1745_v57, %v1745_v57  ;;  %3284 = vmatmul.mubr.msk.bf16.vlgmr.msra.gmra.mxu1 %vm1172_vm2, %v1851_v4 }
 0x5d0   : > { %1749 = vadd.xlane.f32.xlu0 %v1748_v59  ;;  %v3270_v61 = vpop.f32.mrf.mxu1  ;;  %3295 = vmatprep.mubr.msk.bf16.mxu1 %vm3613_vm1, %v3612_v2 }
 0x5d1   : > { %v1754_v62 = vsel %vm1172_vm2, %v1753_v60, 0.0 }
 0x5d2   : > { %1755 = vadd.xlane.f32.xlu1 %v1754_v62 }
 0x659   : > { %v1750_v6 = vpop.xlane.xlu0 %1749 }
 0x65a   : > { %v1752_v7 = vmul.f32 0.03125, %v1750_v6 }
 0x65b   : > { %v1756_v8 = vpop.xlane.xlu1 %1755 }
 0x65c   : > { %v1758_v9 = vmul.f32 %v1752_v7, %v1752_v7  ;;  %v1757_v10 = vmul.f32 0.03125, %v1756_v8  ;;  %v1761_v15 = vsub.f32 %v1745_v57, %v1752_v7 }
 0x65e   : > { %v1759_v12 = vsub.f32 %v1757_v10, %v1758_v9 }
 0x660   : > { %v1760_v13 = vmax.f32 %v1759_v12, 0.0 }
 0x662   : > { %v1762_v14 = vadd.f32 1e-05, %v1760_v13 }
 0x664   : > { %3492 = vrsqrt.f32 %v1762_v14 }
 0x671   : > { %v3493_v11 = vpop.eup %3492 }
 0x672   : > { %v1764_v17 = vmul.f32 %v3493_v11, %v1761_v15 }
 0x674   : > { %v1771_v19 = vmul.f32 %v3095_v16, %v1764_v17 }
 0x676   : > { %v4075_v20 = vadd.f32 %v3096_v18, %v1771_v19 }
 0x678   : > { %v1784_v21 = vpack.c.bf16 %v4075_v20, %v4075_v20 }
 0x67a   : > { %3276 = vmatmul.mubr.msk.bf16.vlgmr.msra.gmra.mxu0 %vm1172_vm2, %v1784_v21 }
 0x67b   : > { %3289 = vmatprep.mubr.msk.bf16.mxu0 %vm3613_vm1, %v3612_v2 }
 0x68f   : > { %v1907_v23 = vpop.f32.mrf.mxu1 }
 0x690   : > { %v1908_v24 = vadd.f32 %v3101_v22, %v1907_v23 }
 0x691   : > { %v3285_v25 = vpop.f32.mrf.mxu1 }
 0x692   : > { %v4087_v26 = vpack.c.bf16 %v1908_v24, %v1908_v24 }
 0x693   : > { %v1910_v27 = vpop.f32.mrf.mxu1 }
 0x694   : > { %2031 = vrot.lane.b32.xlu0 %v4087_v26, %s3615_s5  ;;  %v1925_v29 = vsel %vm1227_vm3, %v4087_v26, 0 }
 0x695   : > { %v3286_v28 = vpop.f32.mrf.mxu1  ;;  %3288 = vmatpush3.bf16.xpose.msra.mxu0 %v1925_v29 }
 0x696   : > { %3299 = vmatprep.subr.bf16.mxu0 %v3612_v2 }
 0x698   : > { %2141 = vrot.lane.b32.xlu0 %v4087_v26, %s3618_s1 }
 0x69c   : > { %2251 = vrot.lane.b32.xlu0 %v4087_v26, %s3620_s25 }
 0x706   : > { %v2032_v36 = vpop.permute.xlu0 %2031 }
 0x707   : > { %v2037_v38 = vsel %vm1227_vm3, %v2032_v36, 0 }
 0x70a   : > { %v2142_v40 = vpop.permute.xlu0 %2141 }
 0x70b   : > { %v2147_v42 = vsel %vm1227_vm3, %v2142_v40, 0 }
 0x70e   : > { %v2252_v43 = vpop.permute.xlu0 %2251 }
 0x70f   : > { %v2257_v45 = vsel %vm1227_vm3, %v2252_v43, 0 }
 0x73a   : > { %v1840_v31 = vpop.f32.mrf.mxu0 }
 0x73b   : > { %v1841_v32 = vadd.f32 %v3097_v30, %v1840_v31 }
 0x73c   : > { %v3277_v33 = vpop.f32.mrf.mxu0 }
 0x73d   : > { %v1918_v34 = vmul.f32 0.35355338, %v1841_v32 }
 0x73e   : > { %v1843_v35 = vpop.f32.mrf.mxu0 }
 0x73f   : > { %v1919_v37 = vpack.c.bf16 %v1918_v34, %v1918_v34 }
 0x740   : > { %v3278_v39 = vpop.f32.mrf.mxu0 }
 0x741   : > { %2029 = vrot.lane.b32.xlu1 %v1919_v37, %s3615_s5  ;;  %3290 = vmatmul.mubr.msk.bf16.vlgmr.msra.gmra.mxu0 %vm1227_vm3, %v1919_v37  ;;  %s4409_s5 = scalar_lea.vmem %s4307_s13, %s3844_s27 }
 0x742   : > { %3300 = vmatpush3.bf16.xpose.msra.mxu0 %v2037_v38  ;;  %3301 = vmatprep.mubr.msk.bf16.mxu0 %vm3613_vm1, %v3612_v2 }
 0x743   : > { %3311 = vmatprep.subr.bf16.mxu0 %v3612_v2 }
 0x745   : > { %2139 = vrot.lane.b32.xlu1 %v1919_v37, %s3618_s1  ;;  %s4419_s1 = sld [smem:[#allocation38_spill]] (!%p3131_p1) }
 0x749   : > { %2249 = vrot.lane.b32.xlu1 %v1919_v37, %s3620_s25  ;;  %s4411_s25 = sld [smem:[#allocation34_spill]] }
 0x7b3   : > { %v2030_v41 = vpop.permute.xlu1 %2029 }
 0x7b4   : > { %3302 = vmatmul.mubr.msk.bf16.vlgmr.msra.gmra.mxu0 %vm1227_vm3, %v2030_v41 }
 0x7b5   : > { %3312 = vmatpush3.bf16.xpose.msra.mxu0 %v2147_v42  ;;  %3313 = vmatprep.mubr.msk.bf16.mxu0 %vm3613_vm1, %v3612_v2 }
 0x7b6   : > { %3323 = vmatprep.subr.bf16.mxu0 %v3612_v2 }
 0x7b7   : > { %v2140_v44 = vpop.permute.xlu1 %2139 }
 0x7bb   : > { %v2250_v46 = vpop.permute.xlu1 %2249 }
 0x7bc   : > { %3314 = vmatmul.mubr.msk.bf16.vlgmr.msra.gmra.mxu0 %vm1227_vm3, %v2140_v44 }
 0x7bd   : > { %3324 = vmatpush3.bf16.xpose.msra.mxu0 %v2257_v45  ;;  %3325 = vmatprep.mubr.msk.bf16.mxu0 %vm3613_vm1, %v3612_v2 }
 0x7be   : > { %3335 = vmatprep.subr.bf16.mxu0 %v3612_v2 }
 0x7c4   : > { %3326 = vmatmul.mubr.msk.bf16.vlgmr.msra.gmra.mxu0 %vm1227_vm3, %v2250_v46 }
 0x7c5   : > { %3339 = vmatprep.mubr.msk.bf16.mxu0 %vm3613_vm1, %v3612_v2 }
 0x801   : > { %v1961_v47 = vpop.f32.mrf.mxu0 }
 0x802   : > { %v1967_v48 = vsel %vm1227_vm3, %v1961_v47, -inf }
 0x803   : > { %1968 = vmax.xlane.f32.xlu0 %v1967_v48  ;;  %v3291_v49 = vpop.f32.mrf.mxu0 }
 0x805   : > { %v1964_v50 = vpop.f32.mrf.mxu0 }
 0x807   : > { %v3292_v51 = vpop.f32.mrf.mxu0 }
 0x874   : > { %v2073_v52 = vpop.f32.mrf.mxu0 }
 0x875   : > { %v2079_v53 = vsel %vm1227_vm3, %v2073_v52, -inf }
 0x876   : > { %2080 = vmax.xlane.f32.xlu1 %v2079_v53  ;;  %v3303_v54 = vpop.f32.mrf.mxu0  ;;  %v3468_v53 = vld [vmem:[%s3902_s20 + $0x8] sm:$0xff]  }
 0x877   : > { %3336 = vmatpush3.bf16.msra.mxu0 %v3468_v53 }
 0x878   : > { %v2076_v55 = vpop.f32.mrf.mxu0  ;;  %3337 = vmatprep.subr.bf16.mxu0 %v3612_v2 }
 0x87a   : > { %v3304_v56 = vpop.f32.mrf.mxu0 }
 0x87b   : > { %v3469_v56 = vld [vmem:[%s3902_s20] sm:$0xff]  }
 0x87c   : > { %v2183_v57 = vpop.f32.mrf.mxu0  ;;  %3338 = vmatpush3.bf16.msra.mxu0 %v3469_v56 }
 0x87d   : > { %v2189_v58 = vsel %vm1227_vm3, %v2183_v57, -inf  ;;  %3351 = vmatprep.subr.bf16.mxu0 %v3612_v2 }
 0x87e   : > { %2190 = vmax.xlane.f32.xlu0 %v2189_v58  ;;  %v3315_v59 = vpop.f32.mrf.mxu0 }
 0x880   : > { %v2186_v60 = vpop.f32.mrf.mxu0 }
 0x882   : > { %v3316_v61 = vpop.f32.mrf.mxu0 }
 0x884   : > { %v2293_v62 = vpop.f32.mrf.mxu0 }
 0x885   : > { %v2299_v63 = vsel %vm1227_vm3, %v2293_v62, -inf }
 0x886   : > { %2300 = vmax.xlane.f32.xlu0 %v2299_v63  ;;  %v3327_v0 = vpop.f32.mrf.mxu0 }
 0x888   : > { %v2296_v1 = vpop.f32.mrf.mxu0 }
 0x88a   : > { %v3328_v3 = vpop.f32.mrf.mxu0 }
 0x88c   : > { %v1969_v5 = vpop.xlane.xlu0 %1968 }
 0x88d   : > { %v1970_v4 = vsub.f32 %v1961_v47, %v1969_v5 }
 0x88f   : > { %v1971_v6 = vmul.f32 1.442695, %v1970_v4 }
 0x891   : > { %3494 = vpow2.f32 %v1971_v6 }
 0x89e   : > { %v3495_v7 = vpop.eup %3494 }
 0x89f   : > { %v1973_v8 = vsel %vm1227_vm3, %v3495_v7, 0.0 }
 0x8a0   : > { %1974 = vadd.xlane.f32.xlu1 %v1973_v8 }
 0x8b1   : > { %1980 = vrot.lane.b32.xlu1 %v4087_v26, %s3614_s28 }
 0x8ff   : > { %v2081_v9 = vpop.xlane.xlu1 %2080 }
 0x900   : > { %v2082_v10 = vsub.f32 %v2073_v52, %v2081_v9 }
 0x902   : > { %v2083_v12 = vmul.f32 1.442695, %v2082_v10 }
 0x904   : > { %3496 = vpow2.f32 %v2083_v12  ;;  %v3113_v12 = vld [vmem:[%s4409_s5] ss:$0 sm:$0xff]  ;;  %s4418_s5 = sld [smem:[#allocation40_spill]] (!%p3131_p1) }
 0x907   : > { %v2191_v13 = vpop.xlane.xlu0 %2190 }
 0x908   : > { %v2192_v14 = vsub.f32 %v2183_v57, %v2191_v13 }
 0x90a   : > { %v2193_v15 = vmul.f32 1.442695, %v2192_v14 }
 0x90c   : > { %3498 = vpow2.f32 %v2193_v15 }
 0x90f   : > { %v2301_v11 = vpop.xlane.xlu0 %2300 }
 0x910   : > { %v2302_v16 = vsub.f32 %v2293_v62, %v2301_v11 }
 0x911   : > { %v3497_v17 = vpop.eup %3496 }
 0x912   : > { %v2303_v18 = vmul.f32 1.442695, %v2302_v16  ;;  %v2085_v19 = vsel %vm1227_vm3, %v3497_v17, 0.0 }
 0x913   : > { %2086 = vadd.xlane.f32.xlu0 %v2085_v19 }
 0x914   : > { %3500 = vpow2.f32 %v2303_v18 }
 0x919   : > { %v3499_v21 = vpop.eup %3498 }
 0x91a   : > { %v2195_v22 = vsel %vm1227_vm3, %v3499_v21, 0.0 }
 0x91b   : > { %2196 = vadd.xlane.f32.xlu1 %v2195_v22  ;;  %v3470_v22 = vld [vmem:[%s3919_s8 + $0x8] sm:$0xff]  }
 0x921   : > { %v3501_v23 = vpop.eup %3500 }
 0x922   : > { %v2305_v24 = vsel %vm1227_vm3, %v3501_v23, 0.0 }
 0x923   : > { %2306 = vadd.xlane.f32.xlu0 %v2305_v24  ;;  %v3472_v24 = vld [vmem:[%s3929_s6 + $0x18] sm:$0xff]  }
 0x929   : > { %v1975_v25 = vpop.xlane.xlu1 %1974 }
 0x92a   : > { %3502 = vrcp.f32 %v1975_v25  ;;  %v3473_v25 = vld [vmem:[%s3929_s6 + $0x10] sm:$0xff]  }
 0x92c   : > { %2201 = vrot.lane.b32.xlu1 %v4087_v26, %s3617_s7  ;;  %s4410_s7 = scalar_lea.vmem %s4308_s14, %s3844_s27 }
 0x92d   : > { %v1981_v27 = vpop.permute.xlu1 %1980 }
 0x92e   : > { %v1986_v28 = vsel %vm1291_vm4, %v1981_v27, 0 }
 0x92f   : > { %3294 = vmatpush3.bf16.msra.mxu1 %v1986_v28 }
 0x930   : > { %2311 = vrot.lane.b32.xlu1 %v4087_v26, %s3619_s10  ;;  %3305 = vmatprep.subr.bf16.mxu1 %v3612_v2 }
 0x937   : > { %v3503_v29 = vpop.eup %3502 }
 0x938   : > { %v1977_v30 = vmul.f32 %v3503_v29, %v3495_v7 }
 0x939   : > { %2091 = vrot.lane.b32.xlu0 %v4087_v26, %s3616_s9 }
 0x93a   : > { %v1978_v31 = vpack.c.bf16 %v1977_v30, %v1977_v30 }
 0x93c   : > { %3296 = vmatmul.mubr.msk.bf16.vlgmr.msra.gmra.mxu1 %vm1227_vm3, %v1978_v31 }
 0x93d   : > { %3307 = vmatprep.mubr.msk.bf16.mxu1 %vm3613_vm1, %v3612_v2 }
 0x99c   : > { %v2087_v32 = vpop.xlane.xlu0 %2086 }
 0x99d   : > { %3504 = vrcp.f32 %v2087_v32 }
 0x9a4   : > { %v2197_v33 = vpop.xlane.xlu1 %2196 }
 0x9a5   : > { %3506 = vrcp.f32 %v2197_v33 }
 0x9a8   : > { %v2202_v39 = vpop.permute.xlu1 %2201 }
 0x9a9   : > { %v2207_v41 = vsel %vm1291_vm4, %v2202_v39, 0 }
 0x9aa   : > { %v3505_v34 = vpop.eup %3504 }
 0x9ab   : > { %v2089_v36 = vmul.f32 %v3505_v34, %v3497_v17 }
 0x9ac   : > { %v2307_v35 = vpop.xlane.xlu0 %2306  ;;  %v2312_v43 = vpop.permute.xlu1 %2311 }
 0x9ad   : > { %3508 = vrcp.f32 %v2307_v35  ;;  %v2090_v26 = vpack.c.bf16 %v2089_v36, %v2089_v36  ;;  %v2317_v46 = vsel %vm1291_vm4, %v2312_v43, 0  ;;  %v3117_v36 = vld [vmem:[%s4410_s7] ss:$0 sm:$0xff] }
 0x9ae   : > { %v3119_v43 = vld [vmem:[%s1123_s23] ss:$0 sm:$0xff] }
 0x9b0   : > { %v2092_v37 = vpop.permute.xlu0 %2091 }
 0x9b1   : > { %v2097_v38 = vsel %vm1291_vm4, %v2092_v37, 0 }
 0x9b2   : > { %3306 = vmatpush3.bf16.msra.mxu1 %v2097_v38  ;;  %v3507_v40 = vpop.eup %3506 }
 0x9b3   : > { %3317 = vmatprep.subr.bf16.mxu1 %v3612_v2  ;;  %v2199_v42 = vmul.f32 %v3507_v40, %v3499_v21 }
 0x9b5   : > { %3308 = vmatmul.mubr.msk.bf16.vlgmr.msra.gmra.mxu1 %vm1227_vm3, %v2090_v26  ;;  %v2200_v44 = vpack.c.bf16 %v2199_v42, %v2199_v42  ;;  %v3475_v42 = vld [vmem:[%s3929_s6] sm:$0xff]  }
 0x9b6   : > { %3318 = vmatpush3.bf16.msra.mxu1 %v2207_v41  ;;  %3319 = vmatprep.mubr.msk.bf16.mxu1 %vm3613_vm1, %v3612_v2  ;;  %v3474_v41 = vld [vmem:[%s3929_s6 + $0x8] sm:$0xff]  }
 0x9b7   : > { %3329 = vmatprep.subr.bf16.mxu1 %v3612_v2 }
 0x9ba   : > { %v3509_v45 = vpop.eup %3508 }
 0x9bb   : > { %v2309_v47 = vmul.f32 %v3509_v45, %v3501_v23  ;;  %v3471_v23 = vld [vmem:[%s3919_s8] sm:$0xff]  }
 0x9bd   : > { %3320 = vmatmul.mubr.msk.bf16.vlgmr.msra.gmra.mxu1 %vm1227_vm3, %v2200_v44  ;;  %v2310_v48 = vpack.c.bf16 %v2309_v47, %v2309_v47 }
 0x9be   : > { %3330 = vmatpush3.bf16.msra.mxu1 %v2317_v46  ;;  %3331 = vmatprep.mubr.msk.bf16.mxu1 %vm3613_vm1, %v3612_v2 }
 0x9bf   : > { %3343 = vmatprep.subr.bf16.mxu1 %v3612_v2 }
 0x9c5   : > { %3332 = vmatmul.mubr.msk.bf16.vlgmr.msra.gmra.mxu1 %vm1227_vm3, %v2310_v48 }
 0x9c6   : > { %3347 = vmatprep.mubr.msk.bf16.mxu1 %vm3613_vm1, %v3612_v2  ;;  %3344 = vmatpush3.bf16.msra.mxu1 %v3470_v22 }
 0x9c7   : > { %3345 = vmatprep.subr.bf16.mxu1 %v3612_v2 }
 0x9ca   : > { %3346 = vmatpush3.bf16.msra.mxu1 %v3471_v23 }
 0x9fc   : > { %v2022_v49 = vpop.f32.mrf.mxu1 }
 0x9fe   : > { %v3297_v50 = vpop.f32.mrf.mxu1 }
 0xa00   : > { %v2025_v51 = vpop.f32.mrf.mxu1 }
 0xa02   : > { %v3298_v52 = vpop.f32.mrf.mxu1 }
 0xa75   : > { %v2133_v54 = vpop.f32.mrf.mxu1 }
 0xa76   : > { %2360 = vrot.lane.b32.xlu0 %v2133_v54, %s3625_s26  ;;  %s4412_s26 = scalar_lea.vmem %s4411_s25, %s3844_s27 }
 0xa77   : > { %v3309_v55 = vpop.f32.mrf.mxu1  ;;  %v3118_v38 = vld [vmem:[%s4412_s26] ss:$0 sm:$0xff]  ;;  %s4420_s26 = sld [smem:[#allocation39_spill]] (!%p3131_p1) }
 0xa79   : > { %v2136_v57 = vpop.f32.mrf.mxu1 }
 0xa7b   : > { %v3310_v58 = vpop.f32.mrf.mxu1 }
 0xa7d   : > { %v2243_v59 = vpop.f32.mrf.mxu1 }
 0xa7e   : > { %2364 = vrot.lane.b32.xlu1 %v2243_v59, %s3626_s24 }
 0xa7f   : > { %v3321_v60 = vpop.f32.mrf.mxu1 }
 0xa81   : > { %v2246_v61 = vpop.f32.mrf.mxu1 }
 0xa83   : > { %v3322_v62 = vpop.f32.mrf.mxu1 }
 0xa85   : > { %v2353_v63 = vpop.f32.mrf.mxu1 }
 0xa86   : > { %2368 = vrot.lane.b32.xlu0 %v2353_v63, %s3627_s12 }
 0xa87   : > { %v3333_v0 = vpop.f32.mrf.mxu1 }
 0xa89   : > { %v2356_v1 = vpop.f32.mrf.mxu1 }
 0xa8b   : > { %v3334_v3 = vpop.f32.mrf.mxu1 }
 0xae8   : > { %v2361_v5 = vpop.permute.xlu0 %2360 }
 0xae9   : > { %v2371_v6 = vsel %vm1227_vm3, %v2022_v49, %v2361_v5 }
 0xaf0   : > { %v2365_v4 = vpop.permute.xlu1 %2364 }
 0xaf1   : > { %v2372_v7 = vsel %vm1679_vm5, %v2371_v6, %v2365_v4 }
 0xaf8   : > { %v2369_v8 = vpop.permute.xlu0 %2368 }
 0xaf9   : > { %v2373_v9 = vsel %vm1681_vm6, %v2372_v7, %v2369_v8 }
 0xafa   : > { %v2374_v10 = vpack.c.bf16 %v2373_v9, %v2373_v9  ;;  %v3130_v9 = vld [vmem:[%s4416_s16] ss:$0 sm:$0xff] }
 0xafc   : > { %3340 = vmatmul.mubr.msk.bf16.vlgmr.msra.gmra.mxu0 %vm1172_vm2, %v2374_v10 }
 0xafd   : > { %3359 = vmatprep.mubr.msk.bf16.mxu0 %vm3613_vm1, %v3612_v2  ;;  %3352 = vmatpush3.bf16.msra.mxu0 %v3472_v24 }
 0xafe   : > { %3353 = vmatprep.subr.bf16.mxu0 %v3612_v2 }
 0xb01   : > { %3354 = vmatpush3.bf16.msra.mxu0 %v3473_v25 }
 0xb02   : > { %3355 = vmatprep.subr.bf16.mxu0 %v3612_v2 }
 0xb05   : > { %3356 = vmatpush3.bf16.msra.mxu0 %v3474_v41 }
 0xb06   : > { %3357 = vmatprep.subr.bf16.mxu0 %v3612_v2  ;;  %v3123_v2 = vld [vmem:[%s1131_s21] ss:$0 sm:$0xff]  ;;  %s4413_s21 = sld [smem:[#allocation36_spill]] }
 0xb09   : > { %3358 = vmatpush3.bf16.msra.mxu0 %v3475_v42 }
 0xb0c   : > { %s4414_s29 = scalar_lea.vmem %s4413_s21, %s3844_s27 }
 0xb0d   : > { %v3129_v7 = vld [vmem:[%s4414_s29] ss:$0 sm:$0xff] }
 0xbbc   : > { %v2430_v13 = vpop.f32.mrf.mxu0 }
 0xbbd   : > { %v2431_v14 = vadd.f32 %v3113_v12, %v2430_v13 }
 0xbbe   : > { %v3341_v15 = vpop.f32.mrf.mxu0 }
 0xbbf   : > { %v2436_v11 = vadd.f32 %v2431_v14, %v4075_v20 }
 0xbc0   : > { %v2433_v16 = vpop.f32.mrf.mxu0 }
 0xbc1   : > { %v2439_v17 = vsel %vm1172_vm2, %v2436_v11, 0.0  ;;  %v2443_v18 = vmul.f32 %v2436_v11, %v2436_v11 }
 0xbc2   : > { %2440 = vadd.xlane.f32.xlu1 %v2439_v17  ;;  %v3342_v19 = vpop.f32.mrf.mxu0 }
 0xbc3   : > { %v2444_v21 = vsel %vm1172_vm2, %v2443_v18, 0.0 }
 0xbc4   : > { %2445 = vadd.xlane.f32.xlu0 %v2444_v21 }
 0xc4b   : > { %v2441_v20 = vpop.xlane.xlu1 %2440 }
 0xc4c   : > { %v2442_v27 = vmul.f32 0.03125, %v2441_v20 }
 0xc4d   : > { %v2446_v28 = vpop.xlane.xlu0 %2445 }
 0xc4e   : > { %v2448_v29 = vmul.f32 %v2442_v27, %v2442_v27  ;;  %v2447_v30 = vmul.f32 0.03125, %v2446_v28  ;;  %v2451_v34 = vsub.f32 %v2436_v11, %v2442_v27 }
 0xc50   : > { %v2449_v31 = vsub.f32 %v2447_v30, %v2448_v29 }
 0xc52   : > { %v2450_v32 = vmax.f32 %v2449_v31, 0.0 }
 0xc54   : > { %v2452_v33 = vadd.f32 1e-05, %v2450_v32 }
 0xc56   : > { %3510 = vrsqrt.f32 %v2452_v33 }
 0xc63   : > { %v3511_v35 = vpop.eup %3510 }
 0xc64   : > { %v2454_v37 = vmul.f32 %v3511_v35, %v2451_v34 }
 0xc66   : > { %v2461_v39 = vmul.f32 %v3117_v36, %v2454_v37 }
 0xc68   : > { %v2468_v26 = vadd.f32 %v3118_v38, %v2461_v39 }
 0xc6a   : > { %v2474_v40 = vpack.c.bf16 %v2468_v26, %v2468_v26 }
 0xc6c   : > { %3348 = vmatmul.mubr.msk.bf16.vlgmr.msra.gmra.mxu1 %vm1172_vm2, %v2474_v40 }
 0xd2c   : > { %v2530_v44 = vpop.f32.mrf.mxu1 }
 0xd2d   : > { %v2531_v45 = vadd.f32 %v3119_v43, %v2530_v44 }
 0xd2e   : > { %v3349_v46 = vpop.f32.mrf.mxu1 }
 0xd2f   : > { %v2536_v47 = vmax.f32 %v2531_v45, 0.0 }
 0xd30   : > { %v2533_v48 = vpop.f32.mrf.mxu1 }
 0xd31   : > { %v2546_v49 = vpack.c.bf16 %v2536_v47, %v2536_v47 }
 0xd32   : > { %v3350_v50 = vpop.f32.mrf.mxu1 }
 0xd33   : > { %3360 = vmatmul.mubr.msk.bf16.vlgmr.msra.gmra.mxu0 %vm2577_vm7, %v2546_v49 }
 0xdf3   : > { %v2615_v51 = vpop.f32.mrf.mxu0 }
 0xdf4   : > { %v2616_v52 = vadd.f32 %v3123_v2, %v2615_v51 }
 0xdf5   : > { %v3361_v53 = vpop.f32.mrf.mxu0 }
 0xdf6   : > { %v2621_v54 = vadd.f32 %v2616_v52, %v2468_v26 }
 0xdf7   : > { %v2618_v55 = vpop.f32.mrf.mxu0 }
 0xdf8   : > { %v2624_v56 = vsel %vm1172_vm2, %v2621_v54, 0.0  ;;  %v2628_v57 = vmul.f32 %v2621_v54, %v2621_v54 }
 0xdf9   : > { %2625 = vadd.xlane.f32.xlu0 %v2624_v56  ;;  %v3362_v58 = vpop.f32.mrf.mxu0 }
 0xdfa   : > { %v2629_v59 = vsel %vm1172_vm2, %v2628_v57, 0.0 }
 0xdfb   : > { %2630 = vadd.xlane.f32.xlu1 %v2629_v59 }
 0xe82   : > { %v2626_v60 = vpop.xlane.xlu0 %2625 }
 0xe83   : > { %v2627_v61 = vmul.f32 0.03125, %v2626_v60 }
 0xe84   : > { %v2631_v62 = vpop.xlane.xlu1 %2630 }
 0xe85   : > { %v2633_v63 = vmul.f32 %v2627_v61, %v2627_v61  ;;  %v2632_v0 = vmul.f32 0.03125, %v2631_v62  ;;  %v2636_v4 = vsub.f32 %v2621_v54, %v2627_v61 }
 0xe87   : > { %v2634_v1 = vsub.f32 %v2632_v0, %v2633_v63 }
 0xe89   : > { %v2635_v3 = vmax.f32 %v2634_v1, 0.0 }
 0xe8b   : > { %v2637_v5 = vadd.f32 1e-05, %v2635_v3 }
 0xe8d   : > { %3512 = vrsqrt.f32 %v2637_v5 }
 0xe9a   : > { %v3513_v6 = vpop.eup %3512 }
 0xe9b   : > { %v2639_v8 = vmul.f32 %v3513_v6, %v2636_v4 }
 0xe9d   : > { %v2646_v10 = vmul.f32 %v3129_v7, %v2639_v8  ;;  %2658 = sbr.rel (%p3131_p1) target bundleno = 4118 (0x1016), region = 132 }
 0xe9f   : > { %v2653_v12 = vadd.f32 %v3130_v9, %v2646_v10 }
 0xea1   : > { %2654 = vst.msk [vmem:[#allocation2] sm:$0xff] %vm1172_vm2, %v2653_v12 }
 0xea2   : > { %v2661_v13 = vsel %vm1172_vm2, %v2653_v12, 0.0  ;;  %v2665_v14 = vmul.f32 %v2653_v12, %v2653_v12  ;;  %v3514_v11 = vld [vmem:[%s4418_s5 + $0x8] sm:$0xff]   ;;  %v3628_v16 = vmov 0.0   ;;  %vm3629_vm8 = vmmov 0   ;;  %v3515_v17 = vld [vmem:[%s4418_s5] sm:$0xff]  }
 0xea3   : > { %2662 = vadd.xlane.f32.xlu0 %v2661_v13  ;;  %3363 = vmatprep.subr.bf16.mxu0 %v3628_v16  ;;  %v3132_v29 = vld [vmem:[%s4419_s1] ss:$0 sm:$0xff] }
 0xea4   : > { %v2666_v15 = vsel %vm1172_vm2, %v2665_v14, 0.0  ;;  %3367 = vmatprep.mubr.msk.bf16.mxu0 %vm3629_vm8, %v3628_v16  ;;  %3364 = vmatpush3.bf16.msra.mxu0 %v3514_v11  ;;  %v3133_v31 = vld [vmem:[%s4420_s26] ss:$0 sm:$0xff] }
 0xea5   : > { %3365 = vmatprep.subr.bf16.mxu0 %v3628_v16  ;;  %v3134_v35 = vld [vmem:[%s4421_s0] ss:$0 sm:$0xff] }
 0xea7   : > { %2667 = vadd.xlane.f32.xlu0 %v2666_v15 }
 0xea8   : > { %3366 = vmatpush3.bf16.msra.mxu0 %v3515_v17 }
 0xf2c   : > { %v2663_v18 = vpop.xlane.xlu0 %2662 }
 0xf2d   : > { %v2664_v19 = vmul.f32 0.03125, %v2663_v18 }
 0xf2f   : > { %v2670_v22 = vmul.f32 %v2664_v19, %v2664_v19  ;;  %v2673_v27 = vsub.f32 %v2653_v12, %v2664_v19 }
 0xf30   : > { %v2668_v21 = vpop.xlane.xlu0 %2667 }
 0xf31   : > { %v2669_v23 = vmul.f32 0.03125, %v2668_v21 }
 0xf33   : > { %v2671_v24 = vsub.f32 %v2669_v23, %v2670_v22 }
 0xf35   : > { %v2672_v25 = vmax.f32 %v2671_v24, 0.0 }
 0xf37   : > { %v2674_v20 = vadd.f32 1e-05, %v2672_v25 }
 0xf39   : > { %3516 = vrsqrt.f32 %v2674_v20 }
 0xf46   : > { %v3517_v28 = vpop.eup %3516 }
 0xf47   : > { %v2676_v30 = vmul.f32 %v3517_v28, %v2673_v27 }
 0xf49   : > { %v2683_v32 = vmul.f32 %v3132_v29, %v2676_v30 }
 0xf4b   : > { %v2690_v33 = vadd.f32 %v3133_v31, %v2683_v32 }
 0xf4d   : > { %v2696_v34 = vpack.c.bf16 %v2690_v33, %v2690_v33 }
 0xf4f   : > { %3368 = vmatmul.mubr.msk.bf16.vlgmr.msra.gmra.mxu0 %vm1172_vm2, %v2696_v34 }
0x100f   : > { %v2752_v36 = vpop.f32.mrf.mxu0 }
0x1010   : > { %v2753_v37 = vadd.f32 %v3134_v35, %v2752_v36 }
0x1011   : > { %v3369_v38 = vpop.f32.mrf.mxu0 }
0x1012   : > { %2758 = vst [vmem:[%s4422_s15] sm:$0xff] %v2753_v37 }
0x1013   : > { %v2755_v39 = vpop.f32.mrf.mxu0 }
0x1015   : > { %v3370_v26 = vpop.f32.mrf.mxu0 }
0x1016 PF: > { %s4423_s6 = sld [smem:[#allocation10_spill]]  ;;  %s4427_s2 = scalar_lea.vmem [#allocation3], %s3839_s4 }
0x1017   : > { %s4424_s23 = sld [smem:[#allocation7_spill]]  ;;  %s2773_s20 = sshll.u32 %s4427_s2, 4  ;;  %s2774_s20 = int_to_ptr.vmem [resolvable:$true] %s2773_s20 }
0x1018   : > { %s4426_s22 = sld [smem:[#allocation42_spill]]  ;;  %s3518_s8 = scalar_lea.vmem %s2774_s20, 128 }
0x1019   : > { %p3519_p2 = scmp.ne.s32.totalorder %s2774_s20, %s3518_s8  ;;  %s3630_s9 = smov [#allocation3]  }
0x101a   : > { %s3522_s7 = sshll.u32 %s3630_s9, 4  ;;  %s3523_s7 = int_to_ptr.vmem [resolvable:$false] %s3522_s7 }
0x101b   : > { %p3520_p4 = pnand %p3519_p2, %p3815_p3  ;;  %s3524_s1 = scalar_lea.vmem %s3523_s7, 256 }
0x101c   : > { %s3139_s29 = sshll.u32 %s4423_s6, 7  ;;  %p3525_p6 = scmp.lt.s32.totalorder %s2774_s20, %s3523_s7 }
0x101d   : > { %s4428_s28 = sand.u32 1, %s4424_s23   ;;  %p3521_p5 = pneg %p3520_p4 }
0x101e   : > { %s2771_s16 = scalar_lea.hbm %s4426_s22, %s3139_s29  ;;  %s2760_s27 = scalar_lea.sflag [#allocation4], %s4428_s28 }
0x101f   : > { %p3526_p7 = scmp.lt.s32.totalorder %s3524_s1, %s3518_s8 }
0x1021   : > { %p3527_p8 = por %p3526_p7, %p3525_p6 }
0x1023   : > { %p3528_p10 = pnand %p3527_p8, %p3521_p5 }
0x1025   : > { %3531 = shalt.err (!%p3528_p10)
}
0x1026   : > { %s3532_s10 = scalar_lea.hbm %s2771_s16, 128  ;;  %s3536_s26 = scalar_lea.hbm %s4426_s22, 256 }
0x1027   : > { %p3533_p11 = scmp.ne.s32.totalorder %s2771_s16, %s3532_s10  ;;  %p3537_p0 = scmp.lt.s32.totalorder %s2771_s16, %s4426_s22 }
0x1028   : > { %p3538_p1 = scmp.lt.s32.totalorder %s3536_s26, %s3532_s10 }
0x1029   : > { %p3534_p12 = pnand %p3533_p11, %p3815_p3 }
0x102a   : > { %p3539_p2 = por %p3538_p1, %p3537_p0 }
0x102b   : > { %p3535_p13 = pneg %p3534_p12 }
0x102d   : > { %p3540_p4 = pnand %p3539_p2, %p3535_p13 }
0x102f   : > { %3543 = shalt.err (!%p3540_p4)
}
0x1030   : > { %3371 = dma.vmem_to_hbm [thread:$0]  (%p3815_p3), %s2774_s20, 128, %s2771_s16, %s2760_s27  }
0x1031 PF: > { %s4429_s0 = sld [smem:[#allocation13_spill]] }
0x1032   : > { %s4430_s15 = sld [smem:[#allocation6_spill]] }
0x1037   : > { %p3377_p5 = scmp.ge.s32.totalorder %s4429_s0, 2 }
0x1038   : > { %s2785_s23 = sand.u32 1, %s4430_s15  }
0x1039   : > { %p3374_p6 = pnand %p3377_p5, %p3825_p9  ;;  %s2786_s29 = scalar_lea.sflag [#allocation4], %s2785_s23 }
0x103b   : > { %p3375_p7 = pneg %p3374_p6 }
0x103d   : > { %3577 = dma.done.wait (%p3375_p7), %s2786_s29, 128  }
0x103e   : > { %3579 = vsyncadd (%p3375_p7), %s2786_s29, 4294967168  ;;  %s39_s0 = sadd.s32 1, %s4429_s0   ;;  %s4432_s27 = sld [smem:[#allocation7_spill]] }
0x103f   : > { %p36_p8 = scmp.ge.s32.totalorder %s39_s0, 6   ;;  %s4433_s3 = sld [smem:[#allocation8_spill]] }
0x1040   : > { %s4434_s7 = sld [smem:[#allocation18_spill]] }
0x1041   : > { %s4435_s28 = sld [smem:[#allocation11_spill]]  ;;  %38 = sbr.rel (!%p36_p8) target bundleno = 27 (0x1b), region = 230 }
0x1042   : > { %s4436_s8 = sld [smem:[#allocation12_spill]] }
0x1043   : > { %s4437_s4 = sld [smem:[#allocation14_spill]] }
0x1044   : > { %s4438_s29 = sld [smem:[#allocation16_spill]] }
0x1046   :  { %2791 = vsyncpa [#allocation4], 1 }
0x1047   :  { %2793 = vsyncpa [#allocation4 + $0x1], 1 }

</bundles_post_ra>
